<compile_context>
chip_gen: v5e
topology: v5e:2x2
jax: 0.10.0
libtpu: 0.0.40
codegen_flags: <defaults>
</compile_context>

<pallas_src>
import jax
import jax.numpy as jnp
from jax.experimental import pallas as pl
from jax.experimental.pallas import tpu as pltpu

BN_EPS = 1e-5
LEAKY_SLOPE = 0.2

# bitrev4 is an involution: used both to permute previousX heights into the
# kernel's row order and to restore natural height order on the output.
_BITREV4 = jnp.array([0, 8, 4, 12, 2, 10, 6, 14, 1, 9, 5, 13, 3, 11, 7, 15],
                     dtype=jnp.int32)


def _bn_train(x):
    # BatchNorm (train mode, default affine): per-feature normalization over
    # all rows, biased variance.  One-pass stats keep the two cross-sublane
    # reductions independent (shorter serial chain); inputs are near
    # zero-mean (pre-BN biases removed), so no catastrophic cancellation.
    inv_n = 1.0 / x.shape[0]
    s1 = jnp.sum(x, axis=0, keepdims=True)
    s2 = jnp.sum(x * x, axis=0, keepdims=True)
    m = s1 * inv_n
    v = jnp.maximum(s2 * inv_n - m * m, 0.0)
    return (x - m) * jax.lax.rsqrt(v + BN_EPS)


def _stack_halves(y):
    # [R, 256] -> [2R, 128]: lane-block split + sublane block stack.  Replaces
    # the interleaving reshape (which would be a lane->sublane shuffle); the
    # resulting bit-reversed-height row order is row-order agnostic for BN and
    # matmuls and is undone in the wrapper.
    return jnp.concatenate([y[:, :128], y[:, 128:]], axis=0)


def _generator_kernel(z_ref, xprev_ref, bg4_ref, wsmall_ref,
                      wfc1_ref, wfc2_ref, wg_ref, out_ref):
    # z_ref      [B, 128]   f32   (z zero-padded 100 -> 128)
    # xprev_ref  [16B, 128] f32   (previousX rows, bit-reversed-height major)
    # bg4_ref    [1, 1]     f32   (SMEM scalar: gConv4 bias)
    # wsmall_ref [3,128,128] bf16 (0: gConv4 generator rows, 1: gConv4
    #                              conditioner rows zero-padded, 2: cConv1^T
    #                              zero-padded to 128 out lanes)
    # wfc1_ref   [128,1024] bf16  (gFc1^T, K zero-padded to 128)
    # wfc2_ref   [1024,256] bf16  (gFc2^T, columns pre-permuted for the view)
    # wg_ref     [3,128,256] bf16 (gConv1..3, kh=0 / kh=1 lane-concatenated)
    # out_ref    [16B, 128] f32
    lrelu = lambda x: jnp.where(x >= 0, x, LEAKY_SLOPE * x)
    relu = lambda x: jnp.maximum(x, 0.0)
    bf16 = lambda x: x.astype(jnp.bfloat16)
    f32 = jnp.float32

    # ---- conditioner layer 1: cConv1 -> cBatchNorm2D -> leaky_relu ---------
    # Conv2d(1, 16, (1,128), stride=(1,2)) on the 128-wide input is one matmul
    # per (b, h) row.  The weight is padded to 128 output lanes; the padded
    # columns are exactly zero after BN and hit zero rows of the gConv4 weight.
    c1 = jnp.dot(bf16(xprev_ref[...]), wsmall_ref[2],
                 preferred_element_type=f32)
    c1 = lrelu(_bn_train(c1))                                   # [16B, 128]

    # ---- generator fully-connected stack ------------------------------------
    h = jnp.dot(bf16(z_ref[...]), wfc1_ref[...], preferred_element_type=f32)
    h = relu(_bn_train(h))                                      # [B, 1024]

    # fc2 columns pre-permuted in the wrapper so lanes = (height_bit, channel):
    # z.view(B, 128, 2, 1) becomes a lane-block split + sublane stack.
    h = jnp.dot(bf16(h), wfc2_ref[...], preferred_element_type=f32)
    h = relu(_bn_train(h))                                      # [B, 256]
    g = _stack_halves(h)                                        # [2B, 128]

    # ---- three ConvTranspose2d(128,128,(2,1),stride=(2,2)) blocks ----------
    # stride == kernel => no overlap: out[b, :, 2h+kh] = in[b, :, h] @ W_kh.
    # W packed as [128, 256] = concat over kh; the two kh lane-halves are
    # stacked along sublanes (no interleave).
    for i in range(3):
        y = jnp.dot(bf16(g), wg_ref[i], preferred_element_type=f32)
        g = relu(_bn_train(_stack_halves(y)))                   # [4B/8B/16B,128]

    # ---- concat_features + gConv4 + sigmoid ---------------------------------
    # Two accumulating dots instead of a K=144 lane concat (no lane relayout).
    o = jnp.dot(bf16(g), wsmall_ref[0], preferred_element_type=f32)
    o = o + jnp.dot(bf16(c1), wsmall_ref[1], preferred_element_type=f32)
    out_ref[...] = jax.nn.sigmoid(o + bg4_ref[0, 0])            # [16B, 128]


def init_params(key):
    """Deterministic synthetic parameters in the PyTorch layout (f32)."""
    ks = jax.random.split(key, 16)

    def n(k, shape, scale=0.05):
        return (scale * jax.random.normal(k, shape)).astype(jnp.float32)

    return {
        "cConv1_w": n(ks[0], (16, 1, 1, 128)), "cConv1_b": n(ks[1], (16,)),
        "gFc1_w": n(ks[2], (1024, 100)),       "gFc1_b": n(ks[3], (1024,)),
        "gFc2_w": n(ks[4], (256, 1024)),       "gFc2_b": n(ks[5], (256,)),
        "gConv1_w": n(ks[6], (128, 128, 2, 1)), "gConv1_b": n(ks[7], (128,)),
        "gConv2_w": n(ks[8], (128, 128, 2, 1)), "gConv2_b": n(ks[9], (128,)),
        "gConv3_w": n(ks[10], (128, 128, 2, 1)), "gConv3_b": n(ks[11], (128,)),
        "gConv4_w": n(ks[12], (144, 1, 1, 128)), "gConv4_b": n(ks[13], (1,)),
    }


def pack_params(p):
    """Convert PyTorch-layout params to the kernel's packed bf16 layout.

    Pre-BN biases (cConv1, gFc1, gFc2, gConv1..3) are dropped: with the
    default-affine, training-mode BatchNorm that immediately follows them,
    a per-feature constant is exactly cancelled by the mean subtraction.
    """
    perm = (jnp.arange(256) % 128) * 2 + (jnp.arange(256) // 128)

    w_fc1 = jnp.zeros((128, 1024), jnp.float32).at[:100].set(p["gFc1_w"].T)
    w_fc2 = p["gFc2_w"].T[:, perm]                                  # [1024,256]

    def deconv_pack(w):                                             # [128,128,2,1]
        return jnp.concatenate([w[:, :, 0, 0], w[:, :, 1, 0]], axis=1)

    w_g = jnp.stack([deconv_pack(p["gConv1_w"]),
                     deconv_pack(p["gConv2_w"]),
                     deconv_pack(p["gConv3_w"])])                   # [3,128,256]

    w4 = p["gConv4_w"][:, 0, 0, :]                                  # [144,128]
    wg4_g = w4[:128]                                                # generator rows
    wg4_c = jnp.zeros((128, 128), jnp.float32).at[:16].set(w4[128:144])
    wc1 = jnp.zeros((128, 128), jnp.float32).at[:, :16].set(
        p["cConv1_w"][:, 0, 0, :].T)                                # [128(k),128]
    w_small = jnp.stack([wg4_g, wg4_c, wc1])                        # [3,128,128]

    return {
        "w_fc1": w_fc1.astype(jnp.bfloat16),
        "w_fc2": w_fc2.astype(jnp.bfloat16),
        "w_g": w_g.astype(jnp.bfloat16),
        "w_small": w_small.astype(jnp.bfloat16),
        "b_g4": p["gConv4_b"].reshape(1, 1).astype(jnp.float32),
    }


@jax.jit
def generator_forward(z, previous_x, kparams):
    """Runs the generator.  Accepts a single call (z [B,100],
    previousX [B,1,16,128]) or S stacked calls (leading S axis); stacked calls
    share one pallas_call so the ~1 MB of weights is fetched once and stays
    VMEM-resident across the grid."""
    squeeze = (z.ndim == 2)
    if squeeze:
        z = z[None]
        previous_x = previous_x[None]
    S, B = z.shape[0], z.shape[1]
    R = 16 * B

    z_pad = jnp.pad(z.astype(jnp.float32),
                    ((0, 0), (0, 0), (0, 128 - z.shape[-1])))

    # Present previousX rows in (bit-reversed-height major, batch minor) order
    # so the conditioner output lines up with the generator feature map
    # without any in-kernel row shuffles.
    xp = previous_x.astype(jnp.float32)[:, :, 0]                    # [S,B,16,128]
    xp = xp[:, :, _BITREV4, :]
    xprev_k = jnp.transpose(xp, (0, 2, 1, 3)).reshape(S, R, 128)

    out_k = pl.pallas_call(
        _generator_kernel,
        out_shape=jax.ShapeDtypeStruct((S, R, 128), jnp.float32),
        grid=(S,),
        in_specs=[
            pl.BlockSpec((None, B, 128), lambda s: (s, 0, 0)),      # z (per step)
            pl.BlockSpec((None, R, 128), lambda s: (s, 0, 0)),      # previousX
            pl.BlockSpec(memory_space=pltpu.MemorySpace.SMEM),      # gConv4 bias
            pl.BlockSpec((3, 128, 128), lambda s: (0, 0, 0)),       # small slab
            pl.BlockSpec((128, 1024), lambda s: (0, 0)),            # gFc1
            pl.BlockSpec((1024, 256), lambda s: (0, 0)),            # gFc2
            pl.BlockSpec((3, 128, 256), lambda s: (0, 0, 0)),       # gConv1..3
        ],
        out_specs=pl.BlockSpec((None, R, 128), lambda s: (s, 0, 0)),
        compiler_params=pltpu.CompilerParams(
            dimension_semantics=("parallel",)),                     # 2nd TC on v7x
    )(z_pad, xprev_k, kparams["b_g4"], kparams["w_small"],
      kparams["w_fc1"], kparams["w_fc2"], kparams["w_g"])

    # Undo the bit-reversed height order (tiny gather, fused into this jit).
    out = out_k.reshape(S, 16, B, 128)[:, _BITREV4]                 # natural H
    out = jnp.transpose(out, (0, 2, 1, 3)).reshape(S, B, 1, 16, 128)
    return out[0] if squeeze else out


# ------------------------- pure-JAX f32 reference ---------------------------
def _bn_ref(x, axes):
    m = jnp.mean(x, axis=axes, keepdims=True)
    v = jnp.mean(jnp.square(x - m), axis=axes, keepdims=True)       # biased
    return (x - m) / jnp.sqrt(v + BN_EPS)


def reference_forward(z, previous_x, p):
    """PyTorch-semantics reference (f32, biases included, natural layout)."""
    B = z.shape[0]
    lrelu = lambda x: jnp.where(x >= 0, x, LEAKY_SLOPE * x)
    x = previous_x.astype(jnp.float32)[:, 0]                        # [B,16,128]
    c1 = jnp.einsum("bhk,ok->bho", x, p["cConv1_w"][:, 0, 0, :]) + p["cConv1_b"]
    c1 = lrelu(_bn_ref(c1, (0, 1)))                                 # [B,16,16]
    # TODO(synk): cConv2..cConv4 branches are computed by the PyTorch module
    # but never reach the returned tensor; they are intentionally omitted.

    h = z.astype(jnp.float32) @ p["gFc1_w"].T + p["gFc1_b"]
    h = jnp.maximum(_bn_ref(h, (0,)), 0.0)
    h = h @ p["gFc2_w"].T + p["gFc2_b"]
    h = jnp.maximum(_bn_ref(h, (0,)), 0.0)
    g = jnp.transpose(h.reshape(B, 128, 2), (0, 2, 1))              # [B,H=2,C]
    for name in ("gConv1", "gConv2", "gConv3"):
        w = p[name + "_w"][:, :, :, 0]                              # [C,O,2]
        y = jnp.einsum("bhc,cok->bhko", g, w).reshape(B, -1, 128)
        y = y + p[name + "_b"]
        g = jnp.maximum(_bn_ref(y, (0, 1)), 0.0)                    # [B,2H,128]
    gc = jnp.concatenate([g, c1], axis=-1)                          # [B,16,144]
    o = jnp.einsum("bhc,ck->bhk", gc, p["gConv4_w"][:, 0, 0, :]) + p["gConv4_b"]
    return jax.nn.sigmoid(o).reshape(B, 1, 16, 128)


if __name__ == "__main__":
    key = jax.random.PRNGKey(0)
    kz, kx, kp = jax.random.split(key, 3)
    S, B = 3, 8                                   # 3 stacked generator calls
    z = jax.random.normal(kz, (S, B, 100), dtype=jnp.float32)
    previous_x = jax.random.normal(kx, (S, B, 1, 16, 128), dtype=jnp.float32)

    params = init_params(kp)                      # PyTorch-layout f32 params
    kparams = pack_params(params)                 # packed bf16 kernel layout

    out = generator_forward(z, previous_x, kparams)
    out = jax.block_until_ready(out)
    assert out.shape == (S, B, 1, 16, 128), out.shape
    assert bool(jnp.all(jnp.isfinite(out)))
    assert bool(jnp.all((out >= 0.0) & (out <= 1.0)))   # sigmoid range

    # Tolerance check against the fp32 reference (per-invocation batch stats).
    ref = jnp.stack([reference_forward(z[s], previous_x[s], params)
                     for s in range(S)])
    max_err = float(jnp.max(jnp.abs(out - ref)))
    assert max_err < 5e-2, f"max |kernel - f32 reference| = {max_err}"
    print("KERNEL_OK")
</pallas_src>

<mosaic_0001>
module attributes {stable_mosaic.version = 11 : i64} {
  func.func @_generator_kernel(%arg0: i32, %arg1: memref<1x8x128xf32, #tpu.memory_space<vmem>>, %arg2: memref<1x128x128xf32, #tpu.memory_space<vmem>>, %arg3: memref<1x1xf32, #tpu.memory_space<smem>>, %arg4: memref<3x128x128xbf16, #tpu.memory_space<vmem>>, %arg5: memref<128x1024xbf16, #tpu.memory_space<vmem>>, %arg6: memref<1024x256xbf16, #tpu.memory_space<vmem>>, %arg7: memref<3x128x256xbf16, #tpu.memory_space<vmem>>, %arg8: memref<1x128x128xf32, #tpu.memory_space<vmem>>) attributes {dimension_semantics = [#tpu.dimension_semantics<parallel>], iteration_bounds = array<i64: 3>, scalar_prefetch = 0 : i64, scratch_operands = 0 : i64, tpu.core_type = #tpu.core_type<tc>, window_params = [{transform_indices = @transform_0, window_bounds = array<i64: 1, 8, 128>}, {transform_indices = @transform_1, window_bounds = array<i64: 1, 128, 128>}, {transform_indices = @transform_2, window_bounds = array<i64: 1, 1>}, {pipeline_mode = #tpu.pipeline_mode<synchronous>, transform_indices = @transform_3, window_bounds = array<i64: 3, 128, 128>}, {pipeline_mode = #tpu.pipeline_mode<synchronous>, transform_indices = @transform_4, window_bounds = array<i64: 128, 1024>}, {pipeline_mode = #tpu.pipeline_mode<synchronous>, transform_indices = @transform_5, window_bounds = array<i64: 1024, 256>}, {pipeline_mode = #tpu.pipeline_mode<synchronous>, transform_indices = @transform_6, window_bounds = array<i64: 3, 128, 256>}, {transform_indices = @transform_7, window_bounds = array<i64: 1, 128, 128>}]} {
    %c0 = arith.constant 0 : index
    %c0_0 = arith.constant 0 : index
    %c0_1 = arith.constant 0 : index
    %0 = vector.load %arg2[%c0, %c0_0, %c0_1] : memref<1x128x128xf32, #tpu.memory_space<vmem>>, vector<1x128x128xf32>
    %1 = vector.shape_cast %0 : vector<1x128x128xf32> to vector<128x128xf32>
    %2 = arith.truncf %1 : vector<128x128xf32> to vector<128x128xbf16>
    %c2 = arith.constant 2 : index
    %c0_2 = arith.constant 0 : index
    %c0_3 = arith.constant 0 : index
    %3 = vector.load %arg4[%c2, %c0_2, %c0_3] : memref<3x128x128xbf16, #tpu.memory_space<vmem>>, vector<1x128x128xbf16>
    %4 = vector.shape_cast %3 : vector<1x128x128xbf16> to vector<128x128xbf16>
    %cst = arith.constant dense<0.000000e+00> : vector<128x128xf32>
    %5 = tpu.matmul %2, %4, %cst {dimension_numbers = #tpu.dot_dimension_numbers<[1], [0], [0], [1], [0, 0, 1, 1], [], []>} : vector<128x128xbf16>, vector<128x128xbf16>, vector<128x128xf32> -> vector<128x128xf32>
    %cst_4 = arith.constant dense<0.000000e+00> : vector<128xf32>
    %6 = vector.multi_reduction <add>, %5, %cst_4 [0] : vector<128x128xf32> to vector<128xf32>
    %7 = vector.shape_cast %6 : vector<128xf32> to vector<1x128xf32>
    %8 = arith.mulf %5, %5 : vector<128x128xf32>
    %cst_5 = arith.constant dense<0.000000e+00> : vector<128xf32>
    %9 = vector.multi_reduction <add>, %8, %cst_5 [0] : vector<128x128xf32> to vector<128xf32>
    %10 = vector.shape_cast %9 : vector<128xf32> to vector<1x128xf32>
    %cst_6 = arith.constant 7.812500e-03 : f32
    %11 = vector.broadcast %cst_6 : f32 to vector<1x128xf32>
    %12 = arith.mulf %7, %11 : vector<1x128xf32>
    %cst_7 = arith.constant 7.812500e-03 : f32
    %13 = vector.broadcast %cst_7 : f32 to vector<1x128xf32>
    %14 = arith.mulf %10, %13 : vector<1x128xf32>
    %15 = arith.mulf %12, %12 : vector<1x128xf32>
    %16 = arith.subf %14, %15 : vector<1x128xf32>
    %cst_8 = arith.constant 0.000000e+00 : f32
    %17 = vector.broadcast %cst_8 : f32 to vector<1x128xf32>
    %18 = arith.maximumf %16, %17 : vector<1x128xf32>
    %19 = vector.broadcast %12 : vector<1x128xf32> to vector<128x128xf32>
    %20 = arith.subf %5, %19 : vector<128x128xf32>
    %cst_9 = arith.constant 9.99999974E-6 : f32
    %21 = vector.broadcast %cst_9 : f32 to vector<1x128xf32>
    %22 = arith.addf %18, %21 : vector<1x128xf32>
    %23 = math.rsqrt %22 : vector<1x128xf32>
    %24 = vector.broadcast %23 : vector<1x128xf32> to vector<128x128xf32>
    %25 = arith.mulf %20, %24 : vector<128x128xf32>
    %cst_10 = arith.constant 0.000000e+00 : f32
    %26 = vector.broadcast %cst_10 : f32 to vector<128x128xf32>
    %27 = arith.cmpf oge, %25, %26 : vector<128x128xf32>
    %cst_11 = arith.constant 2.000000e-01 : f32
    %28 = vector.broadcast %cst_11 : f32 to vector<128x128xf32>
    %29 = arith.mulf %28, %25 : vector<128x128xf32>
    %30 = arith.select %27, %25, %29 : vector<128x128xi1>, vector<128x128xf32>
    %c0_12 = arith.constant 0 : index
    %c0_13 = arith.constant 0 : index
    %c0_14 = arith.constant 0 : index
    %31 = vector.load %arg1[%c0_12, %c0_13, %c0_14] : memref<1x8x128xf32, #tpu.memory_space<vmem>>, vector<1x8x128xf32>
    %32 = vector.shape_cast %31 : vector<1x8x128xf32> to vector<8x128xf32>
    %33 = arith.truncf %32 : vector<8x128xf32> to vector<8x128xbf16>
    %c0_15 = arith.constant 0 : index
    %c0_16 = arith.constant 0 : index
    %34 = vector.load %arg5[%c0_15, %c0_16] : memref<128x1024xbf16, #tpu.memory_space<vmem>>, vector<128x1024xbf16>
    %cst_17 = arith.constant dense<0.000000e+00> : vector<8x1024xf32>
    %35 = tpu.matmul %33, %34, %cst_17 {dimension_numbers = #tpu.dot_dimension_numbers<[1], [0], [0], [1], [0, 0, 1, 1], [], []>} : vector<8x128xbf16>, vector<128x1024xbf16>, vector<8x1024xf32> -> vector<8x1024xf32>
    %cst_18 = arith.constant dense<0.000000e+00> : vector<1024xf32>
    %36 = vector.multi_reduction <add>, %35, %cst_18 [0] : vector<8x1024xf32> to vector<1024xf32>
    %37 = vector.shape_cast %36 : vector<1024xf32> to vector<1x1024xf32>
    %38 = arith.mulf %35, %35 : vector<8x1024xf32>
    %cst_19 = arith.constant dense<0.000000e+00> : vector<1024xf32>
    %39 = vector.multi_reduction <add>, %38, %cst_19 [0] : vector<8x1024xf32> to vector<1024xf32>
    %40 = vector.shape_cast %39 : vector<1024xf32> to vector<1x1024xf32>
    %cst_20 = arith.constant 1.250000e-01 : f32
    %41 = vector.broadcast %cst_20 : f32 to vector<1x1024xf32>
    %42 = arith.mulf %37, %41 : vector<1x1024xf32>
    %cst_21 = arith.constant 1.250000e-01 : f32
    %43 = vector.broadcast %cst_21 : f32 to vector<1x1024xf32>
    %44 = arith.mulf %40, %43 : vector<1x1024xf32>
    %45 = arith.mulf %42, %42 : vector<1x1024xf32>
    %46 = arith.subf %44, %45 : vector<1x1024xf32>
    %cst_22 = arith.constant 0.000000e+00 : f32
    %47 = vector.broadcast %cst_22 : f32 to vector<1x1024xf32>
    %48 = arith.maximumf %46, %47 : vector<1x1024xf32>
    %49 = vector.broadcast %42 : vector<1x1024xf32> to vector<8x1024xf32>
    %50 = arith.subf %35, %49 : vector<8x1024xf32>
    %cst_23 = arith.constant 9.99999974E-6 : f32
    %51 = vector.broadcast %cst_23 : f32 to vector<1x1024xf32>
    %52 = arith.addf %48, %51 : vector<1x1024xf32>
    %53 = math.rsqrt %52 : vector<1x1024xf32>
    %54 = vector.broadcast %53 : vector<1x1024xf32> to vector<8x1024xf32>
    %55 = arith.mulf %50, %54 : vector<8x1024xf32>
    %cst_24 = arith.constant 0.000000e+00 : f32
    %56 = vector.broadcast %cst_24 : f32 to vector<8x1024xf32>
    %57 = arith.maximumf %55, %56 : vector<8x1024xf32>
    %58 = arith.truncf %57 : vector<8x1024xf32> to vector<8x1024xbf16>
    %c0_25 = arith.constant 0 : index
    %c0_26 = arith.constant 0 : index
    %59 = vector.load %arg6[%c0_25, %c0_26] : memref<1024x256xbf16, #tpu.memory_space<vmem>>, vector<1024x256xbf16>
    %cst_27 = arith.constant dense<0.000000e+00> : vector<8x256xf32>
    %60 = tpu.matmul %58, %59, %cst_27 {dimension_numbers = #tpu.dot_dimension_numbers<[1], [0], [0], [1], [0, 0, 1, 1], [], []>} : vector<8x1024xbf16>, vector<1024x256xbf16>, vector<8x256xf32> -> vector<8x256xf32>
    %cst_28 = arith.constant dense<0.000000e+00> : vector<256xf32>
    %61 = vector.multi_reduction <add>, %60, %cst_28 [0] : vector<8x256xf32> to vector<256xf32>
    %62 = vector.shape_cast %61 : vector<256xf32> to vector<1x256xf32>
    %63 = arith.mulf %60, %60 : vector<8x256xf32>
    %cst_29 = arith.constant dense<0.000000e+00> : vector<256xf32>
    %64 = vector.multi_reduction <add>, %63, %cst_29 [0] : vector<8x256xf32> to vector<256xf32>
    %65 = vector.shape_cast %64 : vector<256xf32> to vector<1x256xf32>
    %cst_30 = arith.constant 1.250000e-01 : f32
    %66 = vector.broadcast %cst_30 : f32 to vector<1x256xf32>
    %67 = arith.mulf %62, %66 : vector<1x256xf32>
    %cst_31 = arith.constant 1.250000e-01 : f32
    %68 = vector.broadcast %cst_31 : f32 to vector<1x256xf32>
    %69 = arith.mulf %65, %68 : vector<1x256xf32>
    %70 = arith.mulf %67, %67 : vector<1x256xf32>
    %71 = arith.subf %69, %70 : vector<1x256xf32>
    %cst_32 = arith.constant 0.000000e+00 : f32
    %72 = vector.broadcast %cst_32 : f32 to vector<1x256xf32>
    %73 = arith.maximumf %71, %72 : vector<1x256xf32>
    %74 = vector.broadcast %67 : vector<1x256xf32> to vector<8x256xf32>
    %75 = arith.subf %60, %74 : vector<8x256xf32>
    %cst_33 = arith.constant 9.99999974E-6 : f32
    %76 = vector.broadcast %cst_33 : f32 to vector<1x256xf32>
    %77 = arith.addf %73, %76 : vector<1x256xf32>
    %78 = math.rsqrt %77 : vector<1x256xf32>
    %79 = vector.broadcast %78 : vector<1x256xf32> to vector<8x256xf32>
    %80 = arith.mulf %75, %79 : vector<8x256xf32>
    %cst_34 = arith.constant 0.000000e+00 : f32
    %81 = vector.broadcast %cst_34 : f32 to vector<8x256xf32>
    %82 = arith.maximumf %80, %81 : vector<8x256xf32>
    %83 = vector.extract_strided_slice %82 {offsets = [0, 0], sizes = [8, 128], strides = [1, 1]} : vector<8x256xf32> to vector<8x128xf32>
    %84 = vector.extract_strided_slice %82 {offsets = [0, 128], sizes = [8, 128], strides = [1, 1]} : vector<8x256xf32> to vector<8x128xf32>
    %85 = tpu.concatenate %83, %84 in 0 : vector<8x128xf32>, vector<8x128xf32> -> vector<16x128xf32>
    %86 = arith.truncf %85 : vector<16x128xf32> to vector<16x128xbf16>
    %c0_35 = arith.constant 0 : index
    %c0_36 = arith.constant 0 : index
    %c0_37 = arith.constant 0 : index
    %87 = vector.load %arg7[%c0_35, %c0_36, %c0_37] : memref<3x128x256xbf16, #tpu.memory_space<vmem>>, vector<1x128x256xbf16>
    %88 = vector.shape_cast %87 : vector<1x128x256xbf16> to vector<128x256xbf16>
    %cst_38 = arith.constant dense<0.000000e+00> : vector<16x256xf32>
    %89 = tpu.matmul %86, %88, %cst_38 {dimension_numbers = #tpu.dot_dimension_numbers<[1], [0], [0], [1], [0, 0, 1, 1], [], []>} : vector<16x128xbf16>, vector<128x256xbf16>, vector<16x256xf32> -> vector<16x256xf32>
    %90 = vector.extract_strided_slice %89 {offsets = [0, 0], sizes = [16, 128], strides = [1, 1]} : vector<16x256xf32> to vector<16x128xf32>
    %91 = vector.extract_strided_slice %89 {offsets = [0, 128], sizes = [16, 128], strides = [1, 1]} : vector<16x256xf32> to vector<16x128xf32>
    %92 = tpu.concatenate %90, %91 in 0 : vector<16x128xf32>, vector<16x128xf32> -> vector<32x128xf32>
    %cst_39 = arith.constant dense<0.000000e+00> : vector<128xf32>
    %93 = vector.multi_reduction <add>, %92, %cst_39 [0] : vector<32x128xf32> to vector<128xf32>
    %94 = vector.shape_cast %93 : vector<128xf32> to vector<1x128xf32>
    %95 = arith.mulf %92, %92 : vector<32x128xf32>
    %cst_40 = arith.constant dense<0.000000e+00> : vector<128xf32>
    %96 = vector.multi_reduction <add>, %95, %cst_40 [0] : vector<32x128xf32> to vector<128xf32>
    %97 = vector.shape_cast %96 : vector<128xf32> to vector<1x128xf32>
    %cst_41 = arith.constant 3.125000e-02 : f32
    %98 = vector.broadcast %cst_41 : f32 to vector<1x128xf32>
    %99 = arith.mulf %94, %98 : vector<1x128xf32>
    %cst_42 = arith.constant 3.125000e-02 : f32
    %100 = vector.broadcast %cst_42 : f32 to vector<1x128xf32>
    %101 = arith.mulf %97, %100 : vector<1x128xf32>
    %102 = arith.mulf %99, %99 : vector<1x128xf32>
    %103 = arith.subf %101, %102 : vector<1x128xf32>
    %cst_43 = arith.constant 0.000000e+00 : f32
    %104 = vector.broadcast %cst_43 : f32 to vector<1x128xf32>
    %105 = arith.maximumf %103, %104 : vector<1x128xf32>
    %106 = vector.broadcast %99 : vector<1x128xf32> to vector<32x128xf32>
    %107 = arith.subf %92, %106 : vector<32x128xf32>
    %cst_44 = arith.constant 9.99999974E-6 : f32
    %108 = vector.broadcast %cst_44 : f32 to vector<1x128xf32>
    %109 = arith.addf %105, %108 : vector<1x128xf32>
    %110 = math.rsqrt %109 : vector<1x128xf32>
    %111 = vector.broadcast %110 : vector<1x128xf32> to vector<32x128xf32>
    %112 = arith.mulf %107, %111 : vector<32x128xf32>
    %cst_45 = arith.constant 0.000000e+00 : f32
    %113 = vector.broadcast %cst_45 : f32 to vector<32x128xf32>
    %114 = arith.maximumf %112, %113 : vector<32x128xf32>
    %115 = arith.truncf %114 : vector<32x128xf32> to vector<32x128xbf16>
    %c1 = arith.constant 1 : index
    %c0_46 = arith.constant 0 : index
    %c0_47 = arith.constant 0 : index
    %116 = vector.load %arg7[%c1, %c0_46, %c0_47] : memref<3x128x256xbf16, #tpu.memory_space<vmem>>, vector<1x128x256xbf16>
    %117 = vector.shape_cast %116 : vector<1x128x256xbf16> to vector<128x256xbf16>
    %cst_48 = arith.constant dense<0.000000e+00> : vector<32x256xf32>
    %118 = tpu.matmul %115, %117, %cst_48 {dimension_numbers = #tpu.dot_dimension_numbers<[1], [0], [0], [1], [0, 0, 1, 1], [], []>} : vector<32x128xbf16>, vector<128x256xbf16>, vector<32x256xf32> -> vector<32x256xf32>
    %119 = vector.extract_strided_slice %118 {offsets = [0, 0], sizes = [32, 128], strides = [1, 1]} : vector<32x256xf32> to vector<32x128xf32>
    %120 = vector.extract_strided_slice %118 {offsets = [0, 128], sizes = [32, 128], strides = [1, 1]} : vector<32x256xf32> to vector<32x128xf32>
    %121 = tpu.concatenate %119, %120 in 0 : vector<32x128xf32>, vector<32x128xf32> -> vector<64x128xf32>
    %cst_49 = arith.constant dense<0.000000e+00> : vector<128xf32>
    %122 = vector.multi_reduction <add>, %121, %cst_49 [0] : vector<64x128xf32> to vector<128xf32>
    %123 = vector.shape_cast %122 : vector<128xf32> to vector<1x128xf32>
    %124 = arith.mulf %121, %121 : vector<64x128xf32>
    %cst_50 = arith.constant dense<0.000000e+00> : vector<128xf32>
    %125 = vector.multi_reduction <add>, %124, %cst_50 [0] : vector<64x128xf32> to vector<128xf32>
    %126 = vector.shape_cast %125 : vector<128xf32> to vector<1x128xf32>
    %cst_51 = arith.constant 1.562500e-02 : f32
    %127 = vector.broadcast %cst_51 : f32 to vector<1x128xf32>
    %128 = arith.mulf %123, %127 : vector<1x128xf32>
    %cst_52 = arith.constant 1.562500e-02 : f32
    %129 = vector.broadcast %cst_52 : f32 to vector<1x128xf32>
    %130 = arith.mulf %126, %129 : vector<1x128xf32>
    %131 = arith.mulf %128, %128 : vector<1x128xf32>
    %132 = arith.subf %130, %131 : vector<1x128xf32>
    %cst_53 = arith.constant 0.000000e+00 : f32
    %133 = vector.broadcast %cst_53 : f32 to vector<1x128xf32>
    %134 = arith.maximumf %132, %133 : vector<1x128xf32>
    %135 = vector.broadcast %128 : vector<1x128xf32> to vector<64x128xf32>
    %136 = arith.subf %121, %135 : vector<64x128xf32>
    %cst_54 = arith.constant 9.99999974E-6 : f32
    %137 = vector.broadcast %cst_54 : f32 to vector<1x128xf32>
    %138 = arith.addf %134, %137 : vector<1x128xf32>
    %139 = math.rsqrt %138 : vector<1x128xf32>
    %140 = vector.broadcast %139 : vector<1x128xf32> to vector<64x128xf32>
    %141 = arith.mulf %136, %140 : vector<64x128xf32>
    %cst_55 = arith.constant 0.000000e+00 : f32
    %142 = vector.broadcast %cst_55 : f32 to vector<64x128xf32>
    %143 = arith.maximumf %141, %142 : vector<64x128xf32>
    %144 = arith.truncf %143 : vector<64x128xf32> to vector<64x128xbf16>
    %c2_56 = arith.constant 2 : index
    %c0_57 = arith.constant 0 : index
    %c0_58 = arith.constant 0 : index
    %145 = vector.load %arg7[%c2_56, %c0_57, %c0_58] : memref<3x128x256xbf16, #tpu.memory_space<vmem>>, vector<1x128x256xbf16>
    %146 = vector.shape_cast %145 : vector<1x128x256xbf16> to vector<128x256xbf16>
    %cst_59 = arith.constant dense<0.000000e+00> : vector<64x256xf32>
    %147 = tpu.matmul %144, %146, %cst_59 {dimension_numbers = #tpu.dot_dimension_numbers<[1], [0], [0], [1], [0, 0, 1, 1], [], []>} : vector<64x128xbf16>, vector<128x256xbf16>, vector<64x256xf32> -> vector<64x256xf32>
    %148 = vector.extract_strided_slice %147 {offsets = [0, 0], sizes = [64, 128], strides = [1, 1]} : vector<64x256xf32> to vector<64x128xf32>
    %149 = vector.extract_strided_slice %147 {offsets = [0, 128], sizes = [64, 128], strides = [1, 1]} : vector<64x256xf32> to vector<64x128xf32>
    %150 = tpu.concatenate %148, %149 in 0 : vector<64x128xf32>, vector<64x128xf32> -> vector<128x128xf32>
    %cst_60 = arith.constant dense<0.000000e+00> : vector<128xf32>
    %151 = vector.multi_reduction <add>, %150, %cst_60 [0] : vector<128x128xf32> to vector<128xf32>
    %152 = vector.shape_cast %151 : vector<128xf32> to vector<1x128xf32>
    %153 = arith.mulf %150, %150 : vector<128x128xf32>
    %cst_61 = arith.constant dense<0.000000e+00> : vector<128xf32>
    %154 = vector.multi_reduction <add>, %153, %cst_61 [0] : vector<128x128xf32> to vector<128xf32>
    %155 = vector.shape_cast %154 : vector<128xf32> to vector<1x128xf32>
    %cst_62 = arith.constant 7.812500e-03 : f32
    %156 = vector.broadcast %cst_62 : f32 to vector<1x128xf32>
    %157 = arith.mulf %152, %156 : vector<1x128xf32>
    %cst_63 = arith.constant 7.812500e-03 : f32
    %158 = vector.broadcast %cst_63 : f32 to vector<1x128xf32>
    %159 = arith.mulf %155, %158 : vector<1x128xf32>
    %160 = arith.mulf %157, %157 : vector<1x128xf32>
    %161 = arith.subf %159, %160 : vector<1x128xf32>
    %cst_64 = arith.constant 0.000000e+00 : f32
    %162 = vector.broadcast %cst_64 : f32 to vector<1x128xf32>
    %163 = arith.maximumf %161, %162 : vector<1x128xf32>
    %164 = vector.broadcast %157 : vector<1x128xf32> to vector<128x128xf32>
    %165 = arith.subf %150, %164 : vector<128x128xf32>
    %cst_65 = arith.constant 9.99999974E-6 : f32
    %166 = vector.broadcast %cst_65 : f32 to vector<1x128xf32>
    %167 = arith.addf %163, %166 : vector<1x128xf32>
    %168 = math.rsqrt %167 : vector<1x128xf32>
    %169 = vector.broadcast %168 : vector<1x128xf32> to vector<128x128xf32>
    %170 = arith.mulf %165, %169 : vector<128x128xf32>
    %cst_66 = arith.constant 0.000000e+00 : f32
    %171 = vector.broadcast %cst_66 : f32 to vector<128x128xf32>
    %172 = arith.maximumf %170, %171 : vector<128x128xf32>
    %173 = arith.truncf %172 : vector<128x128xf32> to vector<128x128xbf16>
    %c0_67 = arith.constant 0 : index
    %c0_68 = arith.constant 0 : index
    %c0_69 = arith.constant 0 : index
    %174 = vector.load %arg4[%c0_67, %c0_68, %c0_69] : memref<3x128x128xbf16, #tpu.memory_space<vmem>>, vector<1x128x128xbf16>
    %175 = vector.shape_cast %174 : vector<1x128x128xbf16> to vector<128x128xbf16>
    %cst_70 = arith.constant dense<0.000000e+00> : vector<128x128xf32>
    %176 = tpu.matmul %173, %175, %cst_70 {dimension_numbers = #tpu.dot_dimension_numbers<[1], [0], [0], [1], [0, 0, 1, 1], [], []>} : vector<128x128xbf16>, vector<128x128xbf16>, vector<128x128xf32> -> vector<128x128xf32>
    %177 = arith.truncf %30 : vector<128x128xf32> to vector<128x128xbf16>
    %c1_71 = arith.constant 1 : index
    %c0_72 = arith.constant 0 : index
    %c0_73 = arith.constant 0 : index
    %178 = vector.load %arg4[%c1_71, %c0_72, %c0_73] : memref<3x128x128xbf16, #tpu.memory_space<vmem>>, vector<1x128x128xbf16>
    %179 = vector.shape_cast %178 : vector<1x128x128xbf16> to vector<128x128xbf16>
    %cst_74 = arith.constant dense<0.000000e+00> : vector<128x128xf32>
    %180 = tpu.matmul %177, %179, %cst_74 {dimension_numbers = #tpu.dot_dimension_numbers<[1], [0], [0], [1], [0, 0, 1, 1], [], []>} : vector<128x128xbf16>, vector<128x128xbf16>, vector<128x128xf32> -> vector<128x128xf32>
    %181 = arith.addf %176, %180 : vector<128x128xf32>
    %c0_75 = arith.constant 0 : index
    %c0_76 = arith.constant 0 : index
    %182 = memref.load %arg3[%c0_75, %c0_76] : memref<1x1xf32, #tpu.memory_space<smem>>
    %183 = vector.broadcast %182 : f32 to vector<128x128xf32>
    %184 = arith.addf %181, %183 : vector<128x128xf32>
    %185 = arith.negf %184 : vector<128x128xf32>
    %186 = math.exp %185 : vector<128x128xf32>
    %cst_77 = arith.constant 1.000000e+00 : f32
    %187 = vector.broadcast %cst_77 : f32 to vector<128x128xf32>
    %188 = arith.addf %187, %186 : vector<128x128xf32>
    %189 = arith.divf %187, %188 : vector<128x128xf32>
    %c0_78 = arith.constant 0 : index
    %c0_79 = arith.constant 0 : index
    %c0_80 = arith.constant 0 : index
    %190 = vector.load %arg8[%c0_78, %c0_79, %c0_80] : memref<1x128x128xf32, #tpu.memory_space<vmem>>, vector<1x128x128xf32>
    %191 = vector.shape_cast %190 : vector<1x128x128xf32> to vector<128x128xf32>
    %192 = vector.shape_cast %189 : vector<128x128xf32> to vector<1x128x128xf32>
    tpu.vector_store %arg8[%c0_78, %c0_79, %c0_80], %192 {strides = array<i32>} : memref<1x128x128xf32, #tpu.memory_space<vmem>>, vector<1x128x128xf32>,
    return
  }
  func.func @transform_0(%arg0: i32) -> (i32, i32, i32) {
    %c0_i32 = arith.constant 0 : i32
    %c0_i32_0 = arith.constant 0 : i32
    %c0_i32_1 = arith.constant 0 : i32
    return %arg0, %c0_i32, %c0_i32_0 : i32, i32, i32
  }
  func.func @transform_1(%arg0: i32) -> (i32, i32, i32) {
    %c0_i32 = arith.constant 0 : i32
    %c0_i32_0 = arith.constant 0 : i32
    %c0_i32_1 = arith.constant 0 : i32
    return %arg0, %c0_i32, %c0_i32_0 : i32, i32, i32
  }
  func.func @transform_2(%arg0: i32) -> (i32, i32) {
    %c0_i32 = arith.constant 0 : i32
    %c0_i32_0 = arith.constant 0 : i32
    %c0_i32_1 = arith.constant 0 : i32
    return %c0_i32, %c0_i32_0 : i32, i32
  }
  func.func @transform_3(%arg0: i32) -> (i32, i32, i32) {
    %c0_i32 = arith.constant 0 : i32
    %c0_i32_0 = arith.constant 0 : i32
    %c0_i32_1 = arith.constant 0 : i32
    %c0_i32_2 = arith.constant 0 : i32
    return %c0_i32, %c0_i32_0, %c0_i32_1 : i32, i32, i32
  }
  func.func @transform_4(%arg0: i32) -> (i32, i32) {
    %c0_i32 = arith.constant 0 : i32
    %c0_i32_0 = arith.constant 0 : i32
    %c0_i32_1 = arith.constant 0 : i32
    return %c0_i32, %c0_i32_0 : i32, i32
  }
  func.func @transform_5(%arg0: i32) -> (i32, i32) {
    %c0_i32 = arith.constant 0 : i32
    %c0_i32_0 = arith.constant 0 : i32
    %c0_i32_1 = arith.constant 0 : i32
    return %c0_i32, %c0_i32_0 : i32, i32
  }
  func.func @transform_6(%arg0: i32) -> (i32, i32, i32) {
    %c0_i32 = arith.constant 0 : i32
    %c0_i32_0 = arith.constant 0 : i32
    %c0_i32_1 = arith.constant 0 : i32
    %c0_i32_2 = arith.constant 0 : i32
    return %c0_i32, %c0_i32_0, %c0_i32_1 : i32, i32, i32
  }
  func.func @transform_7(%arg0: i32) -> (i32, i32, i32) {
    %c0_i32 = arith.constant 0 : i32
    %c0_i32_0 = arith.constant 0 : i32
    %c0_i32_1 = arith.constant 0 : i32
    return %arg0, %c0_i32, %c0_i32_0 : i32, i32, i32
  }
}

</mosaic_0001>

<bundles_post_ra>
// kernel: generator_forward.1
= control target key start
LH: loop header
LB: loop body
LE: loop exit
PB: predicated region body
PF: predicated region fallthrough
CT: control target
= control target key end

     0   :  { %s5263_s26 = smov 0   ;;  %s7626_s0 = inlined_call_operand.vmem [shape: f32[3,8,128], index: 0, kind: input, shape index: {}]   ;;  %s7627_s1 = inlined_call_operand.vmem [shape: f32[3,128,128], index: 1, kind: input, shape index: {}]   ;;  %s7628_s2 = inlined_call_operand.<no memory space> [shape: f32[1,1], index: 2, kind: input, shape index: {}]   ;;  %s7629_s3 = inlined_call_operand.vmem [shape: bf16[3,128,128], index: 3, kind: input, shape index: {}]   ;;  %s7630_s4 = inlined_call_operand.vmem [shape: bf16[128,1024], index: 4, kind: input, shape index: {}]   ;;  %s7631_s5 = inlined_call_operand.vmem [shape: bf16[1024,256], index: 5, kind: input, shape index: {}]   ;;  %s7632_s6 = inlined_call_operand.vmem [shape: bf16[3,128,256], index: 6, kind: input, shape index: {}]   ;;  %s7633_s7 = inlined_call_operand.vmem [shape: f32[3,128,128], index: 7, kind: output, shape index: {}]  }
   0x1   :  { %12 = sst [smem:[#allocation2]] %s7628_s2 }
   0x2 LB: > { %s3698_s27 = sadd.s32 4294967295, %s5218_s26   ;;  %p3702_p0 = scmp.ge.s32.totalorder %s5218_s26, 1  ;;  %s5218_s26 = sphi %s5263_s26, %s18_s26  }
   0x3   : > { %p247_p1 = scmp.lt.s32.totalorder %s5218_s26, 4 }
   0x5   : > { %p248_p2 = pnand %p3702_p0, %p247_p1 }
   0x6   : > { %p283_p3 = scmp.lt.s32.totalorder (!%p248_p2), %s3698_s27, 2  ;;  %s3293_s19 = sld [smem:[#allocation2]] (!%p248_p2) }
   0x7   : > { %251 = sbr.rel (%p248_p2) target bundleno = 1525 (0x5f5), region = 48 }
   0xc   : > { %v4855_v0 = vld [vmem:[%s7629_s3 + $0xb8] sm:$0xff]  ;;  %v3982_v1 = vld [vmem:[%s7630_s4 + $0x1c0] sm:$0xf]  ;;  %v4854_v6 = vld [vmem:[%s7629_s3 + $0xb0] sm:$0xff]  ;;  %s7649_s27 = smov (!%p283_p3, %s3698_s27), 2 }
   0xd   : > { %v4916_v2 = vld [vmem:[%s7630_s4 + $0x1dc] sm:$0xf0]  ;;  %386 = vmatpush.bf16.msra.mxu0 %v4855_v0  ;;  %v4853_v10 = vld [vmem:[%s7629_s3 + $0xa8] sm:$0xff]  ;;  %v3998_v12 = vld [vmem:[%s7630_s4 + $0x1d0] sm:$0xf]  ;;  %s4846_s20 = sshll.u32 %s7649_s27, 7 }
   0xe   : > { %v3983_v3 = vor.u32 %v4916_v2, %v3982_v1  ;;  %v3950_v4 = vld [vmem:[%s7630_s4 + $0x180] sm:$0xf]  ;;  %v4918_v13 = vld [vmem:[%s7630_s4 + $0x1ec] sm:$0xf0]  ;;  %v4851_v26 = vld [vmem:[%s7629_s3 + $0x98] sm:$0xff]  ;;  %s3703_s23 = sshll.u32 %s7649_s27, 3  ;;  %s5380_s2 = scalar_lea.vmem %s7627_s1, %s4846_s20 }
   0xf   : > { %v4908_v5 = vld [vmem:[%s7630_s4 + $0x19c] sm:$0xf0]  ;;  %v3999_v16 = vor.u32 %v4918_v13, %v3998_v12  ;;  %v3966_v17 = vld [vmem:[%s7630_s4 + $0x190] sm:$0xf]  ;;  %v4849_v40 = vld [vmem:[%s7629_s3 + $0x88] sm:$0xff]  ;;  %s286_s29 = scalar_lea.vmem %s7626_s0, %s3703_s23  ;;  %s7593_s24 = scalar_lea.vmem %s7633_s7, %s4846_s20 }
  0x10   : > { %975 = vmatpush.bf16.msra.mxu1 %v3983_v3  ;;  %v3951_v7 = vor.u32 %v4908_v5, %v3950_v4  ;;  %v3918_v8 = vld [vmem:[%s7630_s4 + $0x140] sm:$0xf]  ;;  %v4910_v18 = vld [vmem:[%s7630_s4 + $0x1ac] sm:$0xf0]  ;;  %v4912_v47 = vld [vmem:[%s7630_s4 + $0x1c4] sm:$0xf] }
  0x11   : > { %v4900_v9 = vld [vmem:[%s7630_s4 + $0x15c] sm:$0xf0]  ;;  %387 = vmatpush.bf16.msra.mxu0 %v4854_v6  ;;  %1027 = vmatpush.bf16.msra.mxu2 %v3999_v16  ;;  %v3967_v20 = vor.u32 %v4910_v18, %v3966_v17  ;;  %v3934_v22 = vld [vmem:[%s7630_s4 + $0x150] sm:$0xf]  ;;  %v3984_v48 = vld [vmem:[%s7630_s4 + $0x1e0] sm:$0xf0] }
  0x12   : > { %v3919_v11 = vor.u32 %v4900_v9, %v3918_v8  ;;  %v3886_v14 = vld [vmem:[%s7630_s4 + $0x100] sm:$0xf]  ;;  %v4902_v23 = vld [vmem:[%s7630_s4 + $0x16c] sm:$0xf0]  ;;  %v3990_v49 = vld [vmem:[%s7630_s4 + $0x1c8] sm:$0xf]  ;;  %v3987_v56 = vor.u32 %v4912_v47, %v3984_v48 }
  0x13   : > { %v4892_v15 = vld [vmem:[%s7630_s4 + $0x11c] sm:$0xf0]  ;;  %v3935_v27 = vor.u32 %v4902_v23, %v3934_v22  ;;  %v3902_v29 = vld [vmem:[%s7630_s4 + $0x110] sm:$0xf]  ;;  %v4917_v50 = vld [vmem:[%s7630_s4 + $0x1e4] sm:$0xf0] }
  0x14   : > { %976 = vmatpush.bf16.msra.mxu1 %v3951_v7  ;;  %v4852_v19 = vld [vmem:[%s7629_s3 + $0xa0] sm:$0xff]  ;;  %v3887_v21 = vor.u32 %v4892_v15, %v3886_v14  ;;  %v4894_v30 = vld [vmem:[%s7630_s4 + $0x12c] sm:$0xf0]  ;;  %v298_v53 = vld [vmem:[%s5380_s2 + $0x8] sm:$0xff]  ;;  %v3991_v59 = vor.u32 %v4917_v50, %v3990_v49 }
  0x15   : > { %388 = vmatpush.bf16.msra.mxu0 %v4853_v10  ;;  %v3854_v24 = vld [vmem:[%s7630_s4 + $0xc0] sm:$0xf]  ;;  %1028 = vmatpush.bf16.msra.mxu2 %v3967_v20  ;;  %v4850_v33 = vld [vmem:[%s7629_s3 + $0x90] sm:$0xff]  ;;  %v3903_v34 = vor.u32 %v4894_v30, %v3902_v29  ;;  %v3958_v60 = vld [vmem:[%s7630_s4 + $0x188] sm:$0xf] }
  0x16   : > { %v4884_v25 = vld [vmem:[%s7630_s4 + $0xdc] sm:$0xf0]  ;;  %v3870_v36 = vld [vmem:[%s7630_s4 + $0xd0] sm:$0xf]  ;;  %v4909_v61 = vld [vmem:[%s7630_s4 + $0x1a4] sm:$0xf0] }
  0x17   : > { %v3855_v28 = vor.u32 %v4884_v25, %v3854_v24  ;;  %v3822_v31 = vld [vmem:[%s7630_s4 + $0x80] sm:$0xf]  ;;  %v4886_v37 = vld [vmem:[%s7630_s4 + $0xec] sm:$0xf0]  ;;  %v4904_v0 = vld [vmem:[%s7630_s4 + $0x184] sm:$0xf]  ;;  %v3959_v6 = vor.u32 %v4909_v61, %v3958_v60 }
  0x18   : > { %977 = vmatpush.bf16.msra.mxu1 %v3919_v11  ;;  %v4876_v32 = vld [vmem:[%s7630_s4 + $0x9c] sm:$0xf0]  ;;  %v3871_v41 = vor.u32 %v4886_v37, %v3870_v36  ;;  %v3838_v44 = vld [vmem:[%s7630_s4 + $0x90] sm:$0xf]  ;;  %v3952_v1 = vld [vmem:[%s7630_s4 + $0x1a0] sm:$0xf0] }
  0x19   : > { %389 = vmatpush.bf16.msra.mxu0 %v4852_v19  ;;  %1029 = vmatpush.bf16.msra.mxu2 %v3935_v27  ;;  %v3823_v35 = vor.u32 %v4876_v32, %v3822_v31  ;;  %v3790_v38 = vld [vmem:[%s7630_s4 + $0x40] sm:$0xf]  ;;  %v4878_v45 = vld [vmem:[%s7630_s4 + $0xac] sm:$0xf0]  ;;  %v3955_v5 = vor.u32 %v4904_v0, %v3952_v1  ;;  %v3926_v8 = vld [vmem:[%s7630_s4 + $0x148] sm:$0xf] }
  0x1a   : > { %v4868_v39 = vld [vmem:[%s7630_s4 + $0x5c] sm:$0xf0]  ;;  %v3839_v54 = vor.u32 %v4878_v45, %v3838_v44  ;;  %v3806_v57 = vld [vmem:[%s7630_s4 + $0x50] sm:$0xf]  ;;  %v4901_v9 = vld [vmem:[%s7630_s4 + $0x164] sm:$0xf0] }
  0x1b   : > { %v3791_v42 = vor.u32 %v4868_v39, %v3790_v38  ;;  %v3758_v43 = vld [vmem:[%s7630_s4] sm:$0xf]  ;;  %v4870_v58 = vld [vmem:[%s7630_s4 + $0x6c] sm:$0xf0]  ;;  %v3927_v11 = vor.u32 %v4901_v9, %v3926_v8  ;;  %v4915_v12 = vld [vmem:[%s7630_s4 + $0x1dc] sm:$0xf] }
  0x1c   : > { %978 = vmatpush.bf16.msra.mxu1 %v3887_v21  ;;  %v4860_v46 = vld [vmem:[%s7630_s4 + $0x1c] sm:$0xf0]  ;;  %v3807_v2 = vor.u32 %v4870_v58, %v3806_v57  ;;  %v3774_v3 = vld [vmem:[%s7630_s4 + $0x10] sm:$0xf]  ;;  %v4008_v13 = vld [vmem:[%s7630_s4 + $0x1f8] sm:$0xf0] }
  0x1d   : > { %390 = vmatpush.bf16.msra.mxu0 %v4851_v26  ;;  %1030 = vmatpush.bf16.msra.mxu2 %v3903_v34  ;;  %v4848_v51 = vld [vmem:[%s7629_s3 + $0x80] sm:$0xff]  ;;  %v3759_v55 = vor.u32 %v4860_v46, %v3758_v43  ;;  %v4862_v4 = vld [vmem:[%s7630_s4 + $0x2c] sm:$0xf0]  ;;  %v3894_v14 = vld [vmem:[%s7630_s4 + $0x108] sm:$0xf]  ;;  %v4011_v16 = vor.u32 %v4915_v12, %v4008_v13 }
  0x1e   : > { %v297_v52 = vld [vmem:[%s5380_s2] sm:$0xff]  ;;  %v3775_v10 = vor.u32 %v4862_v4, %v3774_v3  ;;  %v4893_v15 = vld [vmem:[%s7630_s4 + $0x124] sm:$0xf0]  ;;  %v4907_v18 = vld [vmem:[%s7630_s4 + $0x19c] sm:$0xf] }
  0x1f   : > { %v313_v62 = vpack.c.bf16 %v298_v53, %v297_v52  ;;  %v589_v63 = vld [vmem:[%s286_s29] sm:$0xff]  ;;  %v3895_v17 = vor.u32 %v4893_v15, %v3894_v14  ;;  %v3976_v19 = vld [vmem:[%s7630_s4 + $0x1b8] sm:$0xf0]  ;;  %v3862_v20 = vld [vmem:[%s7630_s4 + $0xc8] sm:$0xf] }
  0x20   : > { %979 = vmatpush.bf16.msra.mxu1 %v3855_v28  ;;  %v5435_v7 = vpack.c.bf16 %v589_v63, %v589_v63  ;;  %v4885_v21 = vld [vmem:[%s7630_s4 + $0xe4] sm:$0xf0]  ;;  %v3979_v22 = vor.u32 %v4907_v18, %v3976_v19  ;;  %v299_v23 = vld [vmem:[%s5380_s2 + $0x10] sm:$0xff]  ;;  %v300_v24 = vld [vmem:[%s5380_s2 + $0x18] sm:$0xff] }
  0x21   : > { %391 = vmatpush.bf16.msra.mxu0 %v4850_v33  ;;  %1031 = vmatpush.bf16.msra.mxu2 %v3871_v41  ;;  %v3863_v25 = vor.u32 %v4885_v21, %v3862_v20  ;;  %v3830_v26 = vld [vmem:[%s7630_s4 + $0x88] sm:$0xf]  ;;  %v4899_v27 = vld [vmem:[%s7630_s4 + $0x15c] sm:$0xf]  ;;  %v314_v29 = vpack.c.bf16 %v300_v24, %v299_v23  ;;  %v4896_v31 = vld [vmem:[%s7630_s4 + $0x144] sm:$0xf] }
  0x22   : > { %v3944_v28 = vld [vmem:[%s7630_s4 + $0x178] sm:$0xf0]  ;;  %v4877_v30 = vld [vmem:[%s7630_s4 + $0xa4] sm:$0xf0]  ;;  %v3920_v32 = vld [vmem:[%s7630_s4 + $0x160] sm:$0xf0] }
  0x23   : > { %v3947_v33 = vor.u32 %v4899_v27, %v3944_v28  ;;  %v3923_v34 = vor.u32 %v4896_v31, %v3920_v32  ;;  %v4891_v36 = vld [vmem:[%s7630_s4 + $0x11c] sm:$0xf]  ;;  %v3798_v38 = vld [vmem:[%s7630_s4 + $0x48] sm:$0xf]  ;;  %v4913_v47 = vld [vmem:[%s7630_s4 + $0x1cc] sm:$0xf] }
  0x24   : > { %980 = vmatpush.bf16.msra.mxu1 %v3823_v35  ;;  %v3831_v35 = vor.u32 %v4877_v30, %v3830_v26  ;;  %v3912_v37 = vld [vmem:[%s7630_s4 + $0x138] sm:$0xf0]  ;;  %v4869_v39 = vld [vmem:[%s7630_s4 + $0x64] sm:$0xf0]  ;;  %v3992_v48 = vld [vmem:[%s7630_s4 + $0x1e8] sm:$0xf0] }
  0x25   : > { %392 = vmatpush.bf16.msra.mxu0 %v4849_v40  ;;  %1032 = vmatpush.bf16.msra.mxu2 %v3839_v54  ;;  %v3915_v40 = vor.u32 %v4891_v36, %v3912_v37  ;;  %v3799_v41 = vor.u32 %v4869_v39, %v3798_v38  ;;  %v3880_v43 = vld [vmem:[%s7630_s4 + $0xf8] sm:$0xf0]  ;;  %v3766_v44 = vld [vmem:[%s7630_s4 + $0x8] sm:$0xf]  ;;  %v3995_v52 = vor.u32 %v4913_v47, %v3992_v48  ;;  %v4905_v53 = vld [vmem:[%s7630_s4 + $0x18c] sm:$0xf] }
  0x26   : > { %v4861_v45 = vld [vmem:[%s7630_s4 + $0x24] sm:$0xf0]  ;;  %v4875_v50 = vld [vmem:[%s7630_s4 + $0x9c] sm:$0xf]  ;;  %v4888_v58 = vld [vmem:[%s7630_s4 + $0x104] sm:$0xf] }
  0x27   : > { %v3767_v49 = vor.u32 %v4861_v45, %v3766_v44  ;;  %v302_v57 = vld [vmem:[%s5380_s2 + $0x28] sm:$0xff]  ;;  %v4867_v60 = vld [vmem:[%s7630_s4 + $0x5c] sm:$0xf]  ;;  %v4880_v19 = vld [vmem:[%s7630_s4 + $0xc4] sm:$0xf] }
  0x28   : > { %981 = vmatpush.bf16.msra.mxu1 %v3791_v42  ;;  %v4883_v42 = vld [vmem:[%s7630_s4 + $0xdc] sm:$0xf]  ;;  %v4897_v1 = vld [vmem:[%s7630_s4 + $0x14c] sm:$0xf]  ;;  %v3856_v20 = vld [vmem:[%s7630_s4 + $0xe0] sm:$0xf0] }
  0x29   : > { %393 = vmatpush.bf16.msra.mxu0 %v4848_v51  ;;  %1033 = vmatpush.bf16.msra.mxu2 %v3807_v2  ;;  %v3883_v46 = vor.u32 %v4883_v42, %v3880_v43  ;;  %v3848_v51 = vld [vmem:[%s7630_s4 + $0xb8] sm:$0xf0]  ;;  %v3928_v2 = vld [vmem:[%s7630_s4 + $0x168] sm:$0xf0]  ;;  %v3859_v21 = vor.u32 %v4880_v19, %v3856_v20  ;;  %v4914_v26 = vld [vmem:[%s7630_s4 + $0x1d4] sm:$0xf] }
  0x2a   : > { %v3851_v54 = vor.u32 %v4875_v50, %v3848_v51  ;;  %v3816_v0 = vld [vmem:[%s7630_s4 + $0x78] sm:$0xf0]  ;;  %v4889_v9 = vld [vmem:[%s7630_s4 + $0x10c] sm:$0xf]  ;;  %v4000_v27 = vld [vmem:[%s7630_s4 + $0x1f0] sm:$0xf0] }
  0x2b   : > { %v3819_v3 = vor.u32 %v4867_v60, %v3816_v0  ;;  %v4859_v4 = vld [vmem:[%s7630_s4 + $0x1c] sm:$0xf]  ;;  %v4881_v12 = vld [vmem:[%s7630_s4 + $0xcc] sm:$0xf]  ;;  %v4006_v32 = vld [vmem:[%s7630_s4 + $0x1d8] sm:$0xf] }
  0x2c   : > { %982 = vmatpush.bf16.msra.mxu1 %v3759_v55  ;;  %394 = vmatmul.bf16.vlgmr.msra.gmra.mxu0 %v313_v62  ;;  %v3960_v55 = vld [vmem:[%s7630_s4 + $0x1a8] sm:$0xf0]  ;;  %v304_v18 = vld [vmem:[%s5380_s2 + $0x38] sm:$0xff]  ;;  %v3936_v42 = vld [vmem:[%s7630_s4 + $0x170] sm:$0xf0] }
  0x2d   : > { %988 = vmatpush.bf16.msrb.mxu0 %v3987_v56  ;;  %1034 = vmatpush.bf16.msra.mxu2 %v3775_v10  ;;  %v301_v56 = vld [vmem:[%s5380_s2 + $0x20] sm:$0xff]  ;;  %v3963_v61 = vor.u32 %v4905_v53, %v3960_v55  ;;  %v3896_v10 = vld [vmem:[%s7630_s4 + $0x128] sm:$0xf0]  ;;  %v3974_v39 = vld [vmem:[%s7630_s4 + $0x198] sm:$0xf] }
  0x2e   : > { %v315_v62 = vpack.c.bf16 %v302_v57, %v301_v56  ;;  %v3864_v13 = vld [vmem:[%s7630_s4 + $0xe8] sm:$0xf0]  ;;  %v4872_v44 = vld [vmem:[%s7630_s4 + $0x84] sm:$0xf]  ;;  %v3904_v51 = vld [vmem:[%s7630_s4 + $0x130] sm:$0xf0] }
  0x2f   : > { %983 = vmatmul.bf16.vlgmr.msra.gmra.mxu1 %v5435_v7  ;;  %v3867_v14 = vor.u32 %v4881_v12, %v3864_v13  ;;  %v4873_v15 = vld [vmem:[%s7630_s4 + $0x8c] sm:$0xf]  ;;  %v3824_v45 = vld [vmem:[%s7630_s4 + $0xa0] sm:$0xf0]  ;;  %v4903_v53 = vld [vmem:[%s7630_s4 + $0x174] sm:$0xf0] }
  0x30   : > { %1001 = vmatpush.bf16.msrb.mxu1 %v3991_v59  ;;  %1035 = vmatmul.bf16.vlgmr.msra.gmra.mxu2 %v5435_v7  ;;  %v3888_v59 = vld [vmem:[%s7630_s4 + $0x120] sm:$0xf0]  ;;  %v4865_v24 = vld [vmem:[%s7630_s4 + $0x4c] sm:$0xf]  ;;  %v3827_v50 = vor.u32 %v4872_v44, %v3824_v45  ;;  %v3910_v57 = vld [vmem:[%s7630_s4 + $0x118] sm:$0xf] }
  0x31   : > { %989 = vmatpush.bf16.msrb.mxu0 %v3955_v5  ;;  %1066 = vmatpush.bf16.msrb.mxu2 %v4011_v16  ;;  %v3891_v63 = vor.u32 %v4888_v58, %v3888_v59  ;;  %v3784_v5 = vld [vmem:[%s7630_s4 + $0x38] sm:$0xf0]  ;;  %v3832_v16 = vld [vmem:[%s7630_s4 + $0xa8] sm:$0xf0]  ;;  %v305_v48 = vld [vmem:[%s5380_s2 + $0x40] sm:$0xff] }
  0x32   : > { %v3787_v8 = vor.u32 %v4859_v4, %v3784_v5  ;;  %v4857_v30 = vld [vmem:[%s7630_s4 + $0xc] sm:$0xf]  ;;  %v4895_v58 = vld [vmem:[%s7630_s4 + $0x134] sm:$0xf0]  ;;  %v4882_v59 = vld [vmem:[%s7630_s4 + $0xd4] sm:$0xf] }
  0x33   : > { %v3768_v31 = vld [vmem:[%s7630_s4 + $0x28] sm:$0xf0]  ;;  %v3872_v60 = vld [vmem:[%s7630_s4 + $0xf0] sm:$0xf0]  ;;  %v3911_v0 = vor.u32 %v4895_v58, %v3910_v57  ;;  %v4887_v4 = vld [vmem:[%s7630_s4 + $0xf4] sm:$0xf0] }
  0x34   : > { %1002 = vmatpush.bf16.msrb.mxu1 %v3959_v6  ;;  %v3931_v6 = vor.u32 %v4897_v1, %v3928_v2  ;;  %v3771_v37 = vor.u32 %v4857_v30, %v3768_v31  ;;  %v4864_v1 = vld [vmem:[%s7630_s4 + $0x44] sm:$0xf]  ;;  %v4879_v12 = vld [vmem:[%s7630_s4 + $0xb4] sm:$0xf0]  ;;  %v310_v31 = vld [vmem:[%s5380_s2 + $0x68] sm:$0xff] }
  0x35   : > { %1067 = vmatpush.bf16.msrb.mxu2 %v3979_v22  ;;  %990 = vmatpush.bf16.msrb.mxu0 %v3923_v34  ;;  %v3835_v22 = vor.u32 %v4873_v15, %v3832_v16  ;;  %v4906_v34 = vld [vmem:[%s7630_s4 + $0x194] sm:$0xf]  ;;  %v3792_v2 = vld [vmem:[%s7630_s4 + $0x60] sm:$0xf0]  ;;  %v3814_v19 = vld [vmem:[%s7630_s4 + $0x58] sm:$0xf] }
  0x36   : > { %v3776_v15 = vld [vmem:[%s7630_s4 + $0x30] sm:$0xf0]  ;;  %v4871_v20 = vld [vmem:[%s7630_s4 + $0x74] sm:$0xf0]  ;;  %v309_v30 = vld [vmem:[%s5380_s2 + $0x60] sm:$0xff] }
  0x37   : > { %v4046_v45 = vld [vmem:[%s7631_s5 + $0x40] sm:$0xf] }
  0x38   : > { %1003 = vmatpush.bf16.msrb.mxu1 %v3927_v11  ;;  %v3899_v11 = vor.u32 %v4889_v9, %v3896_v10  ;;  %v3808_v9 = vld [vmem:[%s7630_s4 + $0x70] sm:$0xf0]  ;;  %v4318_v58 = vld [vmem:[%s7631_s5 + $0x260] sm:$0xf] }
  0x39   : > { %1068 = vmatpush.bf16.msrb.mxu2 %v3947_v33  ;;  %991 = vmatpush.bf16.msrb.mxu0 %v3891_v63  ;;  %v4919_v33 = vld [vmem:[%s7630_s4 + $0x1f4] sm:$0xf0]  ;;  %v3840_v63 = vld [vmem:[%s7630_s4 + $0xb0] sm:$0xf0] }
  0x3a   : > { %v4007_v38 = vor.u32 %v4919_v33, %v4006_v32  ;;  %v319_v32 = vpack.c.bf16 %v310_v31, %v309_v30  ;;  %v311_v33 = vld [vmem:[%s5380_s2 + $0x70] sm:$0xff]  ;;  %v4967_v31 = vld [vmem:[%s7631_s5 + $0x174] sm:$0xf0] }
  0x3b   : > { %v4198_v30 = vld [vmem:[%s7631_s5 + $0x170] sm:$0xf] }
  0x3c   : > { %1004 = vmatpush.bf16.msrb.mxu1 %v3895_v17  ;;  %399 = vmatmul.bf16.gmra.mxu0 %v314_v29  ;;  %v303_v17 = vld [vmem:[%s5380_s2 + $0x30] sm:$0xff]  ;;  %v4003_v29 = vor.u32 %v4914_v26, %v4000_v27  ;;  %v4856_v26 = vld [vmem:[%s7630_s4 + $0x4] sm:$0xf] }
  0x3d   : > { %1069 = vmatpush.bf16.msrb.mxu2 %v3915_v40  ;;  %v316_v23 = vpack.c.bf16 %v304_v18, %v303_v17  ;;  %992 = vmatpush.bf16.msrb.mxu0 %v3859_v21  ;;  %v4911_v40 = vld [vmem:[%s7630_s4 + $0x1b4] sm:$0xf0]  ;;  %v307_v17 = vld [vmem:[%s5380_s2 + $0x50] sm:$0xff]  ;;  %v3760_v27 = vld [vmem:[%s7630_s4 + $0x20] sm:$0xf0] }
  0x3e   : > { %1040 = vmatpush.bf16.msra.mxu3 %v4003_v29  ;;  %v3975_v47 = vor.u32 %v4911_v40, %v3974_v39  ;;  %v308_v18 = vld [vmem:[%s5380_s2 + $0x58] sm:$0xff]  ;;  %v3763_v29 = vor.u32 %v4856_v26, %v3760_v27  ;;  %v4062_v39 = vld [vmem:[%s7631_s5 + $0x60] sm:$0xf]  ;;  %v4933_v40 = vld [vmem:[%s7631_s5 + $0x64] sm:$0xf0] }
  0x40   : > { %1005 = vmatpush.bf16.msrb.mxu1 %v3863_v25  ;;  %v3800_v25 = vld [vmem:[%s7630_s4 + $0x68] sm:$0xf0] }
  0x41   : > { %1070 = vmatpush.bf16.msrb.mxu2 %v3883_v46  ;;  %v3803_v28 = vor.u32 %v4865_v24, %v3800_v25  ;;  %v4890_v46 = vld [vmem:[%s7630_s4 + $0x114] sm:$0xf]  ;;  %993 = vmatpush.bf16.msrb.mxu0 %v3827_v50  ;;  %v3782_v24 = vld [vmem:[%s7630_s4 + $0x18] sm:$0xf] }
  0x42   : > { %v4863_v25 = vld [vmem:[%s7630_s4 + $0x34] sm:$0xf0] }
  0x44   : > { %1006 = vmatpush.bf16.msrb.mxu1 %v3831_v35  ;;  %v3968_v35 = vld [vmem:[%s7630_s4 + $0x1b0] sm:$0xf0] }
  0x45   : > { %1071 = vmatpush.bf16.msrb.mxu2 %v3851_v54  ;;  %v3971_v36 = vor.u32 %v4906_v34, %v3968_v35  ;;  %v3907_v54 = vor.u32 %v4890_v46, %v3904_v51  ;;  %v312_v34 = vld [vmem:[%s5380_s2 + $0x78] sm:$0xff]  ;;  %v4929_v46 = vld [vmem:[%s7631_s5 + $0x44] sm:$0xf0] }
  0x46   : > { %v320_v35 = vpack.c.bf16 %v312_v34, %v311_v33  ;;  %v4199_v34 = vor.u32 %v4967_v31, %v4198_v30  ;;  %v4230_v31 = vld [vmem:[%s7631_s5 + $0x1b0] sm:$0xf] }
  0x47   : > { %1041 = vmatpush.bf16.msra.mxu3 %v3971_v36  ;;  %v4070_v36 = vld [vmem:[%s7631_s5 + $0x70] sm:$0xf] }
  0x48   : > { %1007 = vmatpush.bf16.msrb.mxu1 %v3799_v41  ;;  %v4898_v41 = vld [vmem:[%s7630_s4 + $0x154] sm:$0xf] }
  0x49   : > { %1072 = vmatpush.bf16.msrb.mxu2 %v3819_v3  ;;  %v3939_v43 = vor.u32 %v4898_v41, %v3936_v42  ;;  %v3878_v3 = vld [vmem:[%s7630_s4 + $0xd8] sm:$0xf]  ;;  %v4063_v41 = vor.u32 %v4933_v40, %v4062_v39  ;;  %v4054_v42 = vld [vmem:[%s7631_s5 + $0x50] sm:$0xf] }
  0x4a   : > { %v3879_v10 = vor.u32 %v4887_v4, %v3878_v3  ;;  %v4995_v4 = vld [vmem:[%s7631_s5 + $0x254] sm:$0xf0] }
  0x4b   : > { %1042 = vmatpush.bf16.msra.mxu3 %v3939_v43  ;;  %v4931_v43 = vld [vmem:[%s7631_s5 + $0x54] sm:$0xf0] }
  0x4c   : > { %1008 = vmatpush.bf16.msrb.mxu1 %v3767_v49  ;;  %404 = vmatmul.bf16.gmra.mxu0 %v315_v62  ;;  %v306_v49 = vld [vmem:[%s5380_s2 + $0x48] sm:$0xff]  ;;  %v4874_v62 = vld [vmem:[%s7630_s4 + $0x94] sm:$0xf]  ;;  %v4055_v44 = vor.u32 %v4931_v43, %v4054_v42  ;;  %v4254_v43 = vld [vmem:[%s7631_s5 + $0x1e0] sm:$0xf] }
  0x4d   : > { %1073 = vmatpush.bf16.msrb.mxu2 %v3787_v8  ;;  %v317_v55 = vpack.c.bf16 %v306_v49, %v305_v48  ;;  %v3843_v5 = vor.u32 %v4874_v62, %v3840_v63  ;;  %v4866_v8 = vld [vmem:[%s7630_s4 + $0x54] sm:$0xf]  ;;  %v4326_v48 = vld [vmem:[%s7631_s5 + $0x270] sm:$0xf]  ;;  %v4999_v49 = vld [vmem:[%s7631_s5 + $0x274] sm:$0xf0] }
  0x4e   : > { %v3811_v13 = vor.u32 %v4866_v8, %v3808_v9  ;;  %v4327_v50 = vor.u32 %v4999_v49, %v4326_v48  ;;  %v4030_v63 = vld [vmem:[%s7631_s5 + $0x20] sm:$0xf]  ;;  %v4965_v48 = vld [vmem:[%s7631_s5 + $0x164] sm:$0xf0] }
  0x4f   : > { %1009 = vmatmul.bf16.vlgmr.msrb.gmra.mxu1 %v5435_v7  ;;  %1043 = vmatpush.bf16.msra.mxu3 %v3907_v54  ;;  %v4286_v49 = vld [vmem:[%s7631_s5 + $0x220] sm:$0xf] }
  0x50   : > { %1014 = vmatpush.bf16.msra.mxu1 %v3995_v52  ;;  %1074 = vmatmul.bf16.vlgmr.msrb.gmra.mxu2 %v5435_v7  ;;  %v3942_v52 = vld [vmem:[%s7630_s4 + $0x158] sm:$0xf] }
  0x51   : > { %v3943_v56 = vor.u32 %v4903_v53, %v3942_v52  ;;  %v4038_v52 = vld [vmem:[%s7631_s5 + $0x30] sm:$0xf]  ;;  %v4927_v53 = vld [vmem:[%s7631_s5 + $0x34] sm:$0xf0]  ;;  %2137 = vmatpush.bf16.msra.mxu2 %v4199_v34 }
  0x54   : > { %1015 = vmatpush.bf16.msra.mxu1 %v3963_v61  ;;  %v3875_v61 = vor.u32 %v4882_v59, %v3872_v60  ;;  %v4997_v59 = vld [vmem:[%s7631_s5 + $0x264] sm:$0xf0] }
  0x55   : > { %v4319_v60 = vor.u32 %v4997_v59, %v4318_v58 }
  0x56   : > { %1044 = vmatpush.bf16.msra.mxu3 %v3875_v61 }
  0x58   : > { %1016 = vmatpush.bf16.msra.mxu1 %v3931_v6  ;;  %v3795_v6 = vor.u32 %v4864_v1, %v3792_v2 }
  0x5a   : > { %994 = vmatpush.bf16.msrb.mxu0 %v3795_v6  ;;  %1045 = vmatpush.bf16.msra.mxu3 %v3843_v5 }
  0x5c   : > { %1017 = vmatpush.bf16.msra.mxu1 %v3899_v11  ;;  %409 = vmatmul.bf16.gmra.mxu0 %v316_v23  ;;  %v3846_v11 = vld [vmem:[%s7630_s4 + $0x98] sm:$0xf]  ;;  %v3815_v23 = vor.u32 %v4871_v20, %v3814_v19 }
  0x5d   : > { %v3847_v16 = vor.u32 %v4879_v12, %v3846_v11  ;;  %v4923_v11 = vld [vmem:[%s7631_s5 + $0x14] sm:$0xf0] }
  0x5e   : > { %1046 = vmatpush.bf16.msra.mxu3 %v3811_v13  ;;  %995 = vmatpush.bf16.msrb.mxu0 %v3763_v29 }
  0x60   : > { %1018 = vmatpush.bf16.msra.mxu1 %v3867_v14  ;;  %v4858_v14 = vld [vmem:[%s7630_s4 + $0x14] sm:$0xf] }
  0x61   : > { %v3779_v21 = vor.u32 %v4858_v14, %v3776_v15 }
  0x62   : > { %2163 = vmatpush.bf16.msra.mxu0 %v4327_v50 }
  0x63   : > { %1047 = vmatpush.bf16.msra.mxu3 %v3779_v21  ;;  %v4014_v21 = vld [vmem:[%s7631_s5] sm:$0xf] }
  0x64   : > { %1019 = vmatpush.bf16.msra.mxu1 %v3835_v22  ;;  %v318_v22 = vpack.c.bf16 %v308_v18, %v307_v17  ;;  %v4993_v17 = vld [vmem:[%s7631_s5 + $0x244] sm:$0xf0] }
  0x66   : > { %1048 = vmatmul.bf16.vlgmr.msra.gmra.mxu3 %v5435_v7  ;;  %2164 = vmatpush.bf16.msra.mxu0 %v4319_v60  ;;  %v4246_v60 = vld [vmem:[%s7631_s5 + $0x1d0] sm:$0xf] }
  0x68   : > { %1020 = vmatpush.bf16.msra.mxu1 %v3803_v28  ;;  %v3783_v28 = vor.u32 %v4863_v25, %v3782_v24  ;;  %v4262_v24 = vld [vmem:[%s7631_s5 + $0x1f0] sm:$0xf]  ;;  %v4983_v25 = vld [vmem:[%s7631_s5 + $0x1f4] sm:$0xf0] }
  0x69   : > { %v4263_v29 = vor.u32 %v4983_v25, %v4262_v24  ;;  %v4072_v25 = vld [vmem:[%s7631_s5 + $0x78] sm:$0xf0] }
  0x6c   : > { %1021 = vmatpush.bf16.msra.mxu1 %v3771_v37  ;;  %414 = vmatmul.bf16.gmra.mxu0 %v317_v55  ;;  %v4935_v37 = vld [vmem:[%s7631_s5 + $0x74] sm:$0xf0]  ;;  %v4039_v55 = vor.u32 %v4927_v53, %v4038_v52 }
  0x6f   : > { %1022 = vmatmul.bf16.vlgmr.msra.gmra.mxu1 %v5435_v7 }
  0x70   : > { %1053 = vmatpush.bf16.msrb.mxu1 %v4007_v38  ;;  %v4071_v38 = vor.u32 %v4935_v37, %v4070_v36  ;;  %v4991_v36 = vld [vmem:[%s7631_s5 + $0x234] sm:$0xf0] }
  0x72   : > { %2111 = vmatpush.bf16.msrb.mxu3 %v4071_v38 }
  0x74   : > { %1054 = vmatpush.bf16.msrb.mxu1 %v3975_v47  ;;  %v4047_v47 = vor.u32 %v4929_v46, %v4046_v45 }
  0x76   : > { %2112 = vmatpush.bf16.msrb.mxu3 %v4063_v41 }
  0x78   : > { %1055 = vmatpush.bf16.msrb.mxu1 %v3943_v56 }
  0x7a   : > { %2113 = vmatpush.bf16.msrb.mxu3 %v4055_v44  ;;  %v4981_v44 = vld [vmem:[%s7631_s5 + $0x1e4] sm:$0xf0] }
  0x7b   : > { %v4255_v46 = vor.u32 %v4981_v44, %v4254_v43  ;;  %v4932_v43 = vld [vmem:[%s7631_s5 + $0x64] sm:$0xf]  ;;  %v4064_v44 = vld [vmem:[%s7631_s5 + $0x68] sm:$0xf0] }
  0x7c   : > { %1056 = vmatpush.bf16.msrb.mxu1 %v3911_v0  ;;  %419 = vmatmul.bf16.gmra.mxu0 %v318_v22  ;;  %v4925_v0 = vld [vmem:[%s7631_s5 + $0x24] sm:$0xf0] }
  0x7d   : > { %v4031_v1 = vor.u32 %v4925_v0, %v4030_v63  ;;  %v4921_v22 = vld [vmem:[%s7631_s5 + $0x4] sm:$0xf0]  ;;  %v4182_v0 = vld [vmem:[%s7631_s5 + $0x150] sm:$0xf] }
  0x7e   : > { %2114 = vmatpush.bf16.msrb.mxu3 %v4047_v47  ;;  %v4190_v47 = vld [vmem:[%s7631_s5 + $0x160] sm:$0xf] }
  0x7f   : > { %v4191_v53 = vor.u32 %v4965_v48, %v4190_v47 }
  0x80   : > { %1057 = vmatpush.bf16.msrb.mxu1 %v3879_v10  ;;  %v4022_v10 = vld [vmem:[%s7631_s5 + $0x10] sm:$0xf] }
  0x81   : > { %v4023_v13 = vor.u32 %v4923_v11, %v4022_v10  ;;  %2138 = vmatpush.bf16.msra.mxu2 %v4191_v53 }
  0x82   : > { %2115 = vmatpush.bf16.msrb.mxu3 %v4039_v55  ;;  %v4989_v55 = vld [vmem:[%s7631_s5 + $0x224] sm:$0xf0] }
  0x84   : > { %1058 = vmatpush.bf16.msrb.mxu1 %v3847_v16  ;;  %v4302_v16 = vld [vmem:[%s7631_s5 + $0x240] sm:$0xf] }
  0x85   : > { %v4303_v18 = vor.u32 %v4993_v17, %v4302_v16  ;;  %v4174_v16 = vld [vmem:[%s7631_s5 + $0x140] sm:$0xf]  ;;  %v4961_v17 = vld [vmem:[%s7631_s5 + $0x144] sm:$0xf0] }
  0x86   : > { %2116 = vmatpush.bf16.msrb.mxu3 %v4031_v1  ;;  %v4963_v1 = vld [vmem:[%s7631_s5 + $0x154] sm:$0xf0] }
  0x88   : > { %1059 = vmatpush.bf16.msrb.mxu1 %v3815_v23  ;;  %v4015_v23 = vor.u32 %v4921_v22, %v4014_v21  ;;  %v4175_v21 = vor.u32 %v4961_v17, %v4174_v16  ;;  %v4985_v22 = vld [vmem:[%s7631_s5 + $0x204] sm:$0xf0] }
  0x8a   : > { %2117 = vmatpush.bf16.msrb.mxu3 %v4023_v13  ;;  %v4238_v13 = vld [vmem:[%s7631_s5 + $0x1c0] sm:$0xf] }
  0x8c   : > { %1060 = vmatpush.bf16.msrb.mxu1 %v3783_v28  ;;  %424 = vmatmul.bf16.gmra.mxu0 %v319_v32 }
  0x8e   : > { %2118 = vmatpush.bf16.msrb.mxu3 %v4015_v23  ;;  %v4934_v23 = vld [vmem:[%s7631_s5 + $0x74] sm:$0xf] }
  0x8f   : > { %1061 = vmatmul.bf16.vlgmr.msrb.gmra.mxu1 %v5435_v7  ;;  %v4075_v30 = vor.u32 %v4934_v23, %v4072_v25  ;;  %v4206_v25 = vld [vmem:[%s7631_s5 + $0x180] sm:$0xf] }
  0x92   : > { %2150 = vmatpush.bf16.msra.mxu3 %v4263_v29 }
  0x96   : > { %2151 = vmatpush.bf16.msra.mxu3 %v4255_v46  ;;  %v4067_v46 = vor.u32 %v4932_v43, %v4064_v44  ;;  %v4454_v44 = vld [vmem:[%s7631_s5 + $0x370] sm:$0xf] }
  0x9c   : > { %429 = vmatmul.bf16.gmra.mxu0 %v320_v35  ;;  %v4294_v35 = vld [vmem:[%s7631_s5 + $0x230] sm:$0xf] }
  0x9d   : > { %v4295_v40 = vor.u32 %v4991_v36, %v4294_v35  ;;  %v4166_v36 = vld [vmem:[%s7631_s5 + $0x130] sm:$0xf] }
  0xa9   : > { %v5752_v51 = vpop.f32.mrf.mxu0 }
  0xac   : > { %v5760_v54 = vpop.f32.mrf.mxu1  ;;  %996 = vmatmul.bf16.vlgmr.msrb.gmra.mxu0 %v5435_v7  ;;  %v4310_v7 = vld [vmem:[%s7631_s5 + $0x250] sm:$0xf] }
  0xad   : > { %v1079_v56 = vrot.slane %v5760_v54, 4  ;;  %v1127_v57 = vmul.f32 %v5760_v54, %v5760_v54  ;;  %v4311_v5 = vor.u32 %v4995_v4, %v4310_v7  ;;  %v4183_v4 = vor.u32 %v4963_v1, %v4182_v0  ;;  %v4056_v1 = vld [vmem:[%s7631_s5 + $0x58] sm:$0xf0] }
  0xaf   : > { %v1080_v61 = vadd.f32 %v1079_v56, %v5760_v54  ;;  %v1135_v62 = vrot.slane %v1127_v57, 4  ;;  %2165 = vmatpush.bf16.msra.mxu0 %v4311_v5  ;;  %v4278_v5 = vld [vmem:[%s7631_s5 + $0x210] sm:$0xf]  ;;  %2139 = vmatpush.bf16.msra.mxu2 %v4183_v4 }
  0xb0   : > { %v4214_v4 = vld [vmem:[%s7631_s5 + $0x190] sm:$0xf] }
  0xb1   : > { %v1081_v2 = vrot.slane %v1080_v61, 2  ;;  %v1136_v3 = vadd.f32 %v1135_v62, %v1127_v57  ;;  %v5785_v6 = vpop.f32.mrf.mxu0  ;;  %v4287_v57 = vor.u32 %v4989_v55, %v4286_v49 }
  0xb3   : > { %v1082_v8 = vadd.f32 %v1081_v2, %v1080_v61  ;;  %v1137_v9 = vrot.slane %v1136_v3, 2  ;;  %2166 = vmatpush.bf16.msra.mxu0 %v4303_v18  ;;  %v5813_v28 = vpop.f32.mrf.mxu2  ;;  %v4979_v61 = vld [vmem:[%s7631_s5 + $0x1d4] sm:$0xf0]  ;;  %v4270_v18 = vld [vmem:[%s7631_s5 + $0x200] sm:$0xf]  ;;  %2140 = vmatpush.bf16.msra.mxu2 %v4175_v21 }
  0xb4   : > { %v986_v12 = vpop.f32.mrf.mxu1  ;;  %v1103_v32 = vrot.slane %v5813_v28, 4  ;;  %v1131_v33 = vmul.f32 %v5813_v28, %v5813_v28  ;;  %v4247_v63 = vor.u32 %v4979_v61, %v4246_v60  ;;  %v4271_v24 = vor.u32 %v4985_v22, %v4270_v18  ;;  %v4928_v18 = vld [vmem:[%s7631_s5 + $0x44] sm:$0xf] }
  0xb5   : > { %v1083_v14 = vrot.slane %v1082_v8, 1  ;;  %v1138_v15 = vadd.f32 %v1137_v9, %v1136_v3 }
  0xb6   : > { %v1104_v41 = vadd.f32 %v1103_v32, %v5813_v28  ;;  %v1159_v42 = vrot.slane %v1131_v33, 4  ;;  %2152 = vmatpush.bf16.msra.mxu3 %v4247_v63  ;;  %v4975_v32 = vld [vmem:[%s7631_s5 + $0x1b4] sm:$0xf0]  ;;  %v4930_v63 = vld [vmem:[%s7631_s5 + $0x54] sm:$0xf] }
  0xb7   : > { %v1084_v19 = vadd.f32 %v1083_v14, %v1082_v8  ;;  %v1139_v20 = vrot.slane %v1138_v15, 1  ;;  %2167 = vmatpush.bf16.msra.mxu0 %v4295_v40  ;;  %v4987_v8 = vld [vmem:[%s7631_s5 + $0x214] sm:$0xf0]  ;;  %v4977_v14 = vld [vmem:[%s7631_s5 + $0x1c4] sm:$0xf0]  ;;  %v4231_v35 = vor.u32 %v4975_v32, %v4230_v31 }
  0xb8   : > { %v1105_v50 = vrot.slane %v1104_v41, 2  ;;  %v1160_v52 = vadd.f32 %v1159_v42, %v1131_v33  ;;  %v4279_v10 = vor.u32 %v4987_v8, %v4278_v5  ;;  %v4971_v5 = vld [vmem:[%s7631_s5 + $0x194] sm:$0xf0]  ;;  %v4142_v31 = vld [vmem:[%s7631_s5 + $0x100] sm:$0xf] }
  0xb9   : > { %v1140_v26 = vadd.f32 %v1139_v20, %v1138_v15  ;;  %v5811_v27 = vmul.f32 0.125, %v1084_v19  ;;  %v5830_v37 = vpop.f32.mrf.mxu0  ;;  %v4239_v15 = vor.u32 %v4977_v14, %v4238_v13  ;;  %v4955_v13 = vld [vmem:[%s7631_s5 + $0x114] sm:$0xf0]  ;;  %v4953_v32 = vld [vmem:[%s7631_s5 + $0x104] sm:$0xf0] }
  0xba   : > { %v1106_v58 = vadd.f32 %v1105_v50, %v1104_v41  ;;  %v1161_v59 = vrot.slane %v1160_v52, 2  ;;  %v4222_v50 = vld [vmem:[%s7631_s5 + $0x1a0] sm:$0xf] }
  0xbb   : > { %v1191_v38 = vmul.f32 0.125, %v1140_v26  ;;  %v1199_v39 = vmul.f32 %v5811_v27, %v5811_v27  ;;  %2168 = vmatpush.bf16.msra.mxu0 %v4287_v57  ;;  %v1038_v2 = vpop.f32.mrf.mxu2  ;;  %2153 = vmatpush.bf16.msra.mxu3 %v4239_v15  ;;  %v4957_v57 = vld [vmem:[%s7631_s5 + $0x124] sm:$0xf0]  ;;  %v1223_v15 = vsub.f32 %v5760_v54, %v5811_v27 }
  0xbc   : > { %v1107_v3 = vrot.slane %v1106_v58, 1  ;;  %v1162_v7 = vadd.f32 %v1161_v59, %v1160_v52  ;;  %v4973_v52 = vld [vmem:[%s7631_s5 + $0x1a4] sm:$0xf0] }
  0xbd   : > { %v1207_v45 = vsub.f32 %v1191_v38, %v1199_v39  ;;  %v4959_v38 = vld [vmem:[%s7631_s5 + $0x134] sm:$0xf0]  ;;  %v4223_v55 = vor.u32 %v4973_v52, %v4222_v50  ;;  %v4040_v52 = vld [vmem:[%s7631_s5 + $0x38] sm:$0xf0] }
  0xbe   : > { %v1108_v11 = vadd.f32 %v1107_v3, %v1106_v58  ;;  %v1163_v12 = vrot.slane %v1162_v7, 1  ;;  %v4167_v42 = vor.u32 %v4959_v38, %v4166_v36 }
  0xbf   : > { %v1215_v56 = vmax.f32 %v1207_v45, 0.0  ;;  %2169 = vmatpush.bf16.msra.mxu0 %v4279_v10  ;;  %2154 = vmatpush.bf16.msra.mxu3 %v4231_v35 }
  0xc0   : > { %v1164_v19 = vadd.f32 %v1163_v12, %v1162_v7  ;;  %v5891_v20 = vmul.f32 0.125, %v1108_v11  ;;  %2141 = vmatpush.bf16.msra.mxu2 %v4167_v42  ;;  %v4059_v7 = vor.u32 %v4930_v63, %v4056_v1  ;;  %v4215_v11 = vor.u32 %v4971_v5, %v4214_v4  ;;  %v4150_v12 = vld [vmem:[%s7631_s5 + $0x110] sm:$0xf] }
  0xc1   : > { %v5859_v62 = vadd.f32 1e-05, %v1215_v56  ;;  %v5873_v9 = vpop.f32.mrf.mxu0  ;;  %v4158_v56 = vld [vmem:[%s7631_s5 + $0x120] sm:$0xf]  ;;  %v4151_v17 = vor.u32 %v4955_v13, %v4150_v12  ;;  %v4032_v12 = vld [vmem:[%s7631_s5 + $0x28] sm:$0xf0] }
  0xc2   : > { %v1195_v26 = vmul.f32 0.125, %v1164_v19  ;;  %v1203_v29 = vmul.f32 %v5891_v20, %v5891_v20  ;;  %v4159_v61 = vor.u32 %v4957_v57, %v4158_v56  ;;  %v4048_v19 = vld [vmem:[%s7631_s5 + $0x48] sm:$0xf0]  ;;  %v1227_v21 = vsub.f32 %v5813_v28, %v5891_v20  ;;  %v5027_v28 = vld [vmem:[%s7631_s5 + $0x354] sm:$0xf0] }
  0xc3   : > { %5120 = vrsqrt.f32 %v5859_v62  ;;  %2170 = vmatpush.bf16.msra.mxu0 %v4271_v24  ;;  %2155 = vmatpush.bf16.msra.mxu3 %v4223_v55  ;;  %vm1245_vm0 = vweird.f32 %v5859_v62  ;;  %v4051_v22 = vor.u32 %v4928_v18, %v4048_v19  ;;  %v4502_v18 = vld [vmem:[%s7631_s5 + $0x3d0] sm:$0xf]  ;;  %v5043_v19 = vld [vmem:[%s7631_s5 + $0x3d4] sm:$0xf0] }
  0xc4   : > { %v1211_v39 = vsub.f32 %v1195_v26, %v1203_v29  ;;  %2142 = vmatpush.bf16.msra.mxu2 %v4159_v61 }
  0xc6   : > { %v1219_v48 = vmax.f32 %v1211_v39, 0.0  ;;  %v4143_v39 = vor.u32 %v4953_v32, %v4142_v31 }
  0xc7   : > { %2215 = vmatpush.bf16.msrb.mxu0 %v4075_v30  ;;  %2156 = vmatpush.bf16.msra.mxu3 %v4215_v11  ;;  %v4924_v11 = vld [vmem:[%s7631_s5 + $0x24] sm:$0xf] }
  0xc8   : > { %v5947_v59 = vadd.f32 1e-05, %v1219_v48  ;;  %2143 = vmatpush.bf16.msra.mxu2 %v4151_v17  ;;  %v4035_v17 = vor.u32 %v4924_v11, %v4032_v12  ;;  %v5023_v11 = vld [vmem:[%s7631_s5 + $0x334] sm:$0xf0] }
  0xc9   : > { %v5910_v33 = vpop.eup %5120  ;;  %v5929_v45 = vpop.f32.mrf.mxu0 }
  0xca   : > { %v1240_v47 = vmul.f32 %v5910_v33, %v5859_v62  ;;  %vm1246_vm1 = vweird.f32 %v5910_v33  ;;  %5122 = vrsqrt.f32 %v5947_v59  ;;  %v4969_v62 = vld [vmem:[%s7631_s5 + $0x184] sm:$0xf0]  ;;  %vm1285_vm3 = vweird.f32 %v5947_v59 }
  0xcb   : > { %2216 = vmatpush.bf16.msrb.mxu0 %v4067_v46  ;;  %vm5982_vm2 = vmor %vm1245_vm0, %vm1246_vm1  ;;  %v4207_v29 = vor.u32 %v4969_v62, %v4206_v25  ;;  %v5031_v46 = vld [vmem:[%s7631_s5 + $0x374] sm:$0xf0]  ;;  %v4438_v25 = vld [vmem:[%s7631_s5 + $0x350] sm:$0xf] }
  0xcc   : > { %v5912_v34 = vpop.f32.mrf.mxu1  ;;  %v1241_v58 = vmul.f32 %v5910_v33, %v1240_v47  ;;  %v4926_v47 = vld [vmem:[%s7631_s5 + $0x34] sm:$0xf]  ;;  %2144 = vmatpush.bf16.msra.mxu2 %v4143_v39  ;;  %v4455_v57 = vor.u32 %v5031_v46, %v4454_v44  ;;  %v4494_v44 = vld [vmem:[%s7631_s5 + $0x3c0] sm:$0xf]  ;;  %v5041_v46 = vld [vmem:[%s7631_s5 + $0x3c4] sm:$0xf0] }
  0xcd   : > { %v1091_v40 = vrot.slane %v5912_v34, 4  ;;  %v1129_v41 = vmul.f32 %v5912_v34, %v5912_v34  ;;  %2157 = vmatpush.bf16.msra.mxu3 %v4207_v29  ;;  %v4043_v1 = vor.u32 %v4926_v47, %v4040_v52  ;;  %v4024_v29 = vld [vmem:[%s7631_s5 + $0x18] sm:$0xf0] }
  0xce   : > { %v1242_v2 = vmul.f32 0.5, %v1241_v58  ;;  %v4510_v58 = vld [vmem:[%s7631_s5 + $0x3e0] sm:$0xf] }
  0xcf   : > { %v1092_v49 = vadd.f32 %v1091_v40, %v5912_v34  ;;  %v1147_v53 = vrot.slane %v1129_v41, 4  ;;  %2217 = vmatpush.bf16.msrb.mxu0 %v4059_v7  ;;  %v4518_v40 = vld [vmem:[%s7631_s5 + $0x3f0] sm:$0xf] }
  0xd0   : > { %v1243_v14 = vsub.f32 1.5, %v1242_v2  ;;  %v6004_v35 = vpop.eup %5122  ;;  %v4446_v2 = vld [vmem:[%s7631_s5 + $0x360] sm:$0xf]  ;;  %2189 = vmatpush.bf16.msrb.mxu2 %v4455_v57 }
  0xd1   : > { %v1093_v60 = vrot.slane %v1092_v49, 2  ;;  %v1148_v0 = vadd.f32 %v1147_v53, %v1129_v41  ;;  %v5986_v54 = vpop.f32.mrf.mxu0  ;;  %v1280_v41 = vmul.f32 %v6004_v35, %v5947_v59  ;;  %vm1286_vm4 = vweird.f32 %v6004_v35 }
  0xd2   : > { %v1244_v23 = vmul.f32 %v5910_v33, %v1243_v14  ;;  %vm6074_vm5 = vmor %vm1285_vm3, %vm1286_vm4  ;;  %v4439_v59 = vor.u32 %v5027_v28, %v4438_v25  ;;  %v4414_v25 = vld [vmem:[%s7631_s5 + $0x320] sm:$0xf]  ;;  %v5021_v28 = vld [vmem:[%s7631_s5 + $0x324] sm:$0xf0] }
  0xd3   : > { %v1094_v3 = vadd.f32 %v1093_v60, %v1092_v49  ;;  %v1149_v8 = vrot.slane %v1148_v0, 2  ;;  %2218 = vmatpush.bf16.msrb.mxu0 %v4051_v22  ;;  %v6017_v43 = vpop.f32.mrf.mxu2  ;;  %v1281_v53 = vmul.f32 %v6004_v35, %v1280_v41  ;;  %v5045_v60 = vld [vmem:[%s7631_s5 + $0x3e4] sm:$0xf0] }
  0xd4   : > { %v1012_v10 = vpop.f32.mrf.mxu1  ;;  %v1248_v30 = vsel %vm5982_vm2, %v5910_v33, %v1244_v23  ;;  %v5047_v33 = vld [vmem:[%s7631_s5 + $0x3f4] sm:$0xf0]  ;;  %v1121_v49 = vrot.slane %v6017_v43, 4  ;;  %v1134_v50 = vmul.f32 %v6017_v43, %v6017_v43 }
  0xd5   : > { %v1095_v16 = vrot.slane %v1094_v3, 1  ;;  %v1150_v27 = vadd.f32 %v1149_v8, %v1148_v0  ;;  %v1319_v38 = vmul.f32 %v1248_v30, %v1223_v15  ;;  %v4519_v0 = vor.u32 %v5047_v33, %v4518_v40 }
  0xd6   : > { %v1122_v61 = vadd.f32 %v1121_v49, %v6017_v43  ;;  %v1177_v63 = vrot.slane %v1134_v50, 4  ;;  %v1282_v7 = vmul.f32 0.5, %v1281_v53  ;;  %v4920_v49 = vld [vmem:[%s7631_s5 + $0x4] sm:$0xf]  ;;  %v4016_v53 = vld [vmem:[%s7631_s5 + $0x8] sm:$0xf0] }
  0xd7   : > { %v1096_v24 = vadd.f32 %v1095_v16, %v1094_v3  ;;  %v1151_v26 = vrot.slane %v1150_v27, 1  ;;  %v1327_v56 = vmax.f32 %v1319_v38, 0.0  ;;  %v5029_v3 = vld [vmem:[%s7631_s5 + $0x364] sm:$0xf0]  ;;  %2219 = vmatpush.bf16.msrb.mxu0 %v4043_v1  ;;  %v4019_v57 = vor.u32 %v4920_v49, %v4016_v53  ;;  %v5039_v1 = vld [vmem:[%s7631_s5 + $0x3b4] sm:$0xf0] }
  0xd8   : > { %v4447_v10 = vor.u32 %v5029_v3, %v4446_v2  ;;  %v1123_v13 = vrot.slane %v1122_v61, 2  ;;  %v1178_v14 = vadd.f32 %v1177_v63, %v1134_v50  ;;  %v1283_v15 = vsub.f32 1.5, %v1282_v7  ;;  %v4406_v49 = vld [vmem:[%s7631_s5 + $0x310] sm:$0xf] }
  0xd9   : > { %v6006_v36 = vmul.f32 0.125, %v1096_v24  ;;  %v1152_v42 = vadd.f32 %v1151_v26, %v1150_v27  ;;  %v6051_v5 = vpop.f32.mrf.mxu0  ;;  %v6053_v8 = vpack.c.bf16 %v1327_v56, %v1327_v56  ;;  %v4511_v24 = vor.u32 %v5045_v60, %v4510_v58  ;;  %v4922_v26 = vld [vmem:[%s7631_s5 + $0x14] sm:$0xf]  ;;  %v5037_v27 = vld [vmem:[%s7631_s5 + $0x3a4] sm:$0xf0] }
  0xda   : > { %v1124_v22 = vadd.f32 %v1123_v13, %v1122_v61  ;;  %v1179_v23 = vrot.slane %v1178_v14, 2  ;;  %v1284_v20 = vmul.f32 %v6004_v35, %v1283_v15  ;;  %2190 = vmatpush.bf16.msrb.mxu2 %v4447_v10  ;;  %v4027_v38 = vor.u32 %v4922_v26, %v4024_v29  ;;  %v4422_v10 = vld [vmem:[%s7631_s5 + $0x330] sm:$0xf] }
  0xdb   : > { %v1201_v48 = vmul.f32 %v6006_v36, %v6006_v36  ;;  %v1193_v55 = vmul.f32 0.125, %v1152_v42  ;;  %2119 = vmatmul.bf16.vlgmr.msrb.gmra.mxu3 %v6053_v8  ;;  %v1077_v30 = vpop.f32.mrf.mxu2  ;;  %2220 = vmatpush.bf16.msrb.mxu0 %v4035_v17  ;;  %v4503_v42 = vor.u32 %v5043_v19, %v4502_v18  ;;  %v4495_v63 = vor.u32 %v5041_v46, %v4494_v44 }
  0xdc   : > { %2202 = vmatpush.bf16.msrb.mxu3 %v4519_v0  ;;  %v1125_v31 = vrot.slane %v1124_v22, 1  ;;  %v1180_v32 = vadd.f32 %v1179_v23, %v1178_v14  ;;  %v1288_v39 = vsel %vm6074_vm5, %v6004_v35, %v1284_v20  ;;  %v4430_v35 = vld [vmem:[%s7631_s5 + $0x340] sm:$0xf]  ;;  %v4486_v0 = vld [vmem:[%s7631_s5 + $0x3b0] sm:$0xf]  ;;  %v4423_v14 = vor.u32 %v5023_v11, %v4422_v10 }
  0xdd   : > { %v1209_v4 = vsub.f32 %v1193_v55, %v1201_v48  ;;  %v1323_v40 = vmul.f32 %v1288_v39, %v1227_v21  ;;  %v5025_v48 = vld [vmem:[%s7631_s5 + $0x344] sm:$0xf0]  ;;  %v4487_v19 = vor.u32 %v5039_v1, %v4486_v0  ;;  %v4478_v21 = vld [vmem:[%s7631_s5 + $0x3a0] sm:$0xf]  ;;  %v457_v20 = vmul.f32 %v5785_v6, %v5785_v6 }
  0xde   : > { %v1126_v33 = vadd.f32 %v1125_v31, %v1124_v22  ;;  %v1181_v41 = vrot.slane %v1180_v32, 1  ;;  %2191 = vmatpush.bf16.msrb.mxu2 %v4439_v59  ;;  %v4431_v56 = vor.u32 %v5025_v48, %v4430_v35  ;;  %v4415_v31 = vor.u32 %v5021_v28, %v4414_v25  ;;  %v4462_v1 = vld [vmem:[%s7631_s5 + $0x380] sm:$0xf] }
  0xdf   : > { %v1217_v16 = vmax.f32 %v1209_v4, 0.0  ;;  %2221 = vmatpush.bf16.msrb.mxu0 %v4027_v38  ;;  %v1331_v55 = vmax.f32 %v1323_v40, 0.0  ;;  %v458_v38 = vmul.f32 %v5830_v37, %v5830_v37  ;;  %v1225_v44 = vsub.f32 %v5912_v34, %v6006_v36 }
  0xe0   : > { %2203 = vmatpush.bf16.msrb.mxu3 %v4511_v24  ;;  %v1182_v50 = vadd.f32 %v1181_v41, %v1180_v32  ;;  %v6114_v52 = vmul.f32 0.125, %v1126_v33  ;;  %v456_v32 = vmul.f32 %v5752_v51, %v5752_v51  ;;  %v4479_v33 = vor.u32 %v5037_v27, %v4478_v21  ;;  %v4470_v41 = vld [vmem:[%s7631_s5 + $0x390] sm:$0xf] }
  0xe1   : > { %v6085_v62 = vadd.f32 1e-05, %v1217_v16  ;;  %v6103_v47 = vpop.f32.mrf.mxu0  ;;  %v6134_v4 = vpack.c.bf16 %v1331_v55, %v1331_v55  ;;  %v435_v34 = vadd.f32 %v5785_v6, %v5752_v51  ;;  %v459_v55 = vmul.f32 %v5873_v9, %v5873_v9 }
  0xe2   : > { %v1198_v60 = vmul.f32 0.125, %v1182_v50  ;;  %v1206_v61 = vmul.f32 %v6114_v52, %v6114_v52  ;;  %2192 = vmatpush.bf16.msrb.mxu2 %v4431_v56  ;;  %v5019_v50 = vld [vmem:[%s7631_s5 + $0x314] sm:$0xf0]  ;;  %v472_v36 = vadd.f32 %v457_v20, %v456_v32 }
  0xe3   : > { %5124 = vrsqrt.f32 %v6085_v62  ;;  %2222 = vmatpush.bf16.msrb.mxu0 %v4019_v57  ;;  %vm1265_vm6 = vweird.f32 %v6085_v62  ;;  %v4407_v53 = vor.u32 %v5019_v50, %v4406_v49  ;;  %v463_v50 = vmul.f32 %v6103_v47, %v6103_v47 }
  0xe4   : > { %2204 = vmatpush.bf16.msrb.mxu3 %v4503_v42  ;;  %v1214_v13 = vsub.f32 %v1198_v60, %v1206_v61  ;;  %2171 = vmatmul.bf16.vlgmr.msra.gmra.mxu0 %v6134_v4  ;;  %v5035_v42 = vld [vmem:[%s7631_s5 + $0x394] sm:$0xf0]  ;;  %v436_v60 = vadd.f32 %v435_v34, %v5830_v37  ;;  %v473_v61 = vadd.f32 %v472_v36, %v458_v38 }
  0xe5   : > { %v4471_v0 = vor.u32 %v5035_v42, %v4470_v41  ;;  %v4964_v41 = vld [vmem:[%s7631_s5 + $0x164] sm:$0xf]  ;;  %v4192_v42 = vld [vmem:[%s7631_s5 + $0x168] sm:$0xf0] }
  0xe6   : > { %v1222_v18 = vmax.f32 %v1214_v13, 0.0  ;;  %2193 = vmatpush.bf16.msrb.mxu2 %v4423_v14  ;;  %v5017_v14 = vld [vmem:[%s7631_s5 + $0x304] sm:$0xf0] }
  0xe8   : > { %2205 = vmatpush.bf16.msrb.mxu3 %v4495_v63  ;;  %v6165_v30 = vadd.f32 1e-05, %v1222_v18  ;;  %v474_v18 = vadd.f32 %v473_v61, %v459_v55  ;;  %v4184_v61 = vld [vmem:[%s7631_s5 + $0x158] sm:$0xf0] }
  0xe9   : > { %v6129_v2 = vpop.eup %5124  ;;  %v6153_v24 = vpop.f32.mrf.mxu0 }
  0xea   : > { %v1260_v12 = vmul.f32 %v6129_v2, %v6085_v62  ;;  %vm1266_vm7 = vweird.f32 %v6129_v2  ;;  %2194 = vmatpush.bf16.msrb.mxu2 %v4415_v31  ;;  %5126 = vrsqrt.f32 %v6165_v30  ;;  %vm1315_vm12 = vweird.f32 %v6165_v30 }
  0xeb   : > { %vm6181_vm8 = vmor %vm1265_vm6, %vm1266_vm7 }
  0xec   : > { %v6119_v58 = vpop.f32.mrf.mxu1  ;;  %v1261_v17 = vmul.f32 %v6129_v2, %v1260_v12  ;;  %2206 = vmatpush.bf16.msrb.mxu3 %v4487_v19  ;;  %v461_v19 = vmul.f32 %v5986_v54, %v5986_v54 }
  0xed   : > { %v1097_v3 = vrot.slane %v6119_v58, 4  ;;  %v1130_v7 = vmul.f32 %v6119_v58, %v6119_v58 }
  0xee   : > { %v1262_v59 = vmul.f32 0.5, %v1261_v17  ;;  %2195 = vmatpush.bf16.msrb.mxu2 %v4407_v53  ;;  %v4966_v17 = vld [vmem:[%s7631_s5 + $0x174] sm:$0xf] }
  0xef   : > { %v1098_v15 = vadd.f32 %v1097_v3, %v6119_v58  ;;  %v1153_v16 = vrot.slane %v1130_v7, 4  ;;  %v5033_v3 = vld [vmem:[%s7631_s5 + $0x384] sm:$0xf0] }
  0xf0   : > { %v1263_v39 = vsub.f32 1.5, %v1262_v59  ;;  %2207 = vmatpush.bf16.msrb.mxu3 %v4479_v33  ;;  %v4463_v28 = vor.u32 %v5033_v3, %v4462_v1  ;;  %v4328_v59 = vld [vmem:[%s7631_s5 + $0x278] sm:$0xf0] }
  0xf1   : > { %v1099_v22 = vrot.slane %v1098_v15, 2  ;;  %v1154_v23 = vadd.f32 %v1153_v16, %v1130_v7  ;;  %v460_v7 = vmul.f32 %v5929_v45, %v5929_v45  ;;  %v6211_v13 = vpop.f32.mrf.mxu0 }
  0xf2   : > { %v1264_v62 = vmul.f32 %v6129_v2, %v1263_v39 }
  0xf3   : > { %v1100_v26 = vadd.f32 %v1099_v22, %v1098_v15  ;;  %v1155_v29 = vrot.slane %v1154_v23, 2  ;;  %v437_v15 = vadd.f32 %v436_v60, %v5873_v9  ;;  %v4200_v22 = vld [vmem:[%s7631_s5 + $0x178] sm:$0xf0]  ;;  %v4962_v60 = vld [vmem:[%s7631_s5 + $0x154] sm:$0xf] }
  0xf4   : > { %v1025_v40 = vpop.f32.mrf.mxu1  ;;  %v1268_v63 = vsel %vm6181_vm8, %v6129_v2, %v1264_v62  ;;  %v4398_v2 = vld [vmem:[%s7631_s5 + $0x300] sm:$0xf]  ;;  %2208 = vmatpush.bf16.msrb.mxu3 %v4471_v0  ;;  %v4203_v32 = vor.u32 %v4966_v17, %v4200_v22  ;;  %2223 = vmatmul.bf16.vlgmr.msrb.gmra.mxu0 %v6053_v8  ;;  %v4195_v62 = vor.u32 %v4964_v41, %v4192_v42  ;;  %v4312_v0 = vld [vmem:[%s7631_s5 + $0x258] sm:$0xf0]  ;;  %v4992_v22 = vld [vmem:[%s7631_s5 + $0x244] sm:$0xf] }
  0xf5   : > { %v1101_v35 = vrot.slane %v1100_v26, 1  ;;  %v1156_v48 = vadd.f32 %v1155_v29, %v1154_v23  ;;  %v1321_v10 = vmul.f32 %v1268_v63, %v1225_v44  ;;  %v4399_v16 = vor.u32 %v5017_v14, %v4398_v2  ;;  %v4998_v23 = vld [vmem:[%s7631_s5 + $0x274] sm:$0xf]  ;;  %v4951_v2 = vld [vmem:[%s7631_s5 + $0xf4] sm:$0xf0] }
  0xf6   : > { %v438_v25 = vadd.f32 %v437_v15, %v5929_v45  ;;  %v475_v29 = vadd.f32 %v474_v18, %v460_v7  ;;  %v4331_v38 = vor.u32 %v4998_v23, %v4328_v59  ;;  %v462_v40 = vmul.f32 %v6051_v5, %v6051_v5  ;;  %v4994_v63 = vld [vmem:[%s7631_s5 + $0x254] sm:$0xf]  ;;  %v4304_v23 = vld [vmem:[%s7631_s5 + $0x248] sm:$0xf0]  ;;  %v6311_v59 = vpop.f32.mrf.mxu3 }
  0xf7   : > { %v1102_v56 = vadd.f32 %v1101_v35, %v1100_v26  ;;  %v1157_v57 = vrot.slane %v1156_v48, 1  ;;  %v1329_v20 = vmax.f32 %v1321_v10, 0.0  ;;  %v6237_v26 = vpop.eup %5126  ;;  %2196 = vmatpush.bf16.msrb.mxu2 %v4399_v16  ;;  %v4996_v35 = vld [vmem:[%s7631_s5 + $0x264] sm:$0xf]  ;;  %v465_v7 = vmul.f32 %v6211_v13, %v6211_v13 }
  0xf8   : > { %v439_v39 = vadd.f32 %v438_v25, %v5986_v54  ;;  %v476_v44 = vadd.f32 %v475_v29, %v461_v19  ;;  %v1310_v34 = vmul.f32 %v6237_v26, %v6165_v30  ;;  %2209 = vmatpush.bf16.msrb.mxu3 %v4463_v28  ;;  %2267 = vmatpush.bf16.msra.mxu0 %v4331_v38  ;;  %v1109_v41 = vrot.slane %v6311_v59, 4 }
  0xf9   : > { %v1158_v11 = vadd.f32 %v1157_v57, %v1156_v48  ;;  %v6209_v12 = vmul.f32 0.125, %v1102_v56  ;;  %v6242_v33 = vpack.c.bf16 %v1329_v20, %v1329_v20  ;;  %v4320_v48 = vld [vmem:[%s7631_s5 + $0x268] sm:$0xf0]  ;;  %v6265_v36 = vpop.f32.mrf.mxu0  ;;  %v464_v57 = vmul.f32 %v6153_v24, %v6153_v24 }
  0xfa   : > { %v440_v49 = vadd.f32 %v439_v39, %v6051_v5  ;;  %v4323_v53 = vor.u32 %v4996_v35, %v4320_v48  ;;  %v477_v55 = vadd.f32 %v476_v44, %v462_v40  ;;  %v1311_v10 = vmul.f32 %v6237_v26, %v1310_v34  ;;  %v4958_v34 = vld [vmem:[%s7631_s5 + $0x134] sm:$0xf] }
  0xfb   : > { %v1194_v21 = vmul.f32 0.125, %v1158_v11  ;;  %v1202_v27 = vmul.f32 %v6209_v12, %v6209_v12  ;;  %2145 = vmatmul.bf16.vlgmr.msra.gmra.mxu2 %v6242_v33  ;;  %v4134_v11 = vld [vmem:[%s7631_s5 + $0xf0] sm:$0xf]  ;;  %v4187_v14 = vor.u32 %v4962_v60, %v4184_v61  ;;  %v4315_v15 = vor.u32 %v4994_v63, %v4312_v0  ;;  %v4990_v60 = vld [vmem:[%s7631_s5 + $0x234] sm:$0xf] }
  0xfc   : > { %2241 = vmatpush.bf16.msra.mxu2 %v4203_v32  ;;  %v441_v56 = vadd.f32 %v440_v49, %v6103_v47  ;;  %v478_v3 = vadd.f32 %v477_v55, %v463_v50  ;;  %2268 = vmatpush.bf16.msra.mxu0 %v4323_v53  ;;  %v4135_v16 = vor.u32 %v4951_v2, %v4134_v11  ;;  %v6308_v25 = vmul.f32 0.5, %v1311_v10  ;;  %v4949_v32 = vld [vmem:[%s7631_s5 + $0xe4] sm:$0xf0]  ;;  %v4296_v61 = vld [vmem:[%s7631_s5 + $0x238] sm:$0xf0] }
  0xfd   : > { %v1210_v31 = vsub.f32 %v1194_v21, %v1202_v27  ;;  %v466_v19 = vmul.f32 %v6265_v36, %v6265_v36  ;;  %v4960_v21 = vld [vmem:[%s7631_s5 + $0x144] sm:$0xf]  ;;  %v4176_v27 = vld [vmem:[%s7631_s5 + $0x148] sm:$0xf0]  ;;  %v1132_v42 = vmul.f32 %v6311_v59, %v6311_v59  ;;  %v4307_v44 = vor.u32 %v4992_v22, %v4304_v23 }
  0xfe   : > { %v442_v1 = vadd.f32 %v441_v56, %v6153_v24  ;;  %v479_v17 = vadd.f32 %v478_v3, %v464_v57  ;;  %2124 = vmatpush.bf16.msra.mxu1 %v4135_v16  ;;  %v4179_v29 = vor.u32 %v4960_v21, %v4176_v27  ;;  %v1110_v56 = vadd.f32 %v1109_v41, %v6311_v59  ;;  %v4118_v3 = vld [vmem:[%s7631_s5 + $0xd0] sm:$0xf]  ;;  %v4988_v23 = vld [vmem:[%s7631_s5 + $0x224] sm:$0xf]  ;;  %v4110_v41 = vld [vmem:[%s7631_s5 + $0xc0] sm:$0xf] }
  0xff   : > { %v1218_v46 = vmax.f32 %v1210_v31, 0.0  ;;  %v4126_v31 = vld [vmem:[%s7631_s5 + $0xe0] sm:$0xf]  ;;  %v1165_v57 = vrot.slane %v1132_v42, 4  ;;  %v4299_v27 = vor.u32 %v4990_v60, %v4296_v61  ;;  %v4152_v61 = vld [vmem:[%s7631_s5 + $0x118] sm:$0xf0]  ;;  %vm1316_vm13 = vweird.f32 %v6237_v26 }
 0x100   : > { %2242 = vmatpush.bf16.msra.mxu2 %v4195_v62  ;;  %v443_v18 = vadd.f32 %v442_v1, %v6211_v13  ;;  %v480_v20 = vadd.f32 %v479_v17, %v465_v7  ;;  %2269 = vmatpush.bf16.msra.mxu0 %v4315_v15  ;;  %v4168_v62 = vld [vmem:[%s7631_s5 + $0x138] sm:$0xf0]  ;;  %v4947_v7 = vld [vmem:[%s7631_s5 + $0xd4] sm:$0xf0]  ;;  %v1111_v11 = vrot.slane %v1110_v56, 2  ;;  %vm6436_vm14 = vmor %vm1315_vm12, %vm1316_vm13  ;;  %v1230_v30 = vsub.f32 %v6017_v43, %v6114_v52 }
 0x101   : > { %v6263_v8 = vadd.f32 1e-05, %v1218_v46  ;;  %v6323_v40 = vpop.f32.mrf.mxu0  ;;  %v4127_v46 = vor.u32 %v4949_v32, %v4126_v31  ;;  %v1166_v2 = vadd.f32 %v1165_v57, %v1132_v42  ;;  %v4171_v17 = vor.u32 %v4958_v34, %v4168_v62  ;;  %v4945_v42 = vld [vmem:[%s7631_s5 + $0xc4] sm:$0xf0] }
 0x102   : > { %v444_v28 = vadd.f32 %v443_v18, %v6265_v36  ;;  %v481_v48 = vadd.f32 %v480_v20, %v466_v19  ;;  %v467_v55 = vmul.f32 %v6323_v40, %v6323_v40  ;;  %v4956_v18 = vld [vmem:[%s7631_s5 + $0x124] sm:$0xf]  ;;  %v4160_v19 = vld [vmem:[%s7631_s5 + $0x128] sm:$0xf0]  ;;  %v4119_v22 = vor.u32 %v4947_v7, %v4118_v3  ;;  %v4982_v7 = vld [vmem:[%s7631_s5 + $0x1f4] sm:$0xf] }
 0x103   : > { %5128 = vrsqrt.f32 %v6263_v8  ;;  %2125 = vmatpush.bf16.msra.mxu1 %v4127_v46  ;;  %vm1275_vm9 = vweird.f32 %v6263_v8  ;;  %v1167_v21 = vrot.slane %v1166_v2, 2  ;;  %v1112_v32 = vadd.f32 %v1111_v11, %v1110_v56  ;;  %v4264_v11 = vld [vmem:[%s7631_s5 + $0x1f8] sm:$0xf0] }
 0x104   : > { %2243 = vmatpush.bf16.msra.mxu2 %v4187_v14  ;;  %v445_v53 = vadd.f32 %v444_v28, %v6323_v40  ;;  %v482_v10 = vadd.f32 %v481_v48, %v467_v55  ;;  %2270 = vmatpush.bf16.msra.mxu0 %v4307_v44  ;;  %v4288_v28 = vld [vmem:[%s7631_s5 + $0x228] sm:$0xf0]  ;;  %v1051_v44 = vpop.f32.mrf.mxu3  ;;  %v1226_v46 = vsub.f32 %v6119_v58, %v6209_v12  ;;  %v1313_v48 = vsub.f32 1.5, %v6308_v25 }
 0x105   : > { %v4291_v34 = vor.u32 %v4988_v23, %v4288_v28  ;;  %v1168_v57 = vadd.f32 %v1167_v21, %v1166_v2  ;;  %v4111_v60 = vor.u32 %v4945_v42, %v4110_v41  ;;  %v1113_v2 = vrot.slane %v1112_v32, 1  ;;  %v4952_v28 = vld [vmem:[%s7631_s5 + $0x104] sm:$0xf]  ;;  %v4256_v44 = vld [vmem:[%s7631_s5 + $0x1e8] sm:$0xf0] }
 0x106   : > { %v4980_v42 = vld [vmem:[%s7631_s5 + $0x1e4] sm:$0xf] }
 0x107   : > { %2126 = vmatpush.bf16.msra.mxu1 %v4119_v22  ;;  %v1169_v23 = vrot.slane %v1168_v57, 1 }
 0x108   : > { %2244 = vmatpush.bf16.msra.mxu2 %v4179_v29  ;;  %2271 = vmatpush.bf16.msra.mxu0 %v4299_v27  ;;  %v1314_v27 = vmul.f32 %v6237_v26, %v1313_v48 }
 0x109   : > { %v6319_v38 = vpop.eup %5128 }
 0x10a   : > { %v1270_v35 = vmul.f32 %v6319_v38, %v6263_v8  ;;  %vm1276_vm10 = vweird.f32 %v6319_v38  ;;  %v4954_v8 = vld [vmem:[%s7631_s5 + $0x114] sm:$0xf] }
 0x10b   : > { %vm6383_vm11 = vmor %vm1275_vm9, %vm1276_vm10  ;;  %2127 = vmatpush.bf16.msra.mxu1 %v4111_v60  ;;  %v1170_v60 = vadd.f32 %v1169_v23, %v1168_v57  ;;  %v4248_v57 = vld [vmem:[%s7631_s5 + $0x1d8] sm:$0xf0] }
 0x10c   : > { %v6321_v39 = vpop.f32.mrf.mxu1  ;;  %v1271_v63 = vmul.f32 %v6319_v38, %v1270_v35  ;;  %2245 = vmatpush.bf16.msra.mxu2 %v4171_v17  ;;  %2272 = vmatpush.bf16.msra.mxu0 %v4291_v34  ;;  %v4984_v34 = vld [vmem:[%s7631_s5 + $0x204] sm:$0xf] }
 0x10d   : > { %v1115_v49 = vrot.slane %v6321_v39, 4  ;;  %v1133_v50 = vmul.f32 %v6321_v39, %v6321_v39 }
 0x10e   : > { %v1272_v14 = vmul.f32 0.5, %v1271_v63  ;;  %v4986_v63 = vld [vmem:[%s7631_s5 + $0x214] sm:$0xf] }
 0x10f   : > { %v1116_v0 = vadd.f32 %v1115_v49, %v6321_v39  ;;  %v1171_v1 = vrot.slane %v1133_v50, 4  ;;  %v6388_v49 = vpop.f32.mrf.mxu0 }
 0x110   : > { %v1273_v20 = vsub.f32 1.5, %v1272_v14  ;;  %v446_v56 = vadd.f32 %v445_v53, %v6388_v49  ;;  %v468_v25 = vmul.f32 %v6388_v49, %v6388_v49  ;;  %v4280_v53 = vld [vmem:[%s7631_s5 + $0x218] sm:$0xf0] }
 0x111   : > { %v1117_v15 = vrot.slane %v1116_v0, 2  ;;  %v1172_v16 = vadd.f32 %v1171_v1, %v1133_v50  ;;  %v4163_v50 = vor.u32 %v4956_v18, %v4160_v19  ;;  %v4155_v19 = vor.u32 %v4954_v8, %v4152_v61 }
 0x112   : > { %v1274_v55 = vmul.f32 %v6319_v38, %v1273_v20  ;;  %v4283_v21 = vor.u32 %v4986_v63, %v4280_v53  ;;  %v4144_v20 = vld [vmem:[%s7631_s5 + $0x108] sm:$0xf0]  ;;  %v1318_v8 = vsel %vm6436_vm14, %v6237_v26, %v1314_v27  ;;  %v4978_v26 = vld [vmem:[%s7631_s5 + $0x1d4] sm:$0xf] }
 0x113   : > { %v1118_v29 = vadd.f32 %v1117_v15, %v1116_v0  ;;  %v1173_v31 = vrot.slane %v1172_v16, 2  ;;  %v483_v15 = vadd.f32 %v482_v10, %v468_v25  ;;  %2246 = vmatpush.bf16.msra.mxu2 %v4163_v50  ;;  %v4267_v10 = vor.u32 %v4982_v7, %v4264_v11  ;;  %v4240_v27 = vld [vmem:[%s7631_s5 + $0x1c8] sm:$0xf0] }
 0x114   : > { %v1064_v62 = vpop.f32.mrf.mxu1  ;;  %v1278_v0 = vsel %vm6383_vm11, %v6319_v38, %v1274_v55  ;;  %v4102_v38 = vld [vmem:[%s7631_s5 + $0xb0] sm:$0xf]  ;;  %2273 = vmatpush.bf16.msra.mxu0 %v4283_v21  ;;  %v4259_v25 = vor.u32 %v4980_v42, %v4256_v44  ;;  %v4974_v44 = vld [vmem:[%s7631_s5 + $0x1b4] sm:$0xf] }
 0x115   : > { %v1119_v58 = vrot.slane %v1118_v29, 1  ;;  %v1174_v12 = vadd.f32 %v1173_v31, %v1172_v16  ;;  %v1322_v14 = vmul.f32 %v1278_v0, %v1226_v46  ;;  %v4943_v16 = vld [vmem:[%s7631_s5 + $0xb4] sm:$0xf0]  ;;  %v1114_v46 = vadd.f32 %v1113_v2, %v1112_v32  ;;  %v4272_v62 = vld [vmem:[%s7631_s5 + $0x208] sm:$0xf0] }
 0x116   : > { %v4103_v35 = vor.u32 %v4943_v16, %v4102_v38  ;;  %v4094_v32 = vld [vmem:[%s7631_s5 + $0xa0] sm:$0xf]  ;;  %v4275_v61 = vor.u32 %v4984_v34, %v4272_v62  ;;  %v1326_v2 = vmul.f32 %v1318_v8, %v1230_v30  ;;  %v1196_v38 = vmul.f32 0.125, %v1170_v60  ;;  %v5013_v30 = vld [vmem:[%s7631_s5 + $0x2e4] sm:$0xf0] }
 0x117   : > { %v1120_v1 = vadd.f32 %v1119_v58, %v1118_v29  ;;  %v1175_v3 = vrot.slane %v1174_v12, 1  ;;  %v1330_v22 = vmax.f32 %v1322_v14, 0.0  ;;  %v6450_v48 = vpop.f32.mrf.mxu0  ;;  %2247 = vmatpush.bf16.msra.mxu2 %v4155_v19  ;;  %v4147_v58 = vor.u32 %v4952_v28, %v4144_v20  ;;  %v4976_v14 = vld [vmem:[%s7631_s5 + $0x1c4] sm:$0xf]  ;;  %v4937_v19 = vld [vmem:[%s7631_s5 + $0x84] sm:$0xf0] }
 0x118   : > { %v447_v43 = vadd.f32 %v446_v56, %v6450_v48  ;;  %v469_v52 = vmul.f32 %v6450_v48, %v6450_v48  ;;  %2128 = vmatpush.bf16.msra.mxu1 %v4103_v35  ;;  %v6473_v53 = vmul.f32 0.125, %v1114_v46  ;;  %2274 = vmatpush.bf16.msra.mxu0 %v4275_v61  ;;  %v1334_v20 = vmax.f32 %v1326_v2, 0.0  ;;  %v4232_v46 = vld [vmem:[%s7631_s5 + $0x1b8] sm:$0xf0]  ;;  %v4382_v35 = vld [vmem:[%s7631_s5 + $0x2e0] sm:$0xf] }
 0x119   : > { %v1176_v17 = vadd.f32 %v1175_v3, %v1174_v12  ;;  %v6423_v18 = vmul.f32 0.125, %v1120_v1  ;;  %v6452_v50 = vpack.c.bf16 %v1330_v22, %v1330_v22  ;;  %v4941_v12 = vld [vmem:[%s7631_s5 + $0xa4] sm:$0xf0]  ;;  %v4086_v1 = vld [vmem:[%s7631_s5 + $0x90] sm:$0xf] }
 0x11a   : > { %v484_v56 = vadd.f32 %v483_v15, %v469_v52  ;;  %v4095_v0 = vor.u32 %v4941_v12, %v4094_v32  ;;  %v4939_v3 = vld [vmem:[%s7631_s5 + $0x94] sm:$0xf0]  ;;  %v4251_v15 = vor.u32 %v4978_v26, %v4248_v57  ;;  %v1204_v16 = vmul.f32 %v6473_v53, %v6473_v53  ;;  %v4390_v22 = vld [vmem:[%s7631_s5 + $0x2f0] sm:$0xf] }
 0x11b   : > { %v1197_v31 = vmul.f32 0.125, %v1176_v17  ;;  %v1205_v41 = vmul.f32 %v6423_v18, %v6423_v18  ;;  %2158 = vmatmul.bf16.vlgmr.msra.gmra.mxu3 %v6452_v50  ;;  %2248 = vmatpush.bf16.msra.mxu2 %v4147_v58  ;;  %v4087_v11 = vor.u32 %v4939_v3, %v4086_v1  ;;  %v4078_v17 = vld [vmem:[%s7631_s5 + $0x80] sm:$0xf]  ;;  %v6529_v32 = vpack.c.bf16 %v1334_v20, %v1334_v20  ;;  %v4972_v58 = vld [vmem:[%s7631_s5 + $0x1a4] sm:$0xf] }
 0x11c   : > { %2254 = vmatpush.bf16.msra.mxu3 %v4267_v10  ;;  %2129 = vmatpush.bf16.msra.mxu1 %v4095_v0  ;;  %v4079_v28 = vor.u32 %v4937_v19, %v4078_v17  ;;  %v1212_v42 = vsub.f32 %v1196_v38, %v1204_v16  ;;  %v4235_v52 = vor.u32 %v4974_v44, %v4232_v46  ;;  %v4374_v60 = vld [vmem:[%s7631_s5 + $0x2d0] sm:$0xf]  ;;  %v5011_v61 = vld [vmem:[%s7631_s5 + $0x2d4] sm:$0xf0]  ;;  %v4970_v1 = vld [vmem:[%s7631_s5 + $0x194] sm:$0xf] }
 0x11d   : > { %v1213_v55 = vsub.f32 %v1197_v31, %v1205_v41  ;;  %2275 = vmatmul.bf16.vlgmr.msra.gmra.mxu0 %v6134_v4  ;;  %v5015_v4 = vld [vmem:[%s7631_s5 + $0x2f4] sm:$0xf0]  ;;  %v4243_v41 = vor.u32 %v4976_v14, %v4240_v27  ;;  %v4375_v3 = vor.u32 %v5011_v61, %v4374_v60  ;;  %v4216_v14 = vld [vmem:[%s7631_s5 + $0x198] sm:$0xf0]  ;;  %v4366_v38 = vld [vmem:[%s7631_s5 + $0x2c0] sm:$0xf]  ;;  %v1229_v17 = vsub.f32 %v6321_v39, %v6423_v18 }
 0x11e   : > { %v4391_v29 = vor.u32 %v5015_v4, %v4390_v22  ;;  %v5009_v16 = vld [vmem:[%s7631_s5 + $0x2c4] sm:$0xf0]  ;;  %v4219_v39 = vor.u32 %v4970_v1, %v4216_v14  ;;  %v4208_v18 = vld [vmem:[%s7631_s5 + $0x188] sm:$0xf0]  ;;  %v5007_v44 = vld [vmem:[%s7631_s5 + $0x2b4] sm:$0xf0] }
 0x11f   : > { %v1221_v63 = vmax.f32 %v1213_v55, 0.0  ;;  %v6502_v21 = vpop.f32.mrf.mxu0  ;;  %v4383_v55 = vor.u32 %v5013_v30, %v4382_v35 }
 0x120   : > { %2255 = vmatpush.bf16.msra.mxu3 %v4259_v25  ;;  %v448_v10 = vadd.f32 %v447_v43, %v6502_v21  ;;  %v470_v23 = vmul.f32 %v6502_v21, %v6502_v21  ;;  %2130 = vmatpush.bf16.msra.mxu1 %v4087_v11  ;;  %v1220_v43 = vmax.f32 %v1212_v42, 0.0  ;;  %v4224_v25 = vld [vmem:[%s7631_s5 + $0x1a8] sm:$0xf0]  ;;  %v4358_v42 = vld [vmem:[%s7631_s5 + $0x2b0] sm:$0xf] }
 0x121   : > { %v6487_v7 = vadd.f32 1e-05, %v1221_v63  ;;  %v4227_v2 = vor.u32 %v4972_v58, %v4224_v25  ;;  %v4359_v58 = vor.u32 %v5007_v44, %v4358_v42  ;;  %v5003_v42 = vld [vmem:[%s7631_s5 + $0x294] sm:$0xf0] }
 0x122   : > { %v485_v31 = vadd.f32 %v484_v56, %v470_v23  ;;  %v6553_v26 = vadd.f32 1e-05, %v1220_v43  ;;  %v4367_v23 = vor.u32 %v5009_v16, %v4366_v38  ;;  %v5028_v16 = vld [vmem:[%s7631_s5 + $0x364] sm:$0xf] }
 0x123   : > { %5130 = vrsqrt.f32 %v6487_v7  ;;  %vm1305_vm15 = vweird.f32 %v6487_v7 }
 0x124   : > { %2256 = vmatpush.bf16.msra.mxu3 %v4251_v15  ;;  %2131 = vmatpush.bf16.msra.mxu1 %v4079_v28  ;;  %5132 = vrsqrt.f32 %v6553_v26  ;;  %vm1295_vm2 = vweird.f32 %v6553_v26 }
 0x127   : > { %v6534_v8 = vpop.f32.mrf.mxu0 }
 0x128   : > { %2176 = vmatpush.bf16.msrb.mxu1 %v4391_v29  ;;  %2257 = vmatpush.bf16.msra.mxu3 %v4243_v41  ;;  %v449_v63 = vadd.f32 %v448_v10, %v6534_v8  ;;  %v471_v56 = vmul.f32 %v6534_v8, %v6534_v8  ;;  %v4968_v10 = vld [vmem:[%s7631_s5 + $0x184] sm:$0xf]  ;;  %v4520_v41 = vld [vmem:[%s7631_s5 + $0x3f8] sm:$0xf0] }
 0x129   : > { %v5131_v34 = vpop.eup %5130 }
 0x12a   : > { %v1300_v62 = vmul.f32 %v5131_v34, %v6487_v7  ;;  %vm1306_vm0 = vweird.f32 %v5131_v34  ;;  %v450_v57 = vrot.slane %v449_v63, 4  ;;  %v486_v11 = vadd.f32 %v485_v31, %v471_v56  ;;  %v5046_v7 = vld [vmem:[%s7631_s5 + $0x3f4] sm:$0xf]  ;;  %v4512_v56 = vld [vmem:[%s7631_s5 + $0x3e8] sm:$0xf0]  ;;  %v6626_v19 = vpop.eup %5132 }
 0x12b   : > { %2210 = vmatmul.bf16.vlgmr.msrb.gmra.mxu3 %v6529_v32  ;;  %vm6569_vm1 = vmor %vm1305_vm15, %vm1306_vm0  ;;  %v4523_v1 = vor.u32 %v5046_v7, %v4520_v41  ;;  %v4342_v41 = vld [vmem:[%s7631_s5 + $0x290] sm:$0xf]  ;;  %vm1296_vm3 = vweird.f32 %v6626_v19 }
 0x12c   : > { %v1301_v12 = vmul.f32 %v5131_v34, %v1300_v62  ;;  %2177 = vmatpush.bf16.msrb.mxu1 %v4383_v55  ;;  %2258 = vmatpush.bf16.msra.mxu3 %v4235_v52  ;;  %v451_v27 = vadd.f32 %v450_v57, %v449_v63  ;;  %v487_v22 = vrot.slane %v486_v11, 4  ;;  %v5030_v62 = vld [vmem:[%s7631_s5 + $0x374] sm:$0xf]  ;;  %v4456_v55 = vld [vmem:[%s7631_s5 + $0x378] sm:$0xf0]  ;;  %v4211_v52 = vor.u32 %v4968_v10, %v4208_v18  ;;  %vm6740_vm4 = vmor %vm1295_vm2, %vm1296_vm3 }
 0x12d   : > { %v5044_v63 = vld [vmem:[%s7631_s5 + $0x3e4] sm:$0xf]  ;;  %v4350_v57 = vld [vmem:[%s7631_s5 + $0x2a0] sm:$0xf] }
 0x12e   : > { %v1302_v0 = vmul.f32 0.5, %v1301_v12  ;;  %v452_v28 = vrot.slane %v451_v27, 2  ;;  %v488_v20 = vadd.f32 %v487_v22, %v486_v11  ;;  %v5005_v11 = vld [vmem:[%s7631_s5 + $0x2a4] sm:$0xf0]  ;;  %v4515_v7 = vor.u32 %v5044_v63, %v4512_v56 }
 0x12f   : > { %v6585_v31 = vpop.f32.mrf.mxu0  ;;  %v4351_v22 = vor.u32 %v5005_v11, %v4350_v57 }
 0x130   : > { %v1303_v15 = vsub.f32 1.5, %v1302_v0  ;;  %2178 = vmatpush.bf16.msrb.mxu1 %v4375_v3  ;;  %2259 = vmatpush.bf16.msra.mxu3 %v4227_v2  ;;  %v453_v35 = vadd.f32 %v452_v28, %v451_v27  ;;  %v489_v30 = vrot.slane %v488_v20, 2  ;;  %v1128_v43 = vmul.f32 %v6585_v31, %v6585_v31  ;;  %v5042_v28 = vld [vmem:[%s7631_s5 + $0x3d4] sm:$0xf] }
 0x131   : > { %v4459_v3 = vor.u32 %v5030_v62, %v4456_v55  ;;  %v4440_v62 = vld [vmem:[%s7631_s5 + $0x358] sm:$0xf0]  ;;  %v1290_v55 = vmul.f32 %v6626_v19, %v6553_v26  ;;  %v5016_v26 = vld [vmem:[%s7631_s5 + $0x304] sm:$0xf] }
 0x132   : > { %v1304_v4 = vmul.f32 %v5131_v34, %v1303_v15  ;;  %v454_v12 = vrot.slane %v453_v35, 1  ;;  %v490_v25 = vadd.f32 %v489_v30, %v488_v20  ;;  %v1141_v0 = vrot.slane %v1128_v43, 4  ;;  %v4504_v20 = vld [vmem:[%s7631_s5 + $0x3d8] sm:$0xf0] }
 0x133   : > { %v4507_v56 = vor.u32 %v5042_v28, %v4504_v20 }
 0x134   : > { %v1308_v29 = vsel %vm6569_vm1, %v5131_v34, %v1304_v4  ;;  %v1085_v34 = vrot.slane %v6585_v31, 4  ;;  %2179 = vmatpush.bf16.msrb.mxu1 %v4367_v23  ;;  %2260 = vmatpush.bf16.msra.mxu3 %v4219_v39  ;;  %v455_v2 = vadd.f32 %v454_v12, %v453_v35  ;;  %v491_v14 = vrot.slane %v490_v25, 1 }
 0x135   : > { %v1325_v46 = vmul.f32 %v1308_v29, %v1229_v17  ;;  %v4448_v17 = vld [vmem:[%s7631_s5 + $0x368] sm:$0xf0]  ;;  %v1142_v27 = vadd.f32 %v1141_v0, %v1128_v43 }
 0x136   : > { %v1086_v60 = vadd.f32 %v1085_v34, %v6585_v31  ;;  %v492_v4 = vadd.f32 %v491_v14, %v490_v25  ;;  %v6628_v10 = vmul.f32 0.0078125, %v455_v2  ;;  %v4451_v29 = vor.u32 %v5028_v16, %v4448_v17  ;;  %v5026_v34 = vld [vmem:[%s7631_s5 + $0x354] sm:$0xf] }
 0x137   : > { %v1333_v61 = vmax.f32 %v1325_v46, 0.0  ;;  %v1143_v39 = vrot.slane %v1142_v27, 2  ;;  %v999_v18 = vpop.f32.mrf.mxu0  ;;  %v4443_v0 = vor.u32 %v5026_v34, %v4440_v62  ;;  %v1291_v2 = vmul.f32 %v6626_v19, %v1290_v55  ;;  %v5036_v55 = vld [vmem:[%s7631_s5 + $0x3a4] sm:$0xf] }
 0x138   : > { %v1087_v15 = vrot.slane %v1086_v60, 2  ;;  %2180 = vmatpush.bf16.msrb.mxu1 %v4359_v58  ;;  %2261 = vmatpush.bf16.msra.mxu3 %v4211_v52  ;;  %v494_v44 = vmul.f32 0.0078125, %v492_v4  ;;  %v495_v46 = vmul.f32 %v6628_v10, %v6628_v10  ;;  %v513_v35 = vsub.f32 %v6534_v8, %v6628_v10  ;;  %v5040_v52 = vld [vmem:[%s7631_s5 + $0x3c4] sm:$0xf]  ;;  %v4488_v18 = vld [vmem:[%s7631_s5 + $0x3b8] sm:$0xf0] }
 0x139   : > { %v6618_v38 = vpack.c.bf16 %v1333_v61, %v1333_v61  ;;  %v1144_v43 = vadd.f32 %v1143_v39, %v1142_v27  ;;  %v4343_v58 = vor.u32 %v5003_v42, %v4342_v41  ;;  %v4334_v61 = vld [vmem:[%s7631_s5 + $0x280] sm:$0xf]  ;;  %v508_v28 = vsub.f32 %v6265_v36, %v6628_v10 }
 0x13a   : > { %v1088_v23 = vadd.f32 %v1087_v15, %v1086_v60  ;;  %v496_v12 = vsub.f32 %v494_v44, %v495_v46  ;;  %v4496_v60 = vld [vmem:[%s7631_s5 + $0x3c8] sm:$0xf0]  ;;  %v509_v20 = vsub.f32 %v6323_v40, %v6628_v10  ;;  %v510_v39 = vsub.f32 %v6388_v49, %v6628_v10 }
 0x13b   : > { %2197 = vmatmul.bf16.vlgmr.msrb.gmra.mxu2 %v6618_v38  ;;  %2262 = vmatmul.bf16.vlgmr.msra.gmra.mxu3 %v6452_v50  ;;  %v5001_v50 = vld [vmem:[%s7631_s5 + $0x284] sm:$0xf0]  ;;  %v1145_v63 = vrot.slane %v1144_v43, 1  ;;  %v4499_v27 = vor.u32 %v5040_v52, %v4496_v60  ;;  %v511_v41 = vsub.f32 %v6450_v48, %v6628_v10  ;;  %v512_v42 = vsub.f32 %v6502_v21, %v6628_v10  ;;  %v5020_v52 = vld [vmem:[%s7631_s5 + $0x324] sm:$0xf] }
 0x13c   : > { %2306 = vmatpush.bf16.msrb.mxu3 %v4523_v1  ;;  %2293 = vmatpush.bf16.msrb.mxu2 %v4459_v3  ;;  %v1089_v30 = vrot.slane %v1088_v23, 1  ;;  %v5024_v1 = vld [vmem:[%s7631_s5 + $0x344] sm:$0xf]  ;;  %v4432_v3 = vld [vmem:[%s7631_s5 + $0x348] sm:$0xf0]  ;;  %v497_v57 = vmax.f32 %v496_v12, 0.0  ;;  %v4335_v15 = vor.u32 %v5001_v50, %v4334_v61 }
 0x13d   : > { %2181 = vmatpush.bf16.msrb.mxu1 %v4351_v22  ;;  %v1146_v14 = vadd.f32 %v1145_v63, %v1144_v43  ;;  %v4435_v22 = vor.u32 %v5024_v1, %v4432_v3  ;;  %v1292_v44 = vmul.f32 0.5, %v1291_v2  ;;  %v4480_v43 = vld [vmem:[%s7631_s5 + $0x3a8] sm:$0xf0]  ;;  %v4408_v1 = vld [vmem:[%s7631_s5 + $0x318] sm:$0xf0] }
 0x13e   : > { %v1090_v25 = vadd.f32 %v1089_v30, %v1088_v23  ;;  %v6677_v16 = vadd.f32 1e-05, %v497_v57  ;;  %v5038_v23 = vld [vmem:[%s7631_s5 + $0x3b4] sm:$0xf]  ;;  %v4483_v50 = vor.u32 %v5036_v55, %v4480_v43  ;;  %v498_v55 = vsub.f32 %v5752_v51, %v6628_v10 }
 0x13f   : > { %v1192_v4 = vmul.f32 0.125, %v1146_v14  ;;  %v4491_v34 = vor.u32 %v5038_v23, %v4488_v18  ;;  %v1293_v12 = vsub.f32 1.5, %v1292_v44  ;;  %v5032_v14 = vld [vmem:[%s7631_s5 + $0x384] sm:$0xf]  ;;  %v1228_v23 = vsub.f32 %v6311_v59, %v6473_v53 }
 0x140   : > { %2307 = vmatpush.bf16.msrb.mxu3 %v4515_v7  ;;  %2294 = vmatpush.bf16.msrb.mxu2 %v4451_v29  ;;  %v6674_v11 = vmul.f32 0.125, %v1090_v25  ;;  %5134 = vrsqrt.f32 %v6677_v16  ;;  %v5022_v7 = vld [vmem:[%s7631_s5 + $0x334] sm:$0xf]  ;;  %v4424_v29 = vld [vmem:[%s7631_s5 + $0x338] sm:$0xf0]  ;;  %v499_v43 = vsub.f32 %v5785_v6, %v6628_v10  ;;  %vm521_vm6 = vweird.f32 %v6677_v16 }
 0x141   : > { %2182 = vmatpush.bf16.msrb.mxu1 %v4343_v58  ;;  %v4427_v62 = vor.u32 %v5022_v7, %v4424_v29  ;;  %v4416_v58 = vld [vmem:[%s7631_s5 + $0x328] sm:$0xf0]  ;;  %v6736_v3 = vmul.f32 %v6626_v19, %v1293_v12  ;;  %v501_v12 = vsub.f32 %v5873_v9, %v6628_v10  ;;  %v503_v51 = vsub.f32 %v5986_v54, %v6628_v10  ;;  %v4944_v59 = vld [vmem:[%s7631_s5 + $0xc4] sm:$0xf] }
 0x142   : > { %v1200_v17 = vmul.f32 %v6674_v11, %v6674_v11  ;;  %v4419_v63 = vor.u32 %v5020_v52, %v4416_v58  ;;  %v500_v58 = vsub.f32 %v5830_v37, %v6628_v10  ;;  %v504_v6 = vsub.f32 %v6051_v5, %v6628_v10 }
 0x143   : > { %v1298_v7 = vsel %vm6740_vm4, %v6626_v19, %v6736_v3  ;;  %v505_v37 = vsub.f32 %v6103_v47, %v6628_v10  ;;  %v506_v9 = vsub.f32 %v6153_v24, %v6628_v10 }
 0x144   : > { %2308 = vmatpush.bf16.msrb.mxu3 %v4507_v56  ;;  %2295 = vmatpush.bf16.msrb.mxu2 %v4443_v0  ;;  %v1208_v46 = vsub.f32 %v1192_v4, %v1200_v17  ;;  %v5034_v56 = vld [vmem:[%s7631_s5 + $0x394] sm:$0xf]  ;;  %v4472_v0 = vld [vmem:[%s7631_s5 + $0x398] sm:$0xf0]  ;;  %v4400_v4 = vld [vmem:[%s7631_s5 + $0x308] sm:$0xf0]  ;;  %v1324_v49 = vmul.f32 %v1298_v7, %v1228_v23 }
 0x145   : > { %2183 = vmatpush.bf16.msrb.mxu1 %v4335_v15  ;;  %v4464_v15 = vld [vmem:[%s7631_s5 + $0x388] sm:$0xf0] }
 0x146   : > { %v1216_v30 = vmax.f32 %v1208_v46, 0.0  ;;  %v5135_v60 = vpop.eup %5134  ;;  %v4467_v44 = vor.u32 %v5032_v14, %v4464_v15  ;;  %v1224_v15 = vsub.f32 %v6585_v31, %v6674_v11 }
 0x147   : > { %v516_v61 = vmul.f32 %v5135_v60, %v6677_v16  ;;  %vm522_vm5 = vweird.f32 %v5135_v60 }
 0x148   : > { %2309 = vmatpush.bf16.msrb.mxu3 %v4499_v27  ;;  %2296 = vmatpush.bf16.msrb.mxu2 %v4435_v22  ;;  %v6716_v25 = vadd.f32 1e-05, %v1216_v30  ;;  %v4475_v27 = vor.u32 %v5034_v56, %v4472_v0  ;;  %v4403_v30 = vor.u32 %v5016_v26, %v4400_v4  ;;  %vm523_vm7 = vmor %vm521_vm6, %vm522_vm5 }
 0x149   : > { %v517_v57 = vmul.f32 %v5135_v60, %v516_v61 }
 0x14a   : > { %5136 = vrsqrt.f32 %v6716_v25  ;;  %vm1255_vm10 = vweird.f32 %v6716_v25 }
 0x14b   : > { %2249 = vmatmul.bf16.vlgmr.msra.gmra.mxu2 %v6242_v33  ;;  %v5018_v33 = vld [vmem:[%s7631_s5 + $0x314] sm:$0xf]  ;;  %v518_v17 = vmul.f32 0.5, %v517_v57 }
 0x14c   : > { %2310 = vmatpush.bf16.msrb.mxu3 %v4491_v34  ;;  %2297 = vmatpush.bf16.msrb.mxu2 %v4427_v62  ;;  %v4411_v22 = vor.u32 %v5018_v33, %v4408_v1  ;;  %v6766_v34 = vld [vmem:[%s7631_s5 + $0xf4] sm:$0xf]  ;;  %v6771_v62 = vld [vmem:[%s7631_s5 + $0xf8] sm:$0xf0] }
 0x14d   : > { %v519_v29 = vsub.f32 1.5, %v518_v17 }
 0x14f   : > { %v520_v52 = vmul.f32 %v5135_v60, %v519_v29 }
 0x150   : > { %2311 = vmatpush.bf16.msrb.mxu3 %v4483_v50  ;;  %2298 = vmatpush.bf16.msrb.mxu2 %v4419_v63  ;;  %v5137_v18 = vpop.eup %5136  ;;  %v502_v50 = vsub.f32 %v5929_v45, %v6628_v10  ;;  %v4139_v63 = vor.u32 %v6766_v34, %v6771_v62 }
 0x151   : > { %v1250_v46 = vmul.f32 %v5137_v18, %v6716_v25  ;;  %v6788_v16 = vsel %vm523_vm7, %v5135_v60, %v520_v52  ;;  %vm1256_vm8 = vweird.f32 %v5137_v18  ;;  %v507_v52 = vsub.f32 %v6211_v13, %v6628_v10 }
 0x152   : > { %v6800_v45 = vmul.f32 %v6788_v16, %v513_v35  ;;  %v525_v5 = vmul.f32 %v6788_v16, %v498_v55  ;;  %v526_v60 = vmul.f32 %v6788_v16, %v499_v43  ;;  %v527_v56 = vmul.f32 %v6788_v16, %v500_v58  ;;  %vm1257_vm14 = vmor %vm1255_vm10, %vm1256_vm8  ;;  %v4128_v55 = vld [vmem:[%s7631_s5 + $0xe8] sm:$0xf0] }
 0x153   : > { %v1251_v61 = vmul.f32 %v5137_v18, %v1250_v46  ;;  %v528_v47 = vmul.f32 %v6788_v16, %v501_v12  ;;  %v529_v24 = vmul.f32 %v6788_v16, %v502_v50  ;;  %v530_v8 = vmul.f32 %v6788_v16, %v503_v51 }
 0x154   : > { %2312 = vmatpush.bf16.msrb.mxu3 %v4475_v27  ;;  %2299 = vmatpush.bf16.msrb.mxu2 %v4411_v22  ;;  %vm541_vm9 = vcmp.ge.f32.partialorder %v525_v5, 0.0  ;;  %v531_v35 = vmul.f32 %v6788_v16, %v504_v6  ;;  %vm542_vm11 = vcmp.ge.f32.partialorder %v526_v60, 0.0  ;;  %v557_v33 = vmul.f32 0.2, %v525_v5 }
 0x155   : > { %v1252_v54 = vmul.f32 0.5, %v1251_v61  ;;  %v558_v1 = vmul.f32 0.2, %v526_v60  ;;  %vm543_vm12 = vcmp.ge.f32.partialorder %v527_v56, 0.0  ;;  %vm544_vm13 = vcmp.ge.f32.partialorder %v528_v47, 0.0 }
 0x156   : > { %v559_v14 = vmul.f32 0.2, %v527_v56  ;;  %v6816_v17 = vsel %vm541_vm9, %v525_v5, %v557_v33  ;;  %v560_v27 = vmul.f32 0.2, %v528_v47  ;;  %vm545_vm15 = vcmp.ge.f32.partialorder %v529_v24, 0.0 }
 0x157   : > { %v1253_v0 = vsub.f32 1.5, %v1252_v54  ;;  %v6818_v25 = vsel %vm542_vm11, %v526_v60, %v558_v1  ;;  %vm546_vm0 = vcmp.ge.f32.partialorder %v530_v8, 0.0  ;;  %v561_v31 = vmul.f32 0.2, %v529_v24 }
 0x158   : > { %2313 = vmatpush.bf16.msrb.mxu3 %v4467_v44  ;;  %2300 = vmatpush.bf16.msrb.mxu2 %v4403_v30  ;;  %v6822_v26 = vsel %vm543_vm12, %v527_v56, %v559_v14  ;;  %v6824_v4 = vsel %vm544_vm13, %v528_v47, %v560_v27  ;;  %v562_v29 = vmul.f32 0.2, %v530_v8  ;;  %v532_v44 = vmul.f32 %v6788_v16, %v505_v37  ;;  %v4948_v30 = vld [vmem:[%s7631_s5 + $0xe4] sm:$0xf]  ;;  %v4104_v14 = vld [vmem:[%s7631_s5 + $0xb8] sm:$0xf0] }
 0x159   : > { %v1254_v57 = vmul.f32 %v5137_v18, %v1253_v0  ;;  %v3075_v11 = vpack.c.bf16 %v6824_v4, %v6822_v26  ;;  %v533_v46 = vmul.f32 %v6788_v16, %v506_v9  ;;  %v6836_v43 = vsel %vm545_vm15, %v529_v24, %v561_v31  ;;  %v4946_v24 = vld [vmem:[%s7631_s5 + $0xd4] sm:$0xf]  ;;  %v4120_v0 = vld [vmem:[%s7631_s5 + $0xd8] sm:$0xf0]  ;;  %v4940_v31 = vld [vmem:[%s7631_s5 + $0xa4] sm:$0xf] }
 0x15a   : > { %vm547_vm1 = vcmp.ge.f32.partialorder %v531_v35, 0.0  ;;  %v6840_v58 = vsel %vm546_vm0, %v530_v8, %v562_v29  ;;  %vm548_vm2 = vcmp.ge.f32.partialorder %v532_v44, 0.0  ;;  %v563_v12 = vmul.f32 0.2, %v531_v35  ;;  %v4096_v29 = vld [vmem:[%s7631_s5 + $0xa8] sm:$0xf0] }
 0x15b   : > { %2314 = vmatmul.bf16.vlgmr.msrb.gmra.mxu3 %v6529_v32  ;;  %2301 = vmatmul.bf16.vlgmr.msrb.gmra.mxu2 %v6618_v38  ;;  %v1258_v22 = vsel %vm1257_vm14, %v5137_v18, %v1254_v57  ;;  %v3074_v32 = vpack.c.bf16 %v6818_v25, %v6816_v17  ;;  %v564_v61 = vmul.f32 0.2, %v532_v44  ;;  %v3076_v51 = vpack.c.bf16 %v6840_v58, %v6836_v43  ;;  %v4942_v57 = vld [vmem:[%s7631_s5 + $0xb4] sm:$0xf] }
 0x15c   : > { %v1320_v38 = vmul.f32 %v1258_v22, %v1224_v15  ;;  %v534_v6 = vmul.f32 %v6788_v16, %v507_v52  ;;  %vm549_vm3 = vcmp.ge.f32.partialorder %v533_v46, 0.0  ;;  %v6847_v37 = vsel %vm547_vm1, %v531_v35, %v563_v12  ;;  %v4936_v12 = vld [vmem:[%s7631_s5 + $0x84] sm:$0xf] }
 0x15d   : > { %v6849_v9 = vsel %vm548_vm2, %v532_v44, %v564_v61  ;;  %v565_v54 = vmul.f32 0.2, %v533_v46  ;;  %v535_v13 = vmul.f32 %v6788_v16, %v508_v28  ;;  %v4131_v5 = vor.u32 %v4948_v30, %v4128_v55  ;;  %v4080_v61 = vld [vmem:[%s7631_s5 + $0x88] sm:$0xf0] }
 0x15e   : > { %v1328_v18 = vmax.f32 %v1320_v38, 0.0  ;;  %v3077_v60 = vpack.c.bf16 %v6849_v9, %v6847_v37  ;;  %vm550_vm5 = vcmp.ge.f32.partialorder %v534_v6, 0.0  ;;  %v566_v56 = vmul.f32 0.2, %v534_v6  ;;  %v6928_v15 = vpop.f32.mrf.mxu3 }
 0x15f   : > { %v6861_v47 = vsel %vm549_vm3, %v533_v46, %v565_v54  ;;  %v536_v36 = vmul.f32 %v6788_v16, %v509_v20  ;;  %vm551_vm6 = vcmp.ge.f32.partialorder %v535_v13, 0.0  ;;  %v567_v28 = vmul.f32 0.2, %v535_v13  ;;  %v4938_v46 = vld [vmem:[%s7631_s5 + $0x94] sm:$0xf] }
 0x160   : > { %v6842_v50 = vpack.c.bf16 %v1328_v18, %v1328_v18  ;;  %v6873_v8 = vsel %vm550_vm5, %v534_v6, %v566_v56  ;;  %v537_v34 = vmul.f32 %v6788_v16, %v510_v39  ;;  %v538_v40 = vmul.f32 %v6788_v16, %v511_v41  ;;  %v4088_v18 = vld [vmem:[%s7631_s5 + $0x98] sm:$0xf0]  ;;  %v5014_v6 = vld [vmem:[%s7631_s5 + $0x2f4] sm:$0xf]  ;;  %v5012_v56 = vld [vmem:[%s7631_s5 + $0x2e4] sm:$0xf] }
 0x161   : > { %v539_v20 = vmul.f32 %v6788_v16, %v512_v42  ;;  %v3078_v39 = vpack.c.bf16 %v6873_v8, %v6861_v47  ;;  %vm552_vm7 = vcmp.ge.f32.partialorder %v536_v36, 0.0  ;;  %v568_v48 = vmul.f32 0.2, %v536_v36  ;;  %v4112_v42 = vld [vmem:[%s7631_s5 + $0xc8] sm:$0xf0]  ;;  %v6932_v22 = vpop.f32.mrf.mxu0 }
 0x162   : > { %2132 = vmatmul.bf16.vlgmr.msra.gmra.mxu1 %v6842_v50  ;;  %v6897_v41 = vsel %vm551_vm6, %v535_v13, %v567_v28  ;;  %vm553_vm8 = vcmp.ge.f32.partialorder %v537_v34, 0.0  ;;  %vm554_vm9 = vcmp.ge.f32.partialorder %v538_v40, 0.0  ;;  %v569_v21 = vmul.f32 0.2, %v537_v34  ;;  %v4392_v54 = vld [vmem:[%s7631_s5 + $0x2f8] sm:$0xf0] }
 0x163   : > { %2228 = vmatpush.bf16.msra.mxu1 %v4139_v63  ;;  %v4123_v10 = vor.u32 %v4946_v24, %v4120_v0  ;;  %v6902_v53 = vsel %vm552_vm7, %v536_v36, %v568_v48  ;;  %v570_v19 = vmul.f32 0.2, %v538_v40  ;;  %vm555_vm4 = vcmp.ge.f32.partialorder %v539_v20, 0.0  ;;  %v4384_v36 = vld [vmem:[%s7631_s5 + $0x2e8] sm:$0xf0] }
 0x164   : > { %v3079_v3 = vpack.c.bf16 %v6902_v53, %v6897_v41  ;;  %v6909_v2 = vsel %vm553_vm8, %v537_v34, %v569_v21  ;;  %vm556_vm10 = vcmp.ge.f32.partialorder %v6800_v45, 0.0  ;;  %v571_v23 = vmul.f32 0.2, %v539_v20  ;;  %v5010_v0 = vld [vmem:[%s7631_s5 + $0x2d4] sm:$0xf] }
 0x165   : > { %v6912_v7 = vsel %vm554_vm9, %v538_v40, %v570_v19  ;;  %v572_v62 = vmul.f32 0.2, %v6800_v45  ;;  %v4115_v35 = vor.u32 %v4944_v59, %v4112_v42  ;;  %v1332_v1 = vmax.f32 %v1324_v49, 0.0  ;;  %v4376_v34 = vld [vmem:[%s7631_s5 + $0x2d8] sm:$0xf0] }
 0x166   : > { %v3080_v16 = vpack.c.bf16 %v6912_v7, %v6909_v2  ;;  %v6917_v63 = vsel %vm555_vm4, %v539_v20, %v571_v23  ;;  %v4107_v38 = vor.u32 %v4942_v57, %v4104_v14  ;;  %v4099_v44 = vor.u32 %v4940_v31, %v4096_v29  ;;  %v2122_v30 = vpop.f32.mrf.mxu3  ;;  %v5008_v49 = vld [vmem:[%s7631_s5 + $0x2c4] sm:$0xf]  ;;  %v4368_v48 = vld [vmem:[%s7631_s5 + $0x2c8] sm:$0xf0]  ;;  %v5006_v59 = vld [vmem:[%s7631_s5 + $0x2b4] sm:$0xf] }
 0x167   : > { %2229 = vmatpush.bf16.msra.mxu1 %v4131_v5  ;;  %v6920_v33 = vsel %vm556_vm10, %v6800_v45, %v572_v62  ;;  %v1340_v45 = vpack.c.bf16 %v1332_v1, %v1332_v1  ;;  %v4091_v52 = vor.u32 %v4938_v46, %v4088_v18  ;;  %v4083_v13 = vor.u32 %v4936_v12, %v4080_v61  ;;  %v5004_v23 = vld [vmem:[%s7631_s5 + $0x2a4] sm:$0xf]  ;;  %v4352_v62 = vld [vmem:[%s7631_s5 + $0x2a8] sm:$0xf0]  ;;  %v5002_v1 = vld [vmem:[%s7631_s5 + $0x294] sm:$0xf] }
 0x168   : > { %v3081_v27 = vpack.c.bf16 %v6920_v33, %v6917_v63  ;;  %v4395_v5 = vor.u32 %v5014_v6, %v4392_v54  ;;  %v4387_v24 = vor.u32 %v5012_v56, %v4384_v36  ;;  %v4379_v40 = vor.u32 %v5010_v0, %v4376_v34  ;;  %v4344_v57 = vld [vmem:[%s7631_s5 + $0x298] sm:$0xf0]  ;;  %v4336_v31 = vld [vmem:[%s7631_s5 + $0x288] sm:$0xf0] }
 0x169   : > { %v2174_v55 = vpop.f32.mrf.mxu0  ;;  %v4347_v14 = vor.u32 %v5002_v1, %v4344_v57 }
 0x16b   : > { %2230 = vmatpush.bf16.msra.mxu1 %v4123_v10  ;;  %v4371_v10 = vor.u32 %v5008_v49, %v4368_v48 }
 0x16f   : > { %2231 = vmatpush.bf16.msra.mxu1 %v4115_v35  ;;  %v4355_v35 = vor.u32 %v5004_v23, %v4352_v62 }
 0x171   : > { %v6964_v28 = vpop.f32.mrf.mxu0 }
 0x172   : > { %2184 = vmatmul.bf16.vlgmr.msrb.gmra.mxu1 %v1340_v45 }
 0x173   : > { %2232 = vmatpush.bf16.msra.mxu1 %v4107_v38  ;;  %v5000_v38 = vld [vmem:[%s7631_s5 + $0x284] sm:$0xf] }
 0x174   : > { %v4339_v29 = vor.u32 %v5000_v38, %v4336_v31 }
 0x177   : > { %2233 = vmatpush.bf16.msra.mxu1 %v4099_v44 }
 0x179   : > { %v2226_v21 = vpop.f32.mrf.mxu0 }
 0x17b   : > { %2234 = vmatpush.bf16.msra.mxu1 %v4091_v52 }
 0x17e   : > { %v2146_v20 = vpop.f32.mrf.mxu2 }
 0x17f   : > { %2235 = vmatpush.bf16.msra.mxu1 %v4083_v13 }
 0x182   : > { %2236 = vmatmul.bf16.vlgmr.msra.gmra.mxu1 %v6842_v50  ;;  %v4360_v50 = vld [vmem:[%s7631_s5 + $0x2b8] sm:$0xf0] }
 0x183   : > { %2280 = vmatpush.bf16.msrb.mxu1 %v4395_v5  ;;  %v4363_v19 = vor.u32 %v5006_v59, %v4360_v50 }
 0x186   : > { %v2148_v42 = vpop.f32.mrf.mxu2 }
 0x187   : > { %2281 = vmatpush.bf16.msrb.mxu1 %v4387_v24 }
 0x18b   : > { %2282 = vmatpush.bf16.msrb.mxu1 %v4379_v40 }
 0x18f   : > { %2283 = vmatpush.bf16.msrb.mxu1 %v4371_v10 }
 0x193   : > { %2284 = vmatpush.bf16.msrb.mxu1 %v4363_v19 }
 0x197   : > { %2285 = vmatpush.bf16.msrb.mxu1 %v4355_v35 }
 0x19a   : > { %v7003_v44 = vpop.f32.mrf.mxu0 }
 0x19b   : > { %2286 = vmatpush.bf16.msrb.mxu1 %v4347_v14 }
 0x19e   : > { %v2159_v46 = vpop.f32.mrf.mxu3 }
 0x19f   : > { %2287 = vmatpush.bf16.msrb.mxu1 %v4339_v29 }
 0x1a2   : > { %2288 = vmatmul.bf16.vlgmr.msrb.gmra.mxu1 %v1340_v45  ;;  %v2278_v18 = vpop.f32.mrf.mxu0 }
 0x1a6   : > { %v2161_v30 = vpop.f32.mrf.mxu3 }
 0x1ae   : > { %v2211_v55 = vpop.f32.mrf.mxu3 }
 0x1b6   : > { %v2213_v52 = vpop.f32.mrf.mxu3 }
 0x1b7   : > { %v5062_v52 = vld [vmem:[%s7632_s6 + $0x74] sm:$0xf] }
 0x1be   : > { %v2198_v12 = vpop.f32.mrf.mxu2  ;;  %v2263_v61 = vpop.f32.mrf.mxu3 }
 0x1c6   : > { %v2200_v6 = vpop.f32.mrf.mxu2  ;;  %v2265_v54 = vpop.f32.mrf.mxu3 }
 0x1ce   : > { %v2250_v13 = vpop.f32.mrf.mxu2 }
 0x1d6   : > { %v2252_v5 = vpop.f32.mrf.mxu2 }
 0x1d7   : > { %v4574_v5 = vld [vmem:[%s7632_s6 + $0x60] sm:$0xf] }
 0x1de   : > { %v7005_v56 = vpop.f32.mrf.mxu3  ;;  %v7007_v36 = vpop.f32.mrf.mxu2 }
 0x1df   : > { %v2133_v24 = vpop.f32.mrf.mxu1 }
 0x1e0   : > { %v2134_v0 = vadd.f32 %v2133_v24, %v6928_v15  ;;  %v5061_v24 = vld [vmem:[%s7632_s6 + $0x64] sm:$0xf0] }
 0x1e2   : > { %v2147_v40 = vadd.f32 %v2146_v20, %v2134_v0  ;;  %v5060_v0 = vld [vmem:[%s7632_s6 + $0x64] sm:$0xf] }
 0x1e4   : > { %v2160_v48 = vadd.f32 %v2159_v46, %v2147_v40 }
 0x1e6   : > { %v2317_v34 = vpop.f32.mrf.mxu3  ;;  %v2304_v45 = vpop.f32.mrf.mxu2  ;;  %v2173_v21 = vadd.f32 %v6932_v22, %v2160_v48 }
 0x1e7   : > { %v2135_v49 = vpop.f32.mrf.mxu1  ;;  %v4575_v34 = vor.u32 %v5061_v24, %v4574_v5  ;;  %v4576_v45 = vld [vmem:[%s7632_s6 + $0x68] sm:$0xf0] }
 0x1e8   : > { %v4579_v48 = vor.u32 %v5060_v0, %v4576_v45  ;;  %v4544_v5 = vld [vmem:[%s7632_s6 + $0x28] sm:$0xf0] }
 0x1ef   : > { %v2185_v10 = vpop.f32.mrf.mxu1 }
 0x1f0   : > { %v2186_v59 = vadd.f32 %v2185_v10, %v2173_v21  ;;  %v4566_v21 = vld [vmem:[%s7632_s6 + $0x50] sm:$0xf]  ;;  %v5059_v10 = vld [vmem:[%s7632_s6 + $0x54] sm:$0xf0] }
 0x1f2   : > { %v2199_v50 = vadd.f32 %v2198_v12, %v2186_v59  ;;  %v5058_v59 = vld [vmem:[%s7632_s6 + $0x54] sm:$0xf] }
 0x1f4   : > { %v7011_v19 = vadd.f32 %v2211_v55, %v2199_v50  ;;  %v4582_v55 = vld [vmem:[%s7632_s6 + $0x70] sm:$0xf]  ;;  %v4567_v50 = vor.u32 %v5059_v10, %v4566_v21  ;;  %v5050_v21 = vld [vmem:[%s7632_s6 + $0x14] sm:$0xf]  ;;  %v4536_v10 = vld [vmem:[%s7632_s6 + $0x18] sm:$0xf0] }
 0x1f6   : > { %v2319_v23 = vrot.slane %v7011_v19, 4  ;;  %v2331_v62 = vmul.f32 %v7011_v19, %v7011_v19 }
 0x1f7   : > { %v2187_v42 = vpop.f32.mrf.mxu1 }
 0x1f8   : > { %v2320_v20 = vadd.f32 %v2319_v23, %v7011_v19  ;;  %v2333_v1 = vrot.slane %v2331_v62, 4  ;;  %v4568_v42 = vld [vmem:[%s7632_s6 + $0x58] sm:$0xf0] }
 0x1fa   : > { %v2321_v22 = vrot.slane %v2320_v20, 2  ;;  %v2334_v38 = vadd.f32 %v2333_v1, %v2331_v62  ;;  %v5057_v1 = vld [vmem:[%s7632_s6 + $0x44] sm:$0xf0] }
 0x1fc   : > { %v2322_v29 = vadd.f32 %v2321_v22, %v2320_v20  ;;  %v2335_v46 = vrot.slane %v2334_v38, 2  ;;  %v4558_v20 = vld [vmem:[%s7632_s6 + $0x40] sm:$0xf] }
 0x1fe   : > { %v2323_v18 = vrot.slane %v2322_v29, 1  ;;  %v2336_v30 = vadd.f32 %v2335_v46, %v2334_v38  ;;  %v4559_v38 = vor.u32 %v5057_v1, %v4558_v20  ;;  %v4526_v20 = vld [vmem:[%s7632_s6] sm:$0xf]  ;;  %v5049_v1 = vld [vmem:[%s7632_s6 + $0x4] sm:$0xf0] }
 0x1ff   : > { %v2237_v35 = vpop.f32.mrf.mxu1 }
 0x200   : > { %v2238_v15 = vadd.f32 %v2237_v35, %v6964_v28  ;;  %v5063_v28 = vld [vmem:[%s7632_s6 + $0x74] sm:$0xf0]  ;;  %v2324_v6 = vadd.f32 %v2323_v18, %v2322_v29  ;;  %v2337_v54 = vrot.slane %v2336_v30, 1  ;;  %v4571_v35 = vor.u32 %v5058_v59, %v4568_v42  ;;  %v4550_v18 = vld [vmem:[%s7632_s6 + $0x30] sm:$0xf] }
 0x201   : > { %v4583_v12 = vor.u32 %v5063_v28, %v4582_v55  ;;  %v5054_v55 = vld [vmem:[%s7632_s6 + $0x34] sm:$0xf] }
 0x202   : > { %v2251_v57 = vadd.f32 %v2250_v13, %v2238_v15  ;;  %v2338_v40 = vadd.f32 %v2337_v54, %v2336_v30  ;;  %v7042_v49 = vmul.f32 0.125, %v2324_v6  ;;  %v5055_v30 = vld [vmem:[%s7632_s6 + $0x34] sm:$0xf0] }
 0x203   : > { %2480 = vmatpush.bf16.msrb.mxu0 %v4583_v12  ;;  %v4551_v28 = vor.u32 %v5055_v30, %v4550_v18  ;;  %v5053_v12 = vld [vmem:[%s7632_s6 + $0x24] sm:$0xf0] }
 0x204   : > { %v2264_v14 = vadd.f32 %v2263_v61, %v2251_v57  ;;  %v4584_v61 = vld [vmem:[%s7632_s6 + $0x78] sm:$0xf0]  ;;  %v2347_v23 = vmul.f32 0.125, %v2338_v40  ;;  %v2349_v62 = vmul.f32 %v7042_v49, %v7042_v49  ;;  %v5056_v57 = vld [vmem:[%s7632_s6 + $0x44] sm:$0xf] }
 0x205   : > { %v4587_v13 = vor.u32 %v5062_v52, %v4584_v61  ;;  %v4552_v52 = vld [vmem:[%s7632_s6 + $0x38] sm:$0xf0]  ;;  %v5051_v40 = vld [vmem:[%s7632_s6 + $0x14] sm:$0xf0] }
 0x206   : > { %v2277_v15 = vadd.f32 %v7003_v44, %v2264_v14  ;;  %v2351_v44 = vsub.f32 %v2347_v23, %v2349_v62  ;;  %v4555_v54 = vor.u32 %v5054_v55, %v4552_v52 }
 0x207   : > { %v2239_v31 = vpop.f32.mrf.mxu1  ;;  %2494 = vmatpush.bf16.msra.mxu1 %v4587_v13  ;;  %2481 = vmatpush.bf16.msrb.mxu0 %v4575_v34  ;;  %v5052_v13 = vld [vmem:[%s7632_s6 + $0x24] sm:$0xf] }
 0x208   : > { %v4560_v31 = vld [vmem:[%s7632_s6 + $0x48] sm:$0xf0]  ;;  %v2353_v61 = vmax.f32 %v2351_v44, 0.0  ;;  %v4547_v45 = vor.u32 %v5052_v13, %v4544_v5  ;;  %v4527_v44 = vor.u32 %v5049_v1, %v4526_v20 }
 0x209   : > { %v4563_v29 = vor.u32 %v5056_v57, %v4560_v31  ;;  %v5048_v57 = vld [vmem:[%s7632_s6 + $0x4] sm:$0xf] }
 0x20a   : > { %v2357_v59 = vadd.f32 1e-05, %v2353_v61 }
 0x20b   : > { %2495 = vmatpush.bf16.msra.mxu1 %v4579_v48  ;;  %2482 = vmatpush.bf16.msrb.mxu0 %v4567_v50 }
 0x20c   : > { %5138 = vrsqrt.f32 %v2357_v59  ;;  %vm2365_vm12 = vweird.f32 %v2357_v59 }
 0x20f   : > { %2496 = vmatpush.bf16.msra.mxu1 %v4571_v35  ;;  %2483 = vmatpush.bf16.msrb.mxu0 %v4559_v38 }
 0x212   : > { %v5139_v55 = vpop.eup %5138 }
 0x213   : > { %2497 = vmatpush.bf16.msra.mxu1 %v4563_v29  ;;  %2484 = vmatpush.bf16.msrb.mxu0 %v4551_v28  ;;  %v2360_v61 = vmul.f32 %v5139_v55, %v2357_v59  ;;  %vm2366_vm11 = vweird.f32 %v5139_v55  ;;  %v4662_v59 = vld [vmem:[%s7632_s6 + $0xf0] sm:$0xf] }
 0x214   : > { %vm2367_vm13 = vmor %vm2365_vm12, %vm2366_vm11 }
 0x215   : > { %v2361_v5 = vmul.f32 %v5139_v55, %v2360_v61 }
 0x217   : > { %2498 = vmatpush.bf16.msra.mxu1 %v4555_v54 }
 0x21b   : > { %2499 = vmatpush.bf16.msra.mxu1 %v4547_v45 }
 0x21f   : > { %v2289_v22 = vpop.f32.mrf.mxu1 }
 0x220   : > { %v2290_v14 = vadd.f32 %v2289_v22, %v2277_v15  ;;  %v4539_v15 = vor.u32 %v5050_v21, %v4536_v10  ;;  %v4528_v22 = vld [vmem:[%s7632_s6 + $0x8] sm:$0xf0] }
 0x222   : > { %v2303_v46 = vadd.f32 %v7007_v36, %v2290_v14  ;;  %v4542_v36 = vld [vmem:[%s7632_s6 + $0x20] sm:$0xf]  ;;  %2500 = vmatpush.bf16.msra.mxu1 %v4539_v15 }
 0x223   : > { %v4543_v24 = vor.u32 %v5053_v12, %v4542_v36 }
 0x224   : > { %v7091_v6 = vadd.f32 %v7005_v56, %v2303_v46  ;;  %v4534_v56 = vld [vmem:[%s7632_s6 + $0x10] sm:$0xf]  ;;  %v4531_v46 = vor.u32 %v5048_v57, %v4528_v22 }
 0x225   : > { %2485 = vmatpush.bf16.msrb.mxu0 %v4543_v24  ;;  %v4535_v23 = vor.u32 %v5051_v40, %v4534_v56 }
 0x226   : > { %v2325_v0 = vrot.slane %v7091_v6, 4  ;;  %v2332_v34 = vmul.f32 %v7091_v6, %v7091_v6  ;;  %2501 = vmatpush.bf16.msra.mxu1 %v4531_v46  ;;  %v5077_v46 = vld [vmem:[%s7632_s6 + $0xe4] sm:$0xf0] }
 0x227   : > { %v2291_v48 = vpop.f32.mrf.mxu1 }
 0x228   : > { %v2326_v50 = vadd.f32 %v2325_v0, %v7091_v6  ;;  %v2339_v42 = vrot.slane %v2332_v34, 4  ;;  %v2362_v0 = vmul.f32 0.5, %v2361_v5 }
 0x229   : > { %2486 = vmatpush.bf16.msrb.mxu0 %v4535_v23 }
 0x22a   : > { %v2327_v62 = vrot.slane %v2326_v50, 2  ;;  %v2340_v35 = vadd.f32 %v2339_v42, %v2332_v34  ;;  %v2363_v34 = vsub.f32 1.5, %v2362_v0  ;;  %v2355_v42 = vsub.f32 %v7011_v19, %v7042_v49  ;;  %v5079_v19 = vld [vmem:[%s7632_s6 + $0xf4] sm:$0xf0]  ;;  %v5078_v49 = vld [vmem:[%s7632_s6 + $0xf4] sm:$0xf] }
 0x22c   : > { %v2328_v38 = vadd.f32 %v2327_v62, %v2326_v50  ;;  %v2341_v31 = vrot.slane %v2340_v35, 2  ;;  %v2364_v40 = vmul.f32 %v5139_v55, %v2363_v34 }
 0x22d   : > { %2487 = vmatpush.bf16.msrb.mxu0 %v4527_v44 }
 0x22e   : > { %v2329_v14 = vrot.slane %v2328_v38, 1  ;;  %v2342_v29 = vadd.f32 %v2341_v31, %v2340_v35  ;;  %v2368_v10 = vsel %vm2367_vm13, %v5139_v55, %v2364_v40  ;;  %v4656_v55 = vld [vmem:[%s7632_s6 + $0xe8] sm:$0xf0]  ;;  %v5073_v40 = vld [vmem:[%s7632_s6 + $0xc4] sm:$0xf0] }
 0x22f   : > { %v2379_v35 = vmul.f32 %v2368_v10, %v2355_v42 }
 0x230   : > { %v2330_v18 = vadd.f32 %v2329_v14, %v2328_v38  ;;  %v2343_v30 = vrot.slane %v2342_v29, 1  ;;  %v4664_v38 = vld [vmem:[%s7632_s6 + $0xf8] sm:$0xf0] }
 0x231   : > { %v2381_v1 = vmax.f32 %v2379_v35, 0.0  ;;  %v4667_v14 = vor.u32 %v5078_v49, %v4664_v38  ;;  %v4630_v35 = vld [vmem:[%s7632_s6 + $0xb0] sm:$0xf]  ;;  %v5069_v38 = vld [vmem:[%s7632_s6 + $0xa4] sm:$0xf0] }
 0x232   : > { %v2344_v28 = vadd.f32 %v2343_v30, %v2342_v29  ;;  %v2346_v52 = vmul.f32 0.125, %v2330_v18  ;;  %v4654_v29 = vld [vmem:[%s7632_s6 + $0xe0] sm:$0xf]  ;;  %v5076_v18 = vld [vmem:[%s7632_s6 + $0xe4] sm:$0xf] }
 0x233   : > { %2676 = vmatpush.bf16.msra.mxu3 %v4667_v14  ;;  %v4655_v30 = vor.u32 %v5077_v46, %v4654_v29  ;;  %v5068_v46 = vld [vmem:[%s7632_s6 + $0xa4] sm:$0xf] }
 0x234   : > { %v2348_v36 = vmul.f32 0.125, %v2344_v28  ;;  %v2350_v12 = vmul.f32 %v2346_v52, %v2346_v52  ;;  %v2356_v62 = vsub.f32 %v7091_v6, %v2346_v52  ;;  %v4663_v6 = vor.u32 %v5079_v19, %v4662_v59  ;;  %v4646_v52 = vld [vmem:[%s7632_s6 + $0xd0] sm:$0xf]  ;;  %v4632_v19 = vld [vmem:[%s7632_s6 + $0xb8] sm:$0xf0] }
 0x235   : > { %v4659_v28 = vor.u32 %v5076_v18, %v4656_v55  ;;  %v4624_v18 = vld [vmem:[%s7632_s6 + $0xa8] sm:$0xf0] }
 0x236   : > { %v2352_v54 = vsub.f32 %v2348_v36, %v2350_v12  ;;  %2657 = vmatpush.bf16.msra.mxu2 %v4663_v6  ;;  %v5075_v36 = vld [vmem:[%s7632_s6 + $0xd4] sm:$0xf0]  ;;  %v5074_v12 = vld [vmem:[%s7632_s6 + $0xd4] sm:$0xf]  ;;  %v4622_v6 = vld [vmem:[%s7632_s6 + $0xa0] sm:$0xf] }
 0x237   : > { %2677 = vmatpush.bf16.msra.mxu3 %v4659_v28  ;;  %v4647_v61 = vor.u32 %v5075_v36, %v4646_v52  ;;  %v4623_v28 = vor.u32 %v5069_v38, %v4622_v6  ;;  %v4627_v52 = vor.u32 %v5068_v46, %v4624_v18  ;;  %v4614_v36 = vld [vmem:[%s7632_s6 + $0x90] sm:$0xf]  ;;  %v5108_v46 = vld [vmem:[%s7629_s3 + $0x60] sm:$0xff] }
 0x238   : > { %v2354_v13 = vmax.f32 %v2352_v54, 0.0  ;;  %v4648_v54 = vld [vmem:[%s7632_s6 + $0xd8] sm:$0xf0]  ;;  %v5110_v6 = vld [vmem:[%s7629_s3 + $0x70] sm:$0xff] }
 0x239   : > { %v4651_v5 = vor.u32 %v5074_v12, %v4648_v54  ;;  %v5067_v12 = vld [vmem:[%s7632_s6 + $0x94] sm:$0xf0] }
 0x23a   : > { %v2358_v24 = vadd.f32 1e-05, %v2354_v13  ;;  %2658 = vmatpush.bf16.msra.mxu2 %v4655_v30 }
 0x23b   : > { %2678 = vmatpush.bf16.msra.mxu3 %v4651_v5  ;;  %v5066_v5 = vld [vmem:[%s7632_s6 + $0x94] sm:$0xf] }
 0x23c   : > { %5140 = vrsqrt.f32 %v2358_v24  ;;  %vm2375_vm15 = vweird.f32 %v2358_v24 }
 0x23e   : > { %2659 = vmatpush.bf16.msra.mxu2 %v4647_v61 }
 0x242   : > { %v5141_v45 = vpop.eup %5140 }
 0x243   : > { %v2370_v56 = vmul.f32 %v5141_v45, %v2358_v24  ;;  %vm2376_vm14 = vweird.f32 %v5141_v45 }
 0x244   : > { %vm2377_vm0 = vmor %vm2375_vm15, %vm2376_vm14 }
 0x245   : > { %v2371_v48 = vmul.f32 %v5141_v45, %v2370_v56  ;;  %v4638_v56 = vld [vmem:[%s7632_s6 + $0xc0] sm:$0xf] }
 0x246   : > { %v4639_v42 = vor.u32 %v5073_v40, %v4638_v56  ;;  %v4615_v56 = vor.u32 %v5067_v12, %v4614_v36 }
 0x247   : > { %v2372_v21 = vmul.f32 0.5, %v2371_v48  ;;  %v5072_v48 = vld [vmem:[%s7632_s6 + $0xc4] sm:$0xf] }
 0x248   : > { %2660 = vmatpush.bf16.msra.mxu2 %v4639_v42  ;;  %v5064_v42 = vld [vmem:[%s7632_s6 + $0x84] sm:$0xf] }
 0x249   : > { %v2373_v50 = vsub.f32 1.5, %v2372_v21 }
 0x24b   : > { %v2374_v23 = vmul.f32 %v5141_v45, %v2373_v50 }
 0x24d   : > { %v2378_v15 = vsel %vm2377_vm0, %v5141_v45, %v2374_v23  ;;  %v4640_v23 = vld [vmem:[%s7632_s6 + $0xc8] sm:$0xf0] }
 0x24e   : > { %v2380_v20 = vmul.f32 %v2378_v15, %v2356_v62  ;;  %v4643_v62 = vor.u32 %v5072_v48, %v4640_v23  ;;  %v5071_v15 = vld [vmem:[%s7632_s6 + $0xb4] sm:$0xf0]  ;;  %v4606_v48 = vld [vmem:[%s7632_s6 + $0x80] sm:$0xf]  ;;  %v4608_v23 = vld [vmem:[%s7632_s6 + $0x88] sm:$0xf0] }
 0x24f   : > { %v4631_v59 = vor.u32 %v5071_v15, %v4630_v35 }
 0x250   : > { %v2382_v57 = vmax.f32 %v2380_v20, 0.0  ;;  %v5070_v20 = vld [vmem:[%s7632_s6 + $0xb4] sm:$0xf]  ;;  %2679 = vmatpush.bf16.msra.mxu3 %v4643_v62 }
 0x251   : > { %v4635_v49 = vor.u32 %v5070_v20, %v4632_v19  ;;  %2661 = vmatpush.bf16.msra.mxu2 %v4631_v59  ;;  %v4611_v20 = vor.u32 %v5064_v42, %v4608_v23  ;;  %v5111_v19 = vld [vmem:[%s7629_s3 + $0x78] sm:$0xff] }
 0x252   : > { %v2383_v22 = vpack.c.bf16 %v2382_v57, %v2381_v1 }
 0x254   : > { %2488 = vmatmul.bf16.vlgmr.msrb.gmra.mxu0 %v2383_v22  ;;  %2502 = vmatmul.bf16.vlgmr.msra.gmra.mxu1 %v2383_v22 }
 0x255   : > { %2680 = vmatpush.bf16.msra.mxu3 %v4635_v49  ;;  %2662 = vmatpush.bf16.msra.mxu2 %v4623_v28 }
 0x259   : > { %2681 = vmatpush.bf16.msra.mxu3 %v4627_v52  ;;  %2663 = vmatpush.bf16.msra.mxu2 %v4615_v56  ;;  %v5106_v52 = vld [vmem:[%s7629_s3 + $0x50] sm:$0xff] }
 0x2d1   : > { %v7142_v31 = vpop.f32.mrf.mxu0  ;;  %v7144_v44 = vpop.f32.mrf.mxu1 }
 0x2d2   : > { %v2517_v24 = vmul.f32 %v7142_v31, %v7142_v31  ;;  %v2519_v21 = vmul.f32 %v7144_v44, %v7144_v44 }
 0x2d9   : > { %v7170_v13 = vpop.f32.mrf.mxu0  ;;  %v7178_v45 = vpop.f32.mrf.mxu1 }
 0x2da   : > { %v2508_v0 = vadd.f32 %v7170_v13, %v7142_v31  ;;  %v2518_v34 = vmul.f32 %v7170_v13, %v7170_v13  ;;  %v2520_v57 = vmul.f32 %v7178_v45, %v7178_v45 }
 0x2dc   : > { %v2521_v10 = vadd.f32 %v2518_v34, %v2517_v24  ;;  %v2509_v50 = vadd.f32 %v2508_v0, %v7144_v44  ;;  %v4616_v24 = vld [vmem:[%s7632_s6 + $0x98] sm:$0xf0] }
 0x2dd   : > { %v4619_v40 = vor.u32 %v5066_v5, %v4616_v24 }
 0x2de   : > { %v2510_v1 = vadd.f32 %v2509_v50, %v7178_v45  ;;  %v2522_v22 = vadd.f32 %v2521_v10, %v2519_v21  ;;  %v5065_v21 = vld [vmem:[%s7632_s6 + $0x84] sm:$0xf0] }
 0x2df   : > { %v4607_v15 = vor.u32 %v5065_v21, %v4606_v48  ;;  %2682 = vmatpush.bf16.msra.mxu3 %v4619_v40  ;;  %v5104_v40 = vld [vmem:[%s7629_s3 + $0x40] sm:$0xff] }
 0x2e0   : > { %v2511_v14 = vrot.slane %v2510_v1, 4  ;;  %v2523_v29 = vadd.f32 %v2522_v22, %v2520_v57 }
 0x2e1   : > { %2664 = vmatpush.bf16.msra.mxu2 %v4607_v15  ;;  %v4742_v15 = vld [vmem:[%s7632_s6 + $0x170] sm:$0xf] }
 0x2e2   : > { %v2512_v30 = vadd.f32 %v2511_v14, %v2510_v1  ;;  %v2524_v55 = vrot.slane %v2523_v29, 4 }
 0x2e3   : > { %2683 = vmatpush.bf16.msra.mxu3 %v4611_v20  ;;  %v5095_v20 = vld [vmem:[%s7632_s6 + $0x174] sm:$0xf0] }
 0x2e4   : > { %v2513_v61 = vrot.slane %v2512_v30, 2  ;;  %v2525_v54 = vadd.f32 %v2524_v55, %v2523_v29  ;;  %v5109_v29 = vld [vmem:[%s7629_s3 + $0x68] sm:$0xff]  ;;  %v5107_v55 = vld [vmem:[%s7629_s3 + $0x58] sm:$0xff] }
 0x2e5   : > { %3147 = vmatpush.bf16.msrb.mxu2 %v5111_v19 }
 0x2e6   : > { %v2514_v0 = vadd.f32 %v2513_v61, %v2512_v30  ;;  %v2526_v34 = vrot.slane %v2525_v54, 2  ;;  %v5105_v61 = vld [vmem:[%s7629_s3 + $0x48] sm:$0xff] }
 0x2e8   : > { %v2515_v10 = vrot.slane %v2514_v0, 1  ;;  %v2527_v50 = vadd.f32 %v2526_v34, %v2525_v54 }
 0x2e9   : > { %3148 = vmatpush.bf16.msrb.mxu2 %v5110_v6 }
 0x2ea   : > { %v2516_v62 = vadd.f32 %v2515_v10, %v2514_v0  ;;  %v2528_v35 = vrot.slane %v2527_v50, 1 }
 0x2ec   : > { %v2529_v1 = vadd.f32 %v2528_v35, %v2527_v50  ;;  %v2530_v57 = vmul.f32 0.03125, %v2516_v62 }
 0x2ed   : > { %3149 = vmatpush.bf16.msrb.mxu2 %v5109_v29  ;;  %v4734_v29 = vld [vmem:[%s7632_s6 + $0x160] sm:$0xf] }
 0x2ee   : > { %v2531_v22 = vmul.f32 0.03125, %v2529_v1  ;;  %v2532_v59 = vmul.f32 %v2530_v57, %v2530_v57  ;;  %v2535_v5 = vsub.f32 %v7142_v31, %v2530_v57  ;;  %v2536_v24 = vsub.f32 %v7170_v13, %v2530_v57  ;;  %v5094_v1 = vld [vmem:[%s7632_s6 + $0x174] sm:$0xf] }
 0x2ef   : > { %v2538_v50 = vsub.f32 %v7178_v45, %v2530_v57  ;;  %v2537_v31 = vsub.f32 %v7144_v44, %v2530_v57  ;;  %v4743_v57 = vor.u32 %v5095_v20, %v4742_v15  ;;  %v4694_v15 = vld [vmem:[%s7632_s6 + $0x110] sm:$0xf]  ;;  %v5083_v20 = vld [vmem:[%s7632_s6 + $0x114] sm:$0xf0] }
 0x2f0   : > { %v2533_v49 = vsub.f32 %v2531_v22, %v2532_v59  ;;  %v4744_v22 = vld [vmem:[%s7632_s6 + $0x178] sm:$0xf0] }
 0x2f1   : > { %3150 = vmatpush.bf16.msrb.mxu2 %v5108_v46  ;;  %v4747_v6 = vor.u32 %v5094_v1, %v4744_v22  ;;  %2870 = vmatpush.bf16.msra.mxu0 %v4743_v57  ;;  %v5093_v46 = vld [vmem:[%s7632_s6 + $0x164] sm:$0xf0]  ;;  %v5082_v1 = vld [vmem:[%s7632_s6 + $0x114] sm:$0xf]  ;;  %v4696_v57 = vld [vmem:[%s7632_s6 + $0x118] sm:$0xf0] }
 0x2f2   : > { %v2534_v38 = vmax.f32 %v2533_v49, 0.0 }
 0x2f3   : > { %2899 = vmatpush.bf16.msrb.mxu1 %v4747_v6  ;;  %v4699_v6 = vor.u32 %v5082_v1, %v4696_v57 }
 0x2f4   : > { %v2539_v14 = vadd.f32 1e-05, %v2534_v38 }
 0x2f5   : > { %3151 = vmatpush.bf16.msrb.mxu2 %v5107_v55  ;;  %v4736_v55 = vld [vmem:[%s7632_s6 + $0x168] sm:$0xf0] }
 0x2f6   : > { %5142 = vrsqrt.f32 %v2539_v14  ;;  %vm2546_vm2 = vweird.f32 %v2539_v14 }
 0x2f9   : > { %3152 = vmatpush.bf16.msrb.mxu2 %v5106_v52 }
 0x2fc   : > { %v5143_v18 = vpop.eup %5142 }
 0x2fd   : > { %v2541_v30 = vmul.f32 %v5143_v18, %v2539_v14  ;;  %vm2547_vm1 = vweird.f32 %v5143_v18  ;;  %3153 = vmatpush.bf16.msrb.mxu2 %v5105_v61 }
 0x2fe   : > { %vm2548_vm3 = vmor %vm2546_vm2, %vm2547_vm1 }
 0x2ff   : > { %v2542_v28 = vmul.f32 %v5143_v18, %v2541_v30  ;;  %v5092_v30 = vld [vmem:[%s7632_s6 + $0x164] sm:$0xf] }
 0x301   : > { %v2543_v36 = vmul.f32 0.5, %v2542_v28  ;;  %3154 = vmatpush.bf16.msrb.mxu2 %v5104_v40 }
 0x303   : > { %v2544_v12 = vsub.f32 1.5, %v2543_v36  ;;  %v4739_v36 = vor.u32 %v5092_v30, %v4736_v55 }
 0x305   : > { %v2545_v54 = vmul.f32 %v5143_v18, %v2544_v12  ;;  %2900 = vmatpush.bf16.msrb.mxu1 %v4739_v36 }
 0x307   : > { %v2549_v0 = vsel %vm2548_vm3, %v5143_v18, %v2545_v54  ;;  %v4735_v18 = vor.u32 %v5093_v46, %v4734_v29  ;;  %v4726_v54 = vld [vmem:[%s7632_s6 + $0x150] sm:$0xf]  ;;  %v5080_v29 = vld [vmem:[%s7632_s6 + $0x104] sm:$0xf] }
 0x308   : > { %v2550_v34 = vmul.f32 %v2549_v0, %v2535_v5  ;;  %v2551_v56 = vmul.f32 %v2549_v0, %v2536_v24  ;;  %v2552_v13 = vmul.f32 %v2549_v0, %v2537_v31  ;;  %v2553_v42 = vmul.f32 %v2549_v0, %v2538_v50  ;;  %v5091_v5 = vld [vmem:[%s7632_s6 + $0x154] sm:$0xf0]  ;;  %v5090_v0 = vld [vmem:[%s7632_s6 + $0x154] sm:$0xf]  ;;  %v4718_v50 = vld [vmem:[%s7632_s6 + $0x140] sm:$0xf] }
 0x309   : > { %2871 = vmatpush.bf16.msra.mxu0 %v4735_v18  ;;  %v4727_v24 = vor.u32 %v5091_v5, %v4726_v54  ;;  %v5089_v31 = vld [vmem:[%s7632_s6 + $0x144] sm:$0xf0] }
 0x30a   : > { %v2554_v48 = vmax.f32 %v2550_v34, 0.0  ;;  %v2555_v21 = vmax.f32 %v2551_v56, 0.0  ;;  %v2556_v23 = vmax.f32 %v2552_v13, 0.0  ;;  %v2557_v62 = vmax.f32 %v2553_v42, 0.0  ;;  %v4728_v34 = vld [vmem:[%s7632_s6 + $0x158] sm:$0xf0] }
 0x30b   : > { %v4719_v13 = vor.u32 %v5089_v31, %v4718_v50  ;;  %v5088_v42 = vld [vmem:[%s7632_s6 + $0x144] sm:$0xf] }
 0x30c   : > { %v2558_v10 = vpack.c.bf16 %v2555_v21, %v2554_v48  ;;  %v2559_v35 = vpack.c.bf16 %v2557_v62, %v2556_v23  ;;  %v4731_v48 = vor.u32 %v5090_v0, %v4728_v34  ;;  %v4720_v23 = vld [vmem:[%s7632_s6 + $0x148] sm:$0xf0]  ;;  %v4710_v62 = vld [vmem:[%s7632_s6 + $0x130] sm:$0xf] }
 0x30d   : > { %2872 = vmatpush.bf16.msra.mxu0 %v4727_v24 }
 0x30e   : > { %2665 = vmatmul.bf16.vlgmr.msra.gmra.mxu2 %v2558_v10  ;;  %2684 = vmatmul.bf16.vlgmr.msra.gmra.mxu3 %v2558_v10 }
 0x30f   : > { %2901 = vmatpush.bf16.msrb.mxu1 %v4731_v48 }
 0x311   : > { %2873 = vmatpush.bf16.msra.mxu0 %v4719_v13 }
 0x31e   : > { %2670 = vmatmul.bf16.gmra.mxu2 %v2559_v35  ;;  %2689 = vmatmul.bf16.gmra.mxu3 %v2559_v35 }
 0x32e   : > { %3155 = vmatmul.bf16.vlgmr.msrb.gmra.mxu2 %v3074_v32 }
 0x33e   : > { %3160 = vmatmul.bf16.gmra.mxu2 %v3075_v11 }
 0x34e   : > { %3165 = vmatmul.bf16.gmra.mxu2 %v3076_v51 }
 0x35e   : > { %3170 = vmatmul.bf16.gmra.mxu2 %v3077_v60 }
 0x36e   : > { %3175 = vmatmul.bf16.gmra.mxu2 %v3078_v39 }
 0x37e   : > { %3180 = vmatmul.bf16.gmra.mxu2 %v3079_v3 }
 0x38e   : > { %3185 = vmatmul.bf16.gmra.mxu2 %v3080_v16 }
 0x391   : > { %v7295_v17 = vpop.f32.mrf.mxu2  ;;  %v7297_v25 = vpop.f32.mrf.mxu3 }
 0x392   : > { %v2708_v58 = vmul.f32 %v7295_v17, %v7295_v17  ;;  %v2712_v53 = vmul.f32 %v7297_v25, %v7297_v25 }
 0x399   : > { %v7299_v32 = vpop.f32.mrf.mxu2  ;;  %v7301_v26 = vpop.f32.mrf.mxu3 }
 0x39a   : > { %v2709_v11 = vmul.f32 %v7299_v32, %v7299_v32  ;;  %v2695_v51 = vadd.f32 %v7299_v32, %v7295_v17  ;;  %v2713_v7 = vmul.f32 %v7301_v26, %v7301_v26 }
 0x39c   : > { %v2716_v9 = vadd.f32 %v2709_v11, %v2708_v58  ;;  %v4723_v58 = vor.u32 %v5088_v42, %v4720_v23 }
 0x39e   : > { %3190 = vmatmul.bf16.gmra.mxu2 %v3081_v27  ;;  %2902 = vmatpush.bf16.msrb.mxu1 %v4723_v58 }
 0x3a1   : > { %v7306_v4 = vpop.f32.mrf.mxu2  ;;  %v7310_v43 = vpop.f32.mrf.mxu3 }
 0x3a2   : > { %v2710_v37 = vmul.f32 %v7306_v4, %v7306_v4  ;;  %v2696_v60 = vadd.f32 %v2695_v51, %v7306_v4  ;;  %v2714_v27 = vmul.f32 %v7310_v43, %v7310_v43  ;;  %v5087_v51 = vld [vmem:[%s7632_s6 + $0x134] sm:$0xf0] }
 0x3a4   : > { %v2717_v8 = vadd.f32 %v2716_v9, %v2710_v37  ;;  %v5086_v37 = vld [vmem:[%s7632_s6 + $0x134] sm:$0xf]  ;;  %v4711_v9 = vor.u32 %v5087_v51, %v4710_v62 }
 0x3a6   : > { %2874 = vmatpush.bf16.msra.mxu0 %v4711_v9 }
 0x3a9   : > { %v7319_v47 = vpop.f32.mrf.mxu2  ;;  %v7330_v33 = vpop.f32.mrf.mxu3 }
 0x3aa   : > { %v2697_v39 = vadd.f32 %v2696_v60, %v7319_v47  ;;  %v2711_v41 = vmul.f32 %v7319_v47, %v7319_v47  ;;  %v2715_v19 = vmul.f32 %v7330_v33, %v7330_v33  ;;  %v4712_v60 = vld [vmem:[%s7632_s6 + $0x138] sm:$0xf0] }
 0x3ac   : > { %v2698_v3 = vadd.f32 %v2697_v39, %v7297_v25  ;;  %v2718_v2 = vadd.f32 %v2717_v8, %v2711_v41  ;;  %v4715_v41 = vor.u32 %v5086_v37, %v4712_v60 }
 0x3ae   : > { %v2719_v16 = vadd.f32 %v2718_v2, %v2712_v53  ;;  %v2699_v63 = vadd.f32 %v2698_v3, %v7301_v26  ;;  %v4702_v53 = vld [vmem:[%s7632_s6 + $0x120] sm:$0xf]  ;;  %v5085_v3 = vld [vmem:[%s7632_s6 + $0x124] sm:$0xf0]  ;;  %v5084_v2 = vld [vmem:[%s7632_s6 + $0x124] sm:$0xf]  ;;  %2903 = vmatpush.bf16.msrb.mxu1 %v4715_v41 }
 0x3b0   : > { %v2700_v44 = vadd.f32 %v2699_v63, %v7310_v43  ;;  %v2720_v45 = vadd.f32 %v2719_v16, %v2713_v7  ;;  %v4704_v7 = vld [vmem:[%s7632_s6 + $0x128] sm:$0xf0] }
 0x3b2   : > { %v2701_v59 = vadd.f32 %v2700_v44, %v7330_v33  ;;  %v2721_v49 = vadd.f32 %v2720_v45, %v2714_v27  ;;  %v4703_v27 = vor.u32 %v5085_v3, %v4702_v53  ;;  %v4707_v45 = vor.u32 %v5084_v2, %v4704_v7 }
 0x3b4   : > { %v2702_v38 = vrot.slane %v2701_v59, 4  ;;  %v2722_v14 = vadd.f32 %v2721_v49, %v2715_v19  ;;  %2875 = vmatpush.bf16.msra.mxu0 %v4703_v27  ;;  %v4695_v19 = vor.u32 %v5083_v20, %v4694_v15  ;;  %2904 = vmatpush.bf16.msrb.mxu1 %v4707_v45 }
 0x3b6   : > { %v2703_v28 = vadd.f32 %v2702_v38, %v2701_v59  ;;  %v2723_v52 = vrot.slane %v2722_v14, 4  ;;  %v4686_v38 = vld [vmem:[%s7632_s6 + $0x100] sm:$0xf] }
 0x3b8   : > { %v2704_v12 = vrot.slane %v2703_v28, 2  ;;  %v2724_v61 = vadd.f32 %v2723_v52, %v2722_v14  ;;  %v5081_v14 = vld [vmem:[%s7632_s6 + $0x104] sm:$0xf0]  ;;  %2876 = vmatpush.bf16.msra.mxu0 %v4695_v19  ;;  %2905 = vmatpush.bf16.msrb.mxu1 %v4699_v6 }
 0x3b9   : > { %v4687_v46 = vor.u32 %v5081_v14, %v4686_v38 }
 0x3ba   : > { %v2705_v56 = vadd.f32 %v2704_v12, %v2703_v28  ;;  %v2725_v40 = vrot.slane %v2724_v61, 2 }
 0x3bc   : > { %v2706_v21 = vrot.slane %v2705_v56, 1  ;;  %v2726_v10 = vadd.f32 %v2725_v40, %v2724_v61  ;;  %2877 = vmatpush.bf16.msra.mxu0 %v4687_v46 }
 0x3be   : > { %v2707_v35 = vadd.f32 %v2706_v21, %v2705_v56  ;;  %v2727_v11 = vrot.slane %v2726_v10, 1 }
 0x3c0   : > { %v2728_v8 = vadd.f32 %v2727_v11, %v2726_v10  ;;  %v2729_v39 = vmul.f32 0.015625, %v2707_v35 }
 0x3c2   : > { %v2730_v16 = vmul.f32 0.015625, %v2728_v8  ;;  %v2731_v63 = vmul.f32 %v2729_v39, %v2729_v39  ;;  %v2740_v22 = vsub.f32 %v7310_v43, %v2729_v39  ;;  %v4688_v43 = vld [vmem:[%s7632_s6 + $0x108] sm:$0xf0]  ;;  %v2741_v61 = vsub.f32 %v7330_v33, %v2729_v39 }
 0x3c3   : > { %v4691_v18 = vor.u32 %v5080_v29, %v4688_v43  ;;  %v2734_v54 = vsub.f32 %v7295_v17, %v2729_v39  ;;  %v2735_v5 = vsub.f32 %v7299_v32, %v2729_v39  ;;  %v2736_v24 = vsub.f32 %v7306_v4, %v2729_v39 }
 0x3c4   : > { %v2732_v44 = vsub.f32 %v2730_v16, %v2731_v63  ;;  %v2737_v34 = vsub.f32 %v7319_v47, %v2729_v39  ;;  %v2738_v56 = vsub.f32 %v7297_v25, %v2729_v39  ;;  %v2739_v40 = vsub.f32 %v7301_v26, %v2729_v39 }
 0x3c5   : > { %2906 = vmatpush.bf16.msrb.mxu1 %v4691_v18 }
 0x3c6   : > { %v2733_v59 = vmax.f32 %v2732_v44, 0.0 }
 0x3c8   : > { %v2742_v49 = vadd.f32 1e-05, %v2733_v59 }
 0x3ca   : > { %5144 = vrsqrt.f32 %v2742_v49  ;;  %vm2749_vm6 = vweird.f32 %v2742_v49 }
 0x3d0   : > { %v5145_v30 = vpop.eup %5144 }
 0x3d1   : > { %v2744_v55 = vmul.f32 %v5145_v30, %v2742_v49  ;;  %vm2750_vm5 = vweird.f32 %v5145_v30 }
 0x3d2   : > { %vm2751_vm7 = vmor %vm2749_vm6, %vm2750_vm5 }
 0x3d3   : > { %v2745_v28 = vmul.f32 %v5145_v30, %v2744_v55 }
 0x3d5   : > { %v2746_v52 = vmul.f32 0.5, %v2745_v28 }
 0x3d7   : > { %v2747_v36 = vsub.f32 1.5, %v2746_v52 }
 0x3d9   : > { %v2748_v12 = vmul.f32 %v5145_v30, %v2747_v36 }
 0x3db   : > { %v2752_v0 = vsel %vm2751_vm7, %v5145_v30, %v2748_v12 }
 0x3dc   : > { %v2760_v48 = vmul.f32 %v2752_v0, %v2741_v61  ;;  %v2753_v21 = vmul.f32 %v2752_v0, %v2734_v54  ;;  %v2754_v10 = vmul.f32 %v2752_v0, %v2735_v5  ;;  %v2755_v50 = vmul.f32 %v2752_v0, %v2736_v24 }
 0x3dd   : > { %v2756_v31 = vmul.f32 %v2752_v0, %v2737_v34  ;;  %v2757_v33 = vmul.f32 %v2752_v0, %v2738_v56  ;;  %v2758_v13 = vmul.f32 %v2752_v0, %v2739_v40  ;;  %v2759_v42 = vmul.f32 %v2752_v0, %v2740_v22 }
 0x3de   : > { %v2761_v17 = vmax.f32 %v2753_v21, 0.0  ;;  %v2762_v23 = vmax.f32 %v2754_v10, 0.0  ;;  %v2763_v32 = vmax.f32 %v2755_v50, 0.0  ;;  %v2768_v62 = vmax.f32 %v2760_v48, 0.0 }
 0x3df   : > { %v2764_v4 = vmax.f32 %v2756_v31, 0.0  ;;  %v2765_v35 = vmax.f32 %v2757_v33, 0.0  ;;  %v2766_v11 = vmax.f32 %v2758_v13, 0.0  ;;  %v2767_v47 = vmax.f32 %v2759_v42, 0.0 }
 0x3e0   : > { %v2769_v58 = vpack.c.bf16 %v2762_v23, %v2761_v17 }
 0x3e1   : > { %v2770_v25 = vpack.c.bf16 %v2764_v4, %v2763_v32  ;;  %v2771_v51 = vpack.c.bf16 %v2766_v11, %v2765_v35  ;;  %v2772_v26 = vpack.c.bf16 %v2768_v62, %v2767_v47  ;;  %v5103_v11 = vld [vmem:[%s7629_s3 + $0x38] sm:$0xff] }
 0x3e2   : > { %2878 = vmatmul.bf16.vlgmr.msra.gmra.mxu0 %v2769_v58  ;;  %2907 = vmatmul.bf16.vlgmr.msrb.gmra.mxu1 %v2769_v58 }
 0x3e3   : > { %3244 = vmatpush.bf16.msrb.mxu3 %v5103_v11 }
 0x3f2   : > { %2883 = vmatmul.bf16.gmra.mxu0 %v2770_v25  ;;  %2912 = vmatmul.bf16.gmra.mxu1 %v2770_v25 }
 0x402   : > { %2888 = vmatmul.bf16.gmra.mxu0 %v2771_v51  ;;  %2917 = vmatmul.bf16.gmra.mxu1 %v2771_v51 }
 0x412   : > { %2893 = vmatmul.bf16.gmra.mxu0 %v2772_v26  ;;  %2922 = vmatmul.bf16.gmra.mxu1 %v2772_v26 }
 0x45f   : > { %v7442_v37 = vpop.f32.mrf.mxu0  ;;  %v7444_v9 = vpop.f32.mrf.mxu1 }
 0x460   : > { %v2949_v27 = vmul.f32 %v7442_v37, %v7442_v37  ;;  %v2957_v12 = vmul.f32 %v7444_v9, %v7444_v9 }
 0x467   : > { %v7446_v60 = vpop.f32.mrf.mxu0  ;;  %v7448_v8 = vpop.f32.mrf.mxu1 }
 0x468   : > { %v2950_v63 = vmul.f32 %v7446_v60, %v7446_v60  ;;  %v2928_v44 = vadd.f32 %v7446_v60, %v7442_v37  ;;  %v2958_v24 = vmul.f32 %v7448_v8, %v7448_v8 }
 0x46a   : > { %v2965_v15 = vadd.f32 %v2950_v63, %v2949_v27  ;;  %v5102_v63 = vld [vmem:[%s7629_s3 + $0x30] sm:$0xff] }
 0x46b   : > { %3245 = vmatpush.bf16.msrb.mxu3 %v5102_v63 }
 0x46f   : > { %v7450_v39 = vpop.f32.mrf.mxu0  ;;  %v7452_v41 = vpop.f32.mrf.mxu1 }
 0x470   : > { %v2951_v45 = vmul.f32 %v7450_v39, %v7450_v39  ;;  %v2929_v20 = vadd.f32 %v2928_v44, %v7450_v39  ;;  %v2959_v56 = vmul.f32 %v7452_v41, %v7452_v41 }
 0x472   : > { %v2966_v22 = vadd.f32 %v2965_v15, %v2951_v45 }
 0x477   : > { %v7454_v53 = vpop.f32.mrf.mxu0  ;;  %v7456_v3 = vpop.f32.mrf.mxu1 }
 0x478   : > { %v2952_v1 = vmul.f32 %v7454_v53, %v7454_v53  ;;  %v2930_v59 = vadd.f32 %v2929_v20, %v7454_v53  ;;  %v2960_v21 = vmul.f32 %v7456_v3, %v7456_v3  ;;  %v5101_v20 = vld [vmem:[%s7629_s3 + $0x28] sm:$0xff] }
 0x479   : > { %3246 = vmatpush.bf16.msrb.mxu3 %v5101_v20 }
 0x47a   : > { %v2967_v6 = vadd.f32 %v2966_v22, %v2952_v1 }
 0x47f   : > { %v7458_v2 = vpop.f32.mrf.mxu0  ;;  %v7460_v7 = vpop.f32.mrf.mxu1 }
 0x480   : > { %v2953_v19 = vmul.f32 %v7458_v2, %v7458_v2  ;;  %v2931_v38 = vadd.f32 %v2930_v59, %v7458_v2  ;;  %v2961_v31 = vmul.f32 %v7460_v7, %v7460_v7 }
 0x482   : > { %v2968_v29 = vadd.f32 %v2967_v6, %v2953_v19  ;;  %v5100_v6 = vld [vmem:[%s7629_s3 + $0x20] sm:$0xff] }
 0x483   : > { %3247 = vmatpush.bf16.msrb.mxu3 %v5100_v6 }
 0x487   : > { %v7462_v16 = vpop.f32.mrf.mxu0  ;;  %v7480_v49 = vpop.f32.mrf.mxu1 }
 0x488   : > { %v2954_v14 = vmul.f32 %v7462_v16, %v7462_v16  ;;  %v2932_v43 = vadd.f32 %v2931_v38, %v7462_v16  ;;  %v2962_v42 = vmul.f32 %v7480_v49, %v7480_v49 }
 0x48a   : > { %v2969_v18 = vadd.f32 %v2968_v29, %v2954_v14  ;;  %v5099_v29 = vld [vmem:[%s7629_s3 + $0x18] sm:$0xff] }
 0x48b   : > { %3248 = vmatpush.bf16.msrb.mxu3 %v5099_v29 }
 0x48f   : > { %v7475_v57 = vpop.f32.mrf.mxu0  ;;  %v7497_v5 = vpop.f32.mrf.mxu1 }
 0x490   : > { %v2955_v46 = vmul.f32 %v7475_v57, %v7475_v57  ;;  %v2933_v30 = vadd.f32 %v2932_v43, %v7475_v57  ;;  %v2963_v62 = vmul.f32 %v7497_v5, %v7497_v5 }
 0x492   : > { %v2970_v28 = vadd.f32 %v2969_v18, %v2955_v46 }
 0x497   : > { %v7489_v55 = vpop.f32.mrf.mxu0  ;;  %v7514_v32 = vpop.f32.mrf.mxu1 }
 0x498   : > { %v2934_v52 = vadd.f32 %v2933_v30, %v7489_v55  ;;  %v2956_v36 = vmul.f32 %v7489_v55, %v7489_v55  ;;  %v2964_v58 = vmul.f32 %v7514_v32, %v7514_v32 }
 0x49a   : > { %v2935_v61 = vadd.f32 %v2934_v52, %v7444_v9  ;;  %v2971_v54 = vadd.f32 %v2970_v28, %v2956_v36  ;;  %v5098_v52 = vld [vmem:[%s7629_s3 + $0x10] sm:$0xff] }
 0x49b   : > { %3249 = vmatpush.bf16.msrb.mxu3 %v5098_v52 }
 0x49c   : > { %v2936_v0 = vadd.f32 %v2935_v61, %v7448_v8  ;;  %v2972_v34 = vadd.f32 %v2971_v54, %v2957_v12 }
 0x49e   : > { %v2937_v40 = vadd.f32 %v2936_v0, %v7452_v41  ;;  %v2973_v48 = vadd.f32 %v2972_v34, %v2958_v24 }
 0x4a0   : > { %v2974_v10 = vadd.f32 %v2973_v48, %v2959_v56  ;;  %v2938_v50 = vadd.f32 %v2937_v40, %v7456_v3  ;;  %v5097_v56 = vld [vmem:[%s7629_s3 + $0x8] sm:$0xff] }
 0x4a1   : > { %3250 = vmatpush.bf16.msrb.mxu3 %v5097_v56 }
 0x4a2   : > { %v2939_v33 = vadd.f32 %v2938_v50, %v7460_v7  ;;  %v2975_v13 = vadd.f32 %v2974_v10, %v2960_v21 }
 0x4a4   : > { %v2940_v17 = vadd.f32 %v2939_v33, %v7480_v49  ;;  %v2976_v23 = vadd.f32 %v2975_v13, %v2961_v31 }
 0x4a6   : > { %v2941_v4 = vadd.f32 %v2940_v17, %v7497_v5  ;;  %v2977_v35 = vadd.f32 %v2976_v23, %v2962_v42 }
 0x4a8   : > { %v2942_v47 = vadd.f32 %v2941_v4, %v7514_v32  ;;  %v2978_v25 = vadd.f32 %v2977_v35, %v2963_v62 }
 0x4aa   : > { %v2943_v51 = vrot.slane %v2942_v47, 4  ;;  %v2979_v26 = vadd.f32 %v2978_v25, %v2964_v58 }
 0x4ac   : > { %v2944_v27 = vadd.f32 %v2943_v51, %v2942_v47  ;;  %v2980_v44 = vrot.slane %v2979_v26, 4 }
 0x4ae   : > { %v2945_v45 = vrot.slane %v2944_v27, 2  ;;  %v2981_v15 = vadd.f32 %v2980_v44, %v2979_v26 }
 0x4b0   : > { %v2946_v1 = vadd.f32 %v2945_v45, %v2944_v27  ;;  %v2982_v22 = vrot.slane %v2981_v15, 2 }
 0x4b2   : > { %v2947_v59 = vrot.slane %v2946_v1, 1  ;;  %v2983_v19 = vadd.f32 %v2982_v22, %v2981_v15 }
 0x4b4   : > { %v2948_v38 = vadd.f32 %v2947_v59, %v2946_v1  ;;  %v2984_v14 = vrot.slane %v2983_v19, 1 }
 0x4b6   : > { %v2985_v43 = vadd.f32 %v2984_v14, %v2983_v19  ;;  %v7537_v46 = vmul.f32 0.0078125, %v2948_v38 }
 0x4b8   : > { %v2987_v18 = vmul.f32 0.0078125, %v2985_v43  ;;  %v2988_v30 = vmul.f32 %v7537_v46, %v7537_v46  ;;  %v3006_v28 = vsub.f32 %v7514_v32, %v7537_v46  ;;  %v2997_v12 = vsub.f32 %v7475_v57, %v7537_v46  ;;  %v5096_v57 = vld [vmem:[%s7629_s3] sm:$0xff] }
 0x4b9   : > { %v2998_v61 = vsub.f32 %v7489_v55, %v7537_v46  ;;  %v3003_v24 = vsub.f32 %v7460_v7, %v7537_v46  ;;  %v3004_v0 = vsub.f32 %v7480_v49, %v7537_v46  ;;  %v3005_v34 = vsub.f32 %v7497_v5, %v7537_v46  ;;  %3251 = vmatpush.bf16.msrb.mxu3 %v5096_v57 }
 0x4ba   : > { %v2989_v36 = vsub.f32 %v2987_v18, %v2988_v30  ;;  %v2991_v10 = vsub.f32 %v7442_v37, %v7537_v46  ;;  %v2992_v50 = vsub.f32 %v7446_v60, %v7537_v46  ;;  %v2995_v33 = vsub.f32 %v7458_v2, %v7537_v46 }
 0x4bb   : > { %v2996_v13 = vsub.f32 %v7462_v16, %v7537_v46  ;;  %v2999_v35 = vsub.f32 %v7444_v9, %v7537_v46  ;;  %v3000_v60 = vsub.f32 %v7448_v8, %v7537_v46  ;;  %v3001_v2 = vsub.f32 %v7452_v41, %v7537_v46 }
 0x4bc   : > { %v2990_v54 = vmax.f32 %v2989_v36, 0.0  ;;  %v3002_v25 = vsub.f32 %v7456_v3, %v7537_v46  ;;  %v2993_v18 = vsub.f32 %v7450_v39, %v7537_v46  ;;  %v2994_v30 = vsub.f32 %v7454_v53, %v7537_v46 }
 0x4be   : > { %v3007_v40 = vadd.f32 1e-05, %v2990_v54 }
 0x4c0   : > { %5146 = vrsqrt.f32 %v3007_v40  ;;  %vm3014_vm9 = vweird.f32 %v3007_v40 }
 0x4c6   : > { %v5147_v7 = vpop.eup %5146 }
 0x4c7   : > { %v3009_v55 = vmul.f32 %v5147_v7, %v3007_v40  ;;  %vm3015_vm8 = vweird.f32 %v5147_v7  ;;  %v7582_v40 = vstv %s3293_s19 }
 0x4c8   : > { %vm3016_vm4 = vmor %vm3014_vm9, %vm3015_vm8 }
 0x4c9   : > { %v3010_v48 = vmul.f32 %v5147_v7, %v3009_v55 }
 0x4cb   : > { %v3011_v49 = vmul.f32 0.5, %v3010_v48 }
 0x4cd   : > { %v3012_v21 = vsub.f32 1.5, %v3011_v49 }
 0x4cf   : > { %v3013_v5 = vmul.f32 %v5147_v7, %v3012_v21 }
 0x4d1   : > { %v3017_v31 = vsel %vm3016_vm4, %v5147_v7, %v3013_v5 }
 0x4d2   : > { %v3033_v42 = vmul.f32 %v3017_v31, %v3006_v28  ;;  %v3018_v17 = vmul.f32 %v3017_v31, %v2991_v10  ;;  %v3019_v23 = vmul.f32 %v3017_v31, %v2992_v50  ;;  %v3022_v32 = vmul.f32 %v3017_v31, %v2995_v33 }
 0x4d3   : > { %v3023_v62 = vmul.f32 %v3017_v31, %v2996_v13  ;;  %v3024_v4 = vmul.f32 %v3017_v31, %v2997_v12  ;;  %v3025_v16 = vmul.f32 %v3017_v31, %v2998_v61  ;;  %v3026_v63 = vmul.f32 %v3017_v31, %v2999_v35 }
 0x4d4   : > { %v3034_v37 = vmax.f32 %v3018_v17, 0.0  ;;  %v3035_v11 = vmax.f32 %v3019_v23, 0.0  ;;  %v3038_v47 = vmax.f32 %v3022_v32, 0.0  ;;  %v3027_v27 = vmul.f32 %v3017_v31, %v3000_v60 }
 0x4d5   : > { %v3039_v58 = vmax.f32 %v3023_v62, 0.0  ;;  %v3040_v26 = vmax.f32 %v3024_v4, 0.0  ;;  %v3049_v44 = vmax.f32 %v3033_v42, 0.0  ;;  %v3041_v45 = vmax.f32 %v3025_v16, 0.0 }
 0x4d6   : > { %v3050_v51 = vpack.c.bf16 %v3035_v11, %v3034_v37  ;;  %v3028_v15 = vmul.f32 %v3017_v31, %v3001_v2  ;;  %v3042_v20 = vmax.f32 %v3026_v63, 0.0  ;;  %v3043_v8 = vmax.f32 %v3027_v27, 0.0 }
 0x4d7   : > { %v3052_v9 = vpack.c.bf16 %v3039_v58, %v3038_v47  ;;  %v3029_v1 = vmul.f32 %v3017_v31, %v3002_v25  ;;  %v3030_v22 = vmul.f32 %v3017_v31, %v3003_v24  ;;  %v3053_v41 = vpack.c.bf16 %v3041_v45, %v3040_v26 }
 0x4d8   : > { %3252 = vmatmul.bf16.vlgmr.msrb.gmra.mxu3 %v3050_v51  ;;  %v3044_v59 = vmax.f32 %v3028_v15, 0.0  ;;  %v3031_v19 = vmul.f32 %v3017_v31, %v3004_v0  ;;  %v3032_v6 = vmul.f32 %v3017_v31, %v3005_v34  ;;  %v3054_v38 = vpack.c.bf16 %v3043_v8, %v3042_v20  ;;  %v3156_v34 = vpop.f32.mrf.mxu2 }
 0x4d9   : > { %v3045_v14 = vmax.f32 %v3029_v1, 0.0  ;;  %v3046_v3 = vmax.f32 %v3030_v22, 0.0  ;;  %v3020_v12 = vmul.f32 %v3017_v31, %v2993_v18  ;;  %v3021_v61 = vmul.f32 %v3017_v31, %v2994_v30 }
 0x4da   : > { %v3047_v29 = vmax.f32 %v3031_v19, 0.0  ;;  %v3048_v43 = vmax.f32 %v3032_v6, 0.0 }
 0x4db   : > { %v3055_v28 = vpack.c.bf16 %v3045_v14, %v3044_v59  ;;  %v3036_v54 = vmax.f32 %v3020_v12, 0.0  ;;  %v3037_v24 = vmax.f32 %v3021_v61, 0.0 }
 0x4dc   : > { %v3056_v52 = vpack.c.bf16 %v3047_v29, %v3046_v3  ;;  %v3057_v36 = vpack.c.bf16 %v3049_v44, %v3048_v43 }
 0x4dd   : > { %v3051_v0 = vpack.c.bf16 %v3037_v24, %v3036_v54 }
 0x4e0   : > { %v3158_v56 = vpop.f32.mrf.mxu2 }
 0x4e8   : > { %3257 = vmatmul.bf16.gmra.mxu3 %v3051_v0  ;;  %v3161_v39 = vpop.f32.mrf.mxu2 }
 0x4f0   : > { %v3163_v53 = vpop.f32.mrf.mxu2 }
 0x4f8   : > { %3262 = vmatmul.bf16.gmra.mxu3 %v3052_v9  ;;  %v3166_v21 = vpop.f32.mrf.mxu2 }
 0x500   : > { %v3168_v17 = vpop.f32.mrf.mxu2 }
 0x508   : > { %3267 = vmatmul.bf16.gmra.mxu3 %v3053_v41  ;;  %v3171_v27 = vpop.f32.mrf.mxu2 }
 0x518   : > { %3272 = vmatmul.bf16.gmra.mxu3 %v3054_v38 }
 0x528   : > { %3277 = vmatmul.bf16.gmra.mxu3 %v3055_v28 }
 0x538   : > { %3282 = vmatmul.bf16.gmra.mxu3 %v3056_v52  ;;  %v3173_v52 = vpop.f32.mrf.mxu2 }
 0x548   : > { %3287 = vmatmul.bf16.gmra.mxu3 %v3057_v36 }
 0x55b   : > { %v3253_v46 = vpop.f32.mrf.mxu3 }
 0x55c   : > { %v3254_v57 = vadd.f32 %v3253_v46, %v3156_v34 }
 0x55e   : > { %v3295_v7 = vadd.f32 %v7582_v40, %v3254_v57 }
 0x560   : > { %v4828_v55 = vmul.f32 -1.442695, %v3295_v7 }
 0x562   : > { %5148 = vpow2.f32 %v4828_v55 }
 0x563   : > { %v3255_v48 = vpop.f32.mrf.mxu3 }
 0x564   : > { %v3256_v49 = vadd.f32 %v3255_v48, %v3158_v56 }
 0x566   : > { %v3296_v5 = vadd.f32 %v7582_v40, %v3256_v49 }
 0x568   : > { %v5149_v10 = vpop.eup %5148  ;;  %v4829_v50 = vmul.f32 -1.442695, %v3296_v5 }
 0x569   : > { %v3359_v31 = vadd.f32 1.0, %v5149_v10 }
 0x56a   : > { %5150 = vpow2.f32 %v4829_v50 }
 0x56b   : > { %5152 = vrcp.f32 %v3359_v31  ;;  %v3258_v33 = vpop.f32.mrf.mxu3  ;;  %v3386_v2 = vand.u32 2147483648, %v3359_v31  ;;  %v3384_v58 = vand.u32 2147483647, %v3359_v31  ;;  %vm3380_vm11 = vweird.f32 %v3359_v31 }
 0x56c   : > { %v3259_v13 = vadd.f32 %v3258_v33, %v3161_v39 }
 0x56d   : > { %v3387_v44 = vor.u32 1.1754944e-38, %v3386_v2  ;;  %vm3385_vm13 = vcmp.eq.f32.partialorder %v3384_v58, 8.507059e+37 }
 0x56e   : > { %v3297_v42 = vadd.f32 %v7582_v40, %v3259_v13 }
 0x570   : > { %v5151_v23 = vpop.eup %5150  ;;  %v4830_v32 = vmul.f32 -1.442695, %v3297_v42 }
 0x571   : > { %v5153_v62 = vpop.eup %5152  ;;  %v3360_v4 = vadd.f32 1.0, %v5151_v23 }
 0x572   : > { %v3376_v35 = vmul.f32 %v5153_v62, %v3359_v31  ;;  %5154 = vpow2.f32 %v4830_v32  ;;  %vm3381_vm10 = vweird.f32 %v5153_v62  ;;  %v3176_v31 = vpop.f32.mrf.mxu2 }
 0x573   : > { %5156 = vrcp.f32 %v3360_v4  ;;  %v3260_v37 = vpop.f32.mrf.mxu3  ;;  %vm3382_vm12 = vmor %vm3380_vm11, %vm3381_vm10  ;;  %v3401_v41 = vand.u32 2147483648, %v3360_v4  ;;  %v3399_v19 = vand.u32 2147483647, %v3360_v4  ;;  %vm3395_vm15 = vweird.f32 %v3360_v4 }
 0x574   : > { %v3377_v11 = vsub.f32 1.0, %v3376_v35  ;;  %v3261_v60 = vadd.f32 %v3260_v37, %v3163_v53 }
 0x575   : > { %v3402_v43 = vor.u32 1.1754944e-38, %v3401_v41  ;;  %vm3400_vm1 = vcmp.eq.f32.partialorder %v3399_v19, 8.507059e+37 }
 0x576   : > { %v3378_v47 = vmul.f32 %v5153_v62, %v3377_v11  ;;  %v3298_v16 = vadd.f32 %v7582_v40, %v3261_v60 }
 0x578   : > { %v5155_v25 = vpop.eup %5154  ;;  %v3379_v51 = vadd.f32 %v5153_v62, %v3378_v47  ;;  %v4831_v26 = vmul.f32 -1.442695, %v3298_v16 }
 0x579   : > { %v5157_v63 = vpop.eup %5156  ;;  %v3361_v9 = vadd.f32 1.0, %v5155_v25 }
 0x57a   : > { %v3383_v45 = vsel %vm3382_vm12, %v5153_v62, %v3379_v51  ;;  %v3391_v15 = vmul.f32 %v5157_v63, %v3360_v4  ;;  %5158 = vpow2.f32 %v4831_v26  ;;  %vm3396_vm14 = vweird.f32 %v5157_v63 }
 0x57b   : > { %v3388_v20 = vsel %vm3385_vm13, %v3387_v44, %v3383_v45  ;;  %5160 = vrcp.f32 %v3361_v9  ;;  %v3263_v8 = vpop.f32.mrf.mxu3  ;;  %vm3397_vm0 = vmor %vm3395_vm15, %vm3396_vm14  ;;  %v3416_v24 = vand.u32 2147483648, %v3361_v9  ;;  %v3414_v34 = vand.u32 2147483647, %v3361_v9 }
 0x57c   : > { %3615 = vst [vmem:[%s7593_s24] sm:$0xff] %v3388_v20  ;;  %v3392_v1 = vsub.f32 1.0, %v3391_v15  ;;  %v3264_v22 = vadd.f32 %v3263_v8, %v3166_v21  ;;  %vm3410_vm3 = vweird.f32 %v3361_v9 }
 0x57d   : > { %v3417_v7 = vor.u32 1.1754944e-38, %v3416_v24  ;;  %vm3415_vm6 = vcmp.eq.f32.partialorder %v3414_v34, 8.507059e+37 }
 0x57e   : > { %v3393_v59 = vmul.f32 %v5157_v63, %v3392_v1  ;;  %v3299_v6 = vadd.f32 %v7582_v40, %v3264_v22 }
 0x580   : > { %v5159_v38 = vpop.eup %5158  ;;  %v3394_v14 = vadd.f32 %v5157_v63, %v3393_v59  ;;  %v4832_v3 = vmul.f32 -1.442695, %v3299_v6 }
 0x581   : > { %v5161_v29 = vpop.eup %5160  ;;  %v3362_v18 = vadd.f32 1.0, %v5159_v38 }
 0x582   : > { %v3398_v30 = vsel %vm3397_vm0, %v5157_v63, %v3394_v14  ;;  %v3406_v28 = vmul.f32 %v5161_v29, %v3361_v9  ;;  %5162 = vpow2.f32 %v4832_v3  ;;  %vm3411_vm2 = vweird.f32 %v5161_v29 }
 0x583   : > { %v3403_v36 = vsel %vm3400_vm1, %v3402_v43, %v3398_v30  ;;  %5164 = vrcp.f32 %v3362_v18  ;;  %v3265_v12 = vpop.f32.mrf.mxu3  ;;  %vm3412_vm5 = vmor %vm3410_vm3, %vm3411_vm2  ;;  %v3431_v33 = vand.u32 2147483648, %v3362_v18  ;;  %v3429_v42 = vand.u32 2147483647, %v3362_v18 }
 0x584   : > { %3616 = vst [vmem:[%s7593_s24 + $0x8] sm:$0xff] %v3403_v36  ;;  %v3407_v61 = vsub.f32 1.0, %v3406_v28  ;;  %v3266_v54 = vadd.f32 %v3265_v12, %v3168_v17  ;;  %vm3425_vm8 = vweird.f32 %v3362_v18 }
 0x585   : > { %v3432_v35 = vor.u32 1.1754944e-38, %v3431_v33  ;;  %vm3430_vm4 = vcmp.eq.f32.partialorder %v3429_v42, 8.507059e+37 }
 0x586   : > { %v3408_v0 = vmul.f32 %v5161_v29, %v3407_v61  ;;  %v3300_v56 = vadd.f32 %v7582_v40, %v3266_v54 }
 0x588   : > { %v5163_v39 = vpop.eup %5162  ;;  %v3409_v53 = vadd.f32 %v5161_v29, %v3408_v0  ;;  %v4833_v46 = vmul.f32 -1.442695, %v3300_v56 }
 0x589   : > { %v5165_v57 = vpop.eup %5164  ;;  %v3363_v55 = vadd.f32 1.0, %v5163_v39 }
 0x58a   : > { %v3413_v48 = vsel %vm3412_vm5, %v5161_v29, %v3409_v53  ;;  %v3421_v49 = vmul.f32 %v5165_v57, %v3362_v18  ;;  %5166 = vpow2.f32 %v4833_v46  ;;  %vm3426_vm7 = vweird.f32 %v5165_v57 }
 0x58b   : > { %v3418_v21 = vsel %vm3415_vm6, %v3417_v7, %v3413_v48  ;;  %5168 = vrcp.f32 %v3363_v55  ;;  %v3268_v5 = vpop.f32.mrf.mxu3  ;;  %vm3427_vm9 = vmor %vm3425_vm8, %vm3426_vm7  ;;  %v3446_v25 = vand.u32 2147483648, %v3363_v55  ;;  %v3444_v26 = vand.u32 2147483647, %v3363_v55 }
 0x58c   : > { %3617 = vst [vmem:[%s7593_s24 + $0x10] sm:$0xff] %v3418_v21  ;;  %v3422_v10 = vsub.f32 1.0, %v3421_v49  ;;  %v3269_v50 = vadd.f32 %v3268_v5, %v3171_v27  ;;  %v3178_v27 = vpop.f32.mrf.mxu2  ;;  %vm3440_vm11 = vweird.f32 %v3363_v55 }
 0x58d   : > { %v3447_v20 = vor.u32 1.1754944e-38, %v3446_v25  ;;  %vm3445_vm13 = vcmp.eq.f32.partialorder %v3444_v26, 8.507059e+37 }
 0x58e   : > { %v3423_v13 = vmul.f32 %v5165_v57, %v3422_v10  ;;  %v3301_v17 = vadd.f32 %v7582_v40, %v3269_v50 }
 0x590   : > { %v5167_v23 = vpop.eup %5166  ;;  %v3424_v32 = vadd.f32 %v5165_v57, %v3423_v13  ;;  %v4834_v62 = vmul.f32 -1.442695, %v3301_v17 }
 0x591   : > { %v5169_v4 = vpop.eup %5168  ;;  %v3364_v37 = vadd.f32 1.0, %v5167_v23 }
 0x592   : > { %v3428_v11 = vsel %vm3427_vm9, %v5165_v57, %v3424_v32  ;;  %v3436_v60 = vmul.f32 %v5169_v4, %v3363_v55  ;;  %5170 = vpow2.f32 %v4834_v62  ;;  %vm3441_vm10 = vweird.f32 %v5169_v4 }
 0x593   : > { %v3433_v2 = vsel %vm3430_vm4, %v3432_v35, %v3428_v11  ;;  %5172 = vrcp.f32 %v3364_v37  ;;  %v3270_v47 = vpop.f32.mrf.mxu3  ;;  %vm3442_vm12 = vmor %vm3440_vm11, %vm3441_vm10  ;;  %v3461_v38 = vand.u32 2147483648, %v3364_v37  ;;  %v3459_v3 = vand.u32 2147483647, %v3364_v37 }
 0x594   : > { %3618 = vst [vmem:[%s7593_s24 + $0x18] sm:$0xff] %v3433_v2  ;;  %v3437_v58 = vsub.f32 1.0, %v3436_v60  ;;  %v3271_v16 = vadd.f32 %v3270_v47, %v3173_v52  ;;  %vm3455_vm15 = vweird.f32 %v3364_v37  ;;  %v3181_v52 = vpop.f32.mrf.mxu2 }
 0x595   : > { %v3462_v36 = vor.u32 1.1754944e-38, %v3461_v38  ;;  %vm3460_vm1 = vcmp.eq.f32.partialorder %v3459_v3, 8.507059e+37 }
 0x596   : > { %v3438_v51 = vmul.f32 %v5169_v4, %v3437_v58  ;;  %v3302_v63 = vadd.f32 %v7582_v40, %v3271_v16 }
 0x598   : > { %v5171_v44 = vpop.eup %5170  ;;  %v3439_v9 = vadd.f32 %v5169_v4, %v3438_v51  ;;  %v4835_v45 = vmul.f32 -1.442695, %v3302_v63 }
 0x599   : > { %v5173_v15 = vpop.eup %5172  ;;  %v3365_v8 = vadd.f32 1.0, %v5171_v44 }
 0x59a   : > { %v3443_v1 = vsel %vm3442_vm12, %v5169_v4, %v3439_v9  ;;  %v3451_v22 = vmul.f32 %v5173_v15, %v3364_v37  ;;  %5174 = vpow2.f32 %v4835_v45  ;;  %vm3456_vm14 = vweird.f32 %v5173_v15 }
 0x59b   : > { %v3448_v41 = vsel %vm3445_vm13, %v3447_v20, %v3443_v1  ;;  %5176 = vrcp.f32 %v3365_v8  ;;  %v3273_v59 = vpop.f32.mrf.mxu3  ;;  %vm3457_vm0 = vmor %vm3455_vm15, %vm3456_vm14  ;;  %v3476_v39 = vand.u32 2147483648, %v3365_v8  ;;  %v3474_v46 = vand.u32 2147483647, %v3365_v8 }
 0x59c   : > { %3619 = vst [vmem:[%s7593_s24 + $0x20] sm:$0xff] %v3448_v41  ;;  %v3452_v19 = vsub.f32 1.0, %v3451_v22  ;;  %v3274_v6 = vadd.f32 %v3273_v59, %v3176_v31  ;;  %vm3470_vm3 = vweird.f32 %v3365_v8  ;;  %v3183_v31 = vpop.f32.mrf.mxu2 }
 0x59d   : > { %v3477_v21 = vor.u32 1.1754944e-38, %v3476_v39  ;;  %vm3475_vm6 = vcmp.eq.f32.partialorder %v3474_v46, 8.507059e+37 }
 0x59e   : > { %v3453_v14 = vmul.f32 %v5173_v15, %v3452_v19  ;;  %v3303_v29 = vadd.f32 %v7582_v40, %v3274_v6 }
 0x5a0   : > { %v5175_v43 = vpop.eup %5174  ;;  %v3454_v18 = vadd.f32 %v5173_v15, %v3453_v14  ;;  %v4836_v30 = vmul.f32 -1.442695, %v3303_v29 }
 0x5a1   : > { %v5177_v28 = vpop.eup %5176  ;;  %v3366_v12 = vadd.f32 1.0, %v5175_v43 }
 0x5a2   : > { %v3458_v61 = vsel %vm3457_vm0, %v5173_v15, %v3454_v18  ;;  %v3466_v54 = vmul.f32 %v5177_v28, %v3365_v8  ;;  %5178 = vpow2.f32 %v4836_v30  ;;  %vm3471_vm2 = vweird.f32 %v5177_v28 }
 0x5a3   : > { %v3463_v24 = vsel %vm3460_vm1, %v3462_v36, %v3458_v61  ;;  %5180 = vrcp.f32 %v3366_v12  ;;  %v3275_v0 = vpop.f32.mrf.mxu3  ;;  %vm3472_vm5 = vmor %vm3470_vm3, %vm3471_vm2  ;;  %v3491_v23 = vand.u32 2147483648, %v3366_v12  ;;  %v3489_v62 = vand.u32 2147483647, %v3366_v12 }
 0x5a4   : > { %3620 = vst [vmem:[%s7593_s24 + $0x28] sm:$0xff] %v3463_v24  ;;  %v3467_v34 = vsub.f32 1.0, %v3466_v54  ;;  %v3276_v56 = vadd.f32 %v3275_v0, %v3178_v27  ;;  %vm3485_vm8 = vweird.f32 %v3366_v12  ;;  %v3186_v27 = vpop.f32.mrf.mxu2 }
 0x5a5   : > { %v3492_v2 = vor.u32 1.1754944e-38, %v3491_v23  ;;  %vm3490_vm4 = vcmp.eq.f32.partialorder %v3489_v62, 8.507059e+37 }
 0x5a6   : > { %v3468_v53 = vmul.f32 %v5177_v28, %v3467_v34  ;;  %v3304_v57 = vadd.f32 %v7582_v40, %v3276_v56 }
 0x5a8   : > { %v5179_v7 = vpop.eup %5178  ;;  %v3469_v55 = vadd.f32 %v5177_v28, %v3468_v53  ;;  %v4837_v48 = vmul.f32 -1.442695, %v3304_v57 }
 0x5a9   : > { %v5181_v49 = vpop.eup %5180  ;;  %v3367_v5 = vadd.f32 1.0, %v5179_v7 }
 0x5aa   : > { %v3473_v10 = vsel %vm3472_vm5, %v5177_v28, %v3469_v55  ;;  %v3481_v50 = vmul.f32 %v5181_v49, %v3366_v12  ;;  %5182 = vpow2.f32 %v4837_v48  ;;  %vm3486_vm7 = vweird.f32 %v5181_v49 }
 0x5ab   : > { %v3478_v33 = vsel %vm3475_vm6, %v3477_v21, %v3473_v10  ;;  %5184 = vrcp.f32 %v3367_v5  ;;  %v3278_v13 = vpop.f32.mrf.mxu3  ;;  %vm3487_vm9 = vmor %vm3485_vm8, %vm3486_vm7  ;;  %v3506_v44 = vand.u32 2147483648, %v3367_v5  ;;  %v3504_v45 = vand.u32 2147483647, %v3367_v5 }
 0x5ac   : > { %3621 = vst [vmem:[%s7593_s24 + $0x30] sm:$0xff] %v3478_v33  ;;  %v3482_v42 = vsub.f32 1.0, %v3481_v50  ;;  %v3279_v17 = vadd.f32 %v3278_v13, %v3181_v52  ;;  %vm3500_vm11 = vweird.f32 %v3367_v5  ;;  %v3188_v52 = vpop.f32.mrf.mxu2 }
 0x5ad   : > { %v3507_v41 = vor.u32 1.1754944e-38, %v3506_v44  ;;  %vm3505_vm13 = vcmp.eq.f32.partialorder %v3504_v45, 8.507059e+37 }
 0x5ae   : > { %v3483_v32 = vmul.f32 %v5181_v49, %v3482_v42  ;;  %v3305_v4 = vadd.f32 %v7582_v40, %v3279_v17 }
 0x5b0   : > { %v5183_v35 = vpop.eup %5182  ;;  %v3484_v37 = vadd.f32 %v5181_v49, %v3483_v32  ;;  %v4838_v11 = vmul.f32 -1.442695, %v3305_v4 }
 0x5b1   : > { %v5185_v60 = vpop.eup %5184  ;;  %v3368_v47 = vadd.f32 1.0, %v5183_v35 }
 0x5b2   : > { %v3488_v58 = vsel %vm3487_vm9, %v5181_v49, %v3484_v37  ;;  %v3496_v16 = vmul.f32 %v5185_v60, %v3367_v5  ;;  %5186 = vpow2.f32 %v4838_v11  ;;  %vm3501_vm10 = vweird.f32 %v5185_v60 }
 0x5b3   : > { %v3493_v25 = vsel %vm3490_vm4, %v3492_v2, %v3488_v58  ;;  %5188 = vrcp.f32 %v3368_v47  ;;  %v3280_v51 = vpop.f32.mrf.mxu3  ;;  %vm3502_vm12 = vmor %vm3500_vm11, %vm3501_vm10  ;;  %v3521_v43 = vand.u32 2147483648, %v3368_v47  ;;  %v3519_v30 = vand.u32 2147483647, %v3368_v47 }
 0x5b4   : > { %3622 = vst [vmem:[%s7593_s24 + $0x38] sm:$0xff] %v3493_v25  ;;  %v3497_v26 = vsub.f32 1.0, %v3496_v16  ;;  %v3281_v63 = vadd.f32 %v3280_v51, %v3183_v31  ;;  %vm3515_vm15 = vweird.f32 %v3368_v47  ;;  %v3191_v31 = vpop.f32.mrf.mxu2 }
 0x5b5   : > { %v3522_v24 = vor.u32 1.1754944e-38, %v3521_v43  ;;  %vm3520_vm1 = vcmp.eq.f32.partialorder %v3519_v30, 8.507059e+37 }
 0x5b6   : > { %v3498_v9 = vmul.f32 %v5185_v60, %v3497_v26  ;;  %v3306_v15 = vadd.f32 %v7582_v40, %v3281_v63 }
 0x5b8   : > { %v5187_v20 = vpop.eup %5186  ;;  %v3499_v8 = vadd.f32 %v5185_v60, %v3498_v9  ;;  %v4839_v1 = vmul.f32 -1.442695, %v3306_v15 }
 0x5b9   : > { %v5189_v22 = vpop.eup %5188  ;;  %v3369_v59 = vadd.f32 1.0, %v5187_v20 }
 0x5ba   : > { %v3503_v19 = vsel %vm3502_vm12, %v5185_v60, %v3499_v8  ;;  %v3511_v6 = vmul.f32 %v5189_v22, %v3368_v47  ;;  %5190 = vpow2.f32 %v4839_v1  ;;  %vm3516_vm14 = vweird.f32 %v5189_v22 }
 0x5bb   : > { %v3508_v38 = vsel %vm3505_vm13, %v3507_v41, %v3503_v19  ;;  %5192 = vrcp.f32 %v3369_v59  ;;  %v3283_v14 = vpop.f32.mrf.mxu3  ;;  %vm3517_vm0 = vmor %vm3515_vm15, %vm3516_vm14  ;;  %v3536_v7 = vand.u32 2147483648, %v3369_v59  ;;  %v3534_v48 = vand.u32 2147483647, %v3369_v59 }
 0x5bc   : > { %3623 = vst [vmem:[%s7593_s24 + $0x40] sm:$0xff] %v3508_v38  ;;  %v3512_v3 = vsub.f32 1.0, %v3511_v6  ;;  %v3284_v29 = vadd.f32 %v3283_v14, %v3186_v27  ;;  %vm3530_vm3 = vweird.f32 %v3369_v59  ;;  %v3193_v27 = vpop.f32.mrf.mxu2 }
 0x5bd   : > { %v3537_v33 = vor.u32 1.1754944e-38, %v3536_v7  ;;  %vm3535_vm6 = vcmp.eq.f32.partialorder %v3534_v48, 8.507059e+37 }
 0x5be   : > { %v3513_v18 = vmul.f32 %v5189_v22, %v3512_v3  ;;  %v3307_v28 = vadd.f32 %v7582_v40, %v3284_v29 }
 0x5c0   : > { %v5191_v36 = vpop.eup %5190  ;;  %v3514_v12 = vadd.f32 %v5189_v22, %v3513_v18  ;;  %v4840_v61 = vmul.f32 -1.442695, %v3307_v28 }
 0x5c1   : > { %v5193_v54 = vpop.eup %5192  ;;  %v3370_v0 = vadd.f32 1.0, %v5191_v36 }
 0x5c2   : > { %v3518_v34 = vsel %vm3517_vm0, %v5189_v22, %v3514_v12  ;;  %v3526_v56 = vmul.f32 %v5193_v54, %v3369_v59  ;;  %5194 = vpow2.f32 %v4840_v61  ;;  %vm3531_vm2 = vweird.f32 %v5193_v54 }
 0x5c3   : > { %v3523_v39 = vsel %vm3520_vm1, %v3522_v24, %v3518_v34  ;;  %5196 = vrcp.f32 %v3370_v0  ;;  %v3285_v53 = vpop.f32.mrf.mxu3  ;;  %vm3532_vm5 = vmor %vm3530_vm3, %vm3531_vm2  ;;  %v3551_v35 = vand.u32 2147483648, %v3370_v0  ;;  %v3549_v11 = vand.u32 2147483647, %v3370_v0 }
 0x5c4   : > { %3624 = vst [vmem:[%s7593_s24 + $0x48] sm:$0xff] %v3523_v39  ;;  %v3527_v46 = vsub.f32 1.0, %v3526_v56  ;;  %v3286_v57 = vadd.f32 %v3285_v53, %v3188_v52  ;;  %vm3545_vm8 = vweird.f32 %v3370_v0 }
 0x5c5   : > { %v3552_v25 = vor.u32 1.1754944e-38, %v3551_v35  ;;  %vm3550_vm4 = vcmp.eq.f32.partialorder %v3549_v11, 8.507059e+37 }
 0x5c6   : > { %v3528_v55 = vmul.f32 %v5193_v54, %v3527_v46  ;;  %v3308_v49 = vadd.f32 %v7582_v40, %v3286_v57 }
 0x5c8   : > { %v5195_v21 = vpop.eup %5194  ;;  %v3529_v5 = vadd.f32 %v5193_v54, %v3528_v55  ;;  %v4841_v10 = vmul.f32 -1.442695, %v3308_v49 }
 0x5c9   : > { %v5197_v50 = vpop.eup %5196  ;;  %v3371_v13 = vadd.f32 1.0, %v5195_v21 }
 0x5ca   : > { %v3533_v42 = vsel %vm3532_vm5, %v5193_v54, %v3529_v5  ;;  %v3541_v17 = vmul.f32 %v5197_v50, %v3370_v0  ;;  %5198 = vpow2.f32 %v4841_v10  ;;  %vm3546_vm7 = vweird.f32 %v5197_v50 }
 0x5cb   : > { %v3538_v23 = vsel %vm3535_vm6, %v3537_v33, %v3533_v42  ;;  %5200 = vrcp.f32 %v3371_v13  ;;  %v3288_v32 = vpop.f32.mrf.mxu3  ;;  %vm3547_vm9 = vmor %vm3545_vm8, %vm3546_vm7  ;;  %v3566_v20 = vand.u32 2147483648, %v3371_v13  ;;  %v3564_v1 = vand.u32 2147483647, %v3371_v13 }
 0x5cc   : > { %3625 = vst [vmem:[%s7593_s24 + $0x50] sm:$0xff] %v3538_v23  ;;  %v3542_v62 = vsub.f32 1.0, %v3541_v17  ;;  %v3289_v4 = vadd.f32 %v3288_v32, %v3191_v31  ;;  %vm3560_vm11 = vweird.f32 %v3371_v13 }
 0x5cd   : > { %v3567_v38 = vor.u32 1.1754944e-38, %v3566_v20  ;;  %vm3565_vm13 = vcmp.eq.f32.partialorder %v3564_v1, 8.507059e+37 }
 0x5ce   : > { %v3543_v37 = vmul.f32 %v5197_v50, %v3542_v62  ;;  %v3309_v60 = vadd.f32 %v7582_v40, %v3289_v4 }
 0x5d0   : > { %v5199_v2 = vpop.eup %5198  ;;  %v3544_v47 = vadd.f32 %v5197_v50, %v3543_v37  ;;  %v4842_v58 = vmul.f32 -1.442695, %v3309_v60 }
 0x5d1   : > { %v5201_v16 = vpop.eup %5200  ;;  %v3372_v51 = vadd.f32 1.0, %v5199_v2 }
 0x5d2   : > { %v3548_v26 = vsel %vm3547_vm9, %v5197_v50, %v3544_v47  ;;  %v3556_v63 = vmul.f32 %v5201_v16, %v3371_v13  ;;  %5202 = vpow2.f32 %v4842_v58  ;;  %vm3561_vm10 = vweird.f32 %v5201_v16 }
 0x5d3   : > { %v3553_v44 = vsel %vm3550_vm4, %v3552_v25, %v3548_v26  ;;  %5204 = vrcp.f32 %v3372_v51  ;;  %v3290_v9 = vpop.f32.mrf.mxu3  ;;  %vm3562_vm12 = vmor %vm3560_vm11, %vm3561_vm10  ;;  %v3581_v30 = vand.u32 2147483648, %v3372_v51  ;;  %vm3575_vm15 = vweird.f32 %v3372_v51 }
 0x5d4   : > { %3626 = vst [vmem:[%s7593_s24 + $0x58] sm:$0xff] %v3553_v44  ;;  %v3557_v45 = vsub.f32 1.0, %v3556_v63  ;;  %v3291_v15 = vadd.f32 %v3290_v9, %v3193_v27 }
 0x5d5   : > { %v3582_v61 = vor.u32 1.1754944e-38, %v3581_v30 }
 0x5d6   : > { %v3558_v8 = vmul.f32 %v5201_v16, %v3557_v45  ;;  %v3310_v22 = vadd.f32 %v7582_v40, %v3291_v15  ;;  %v3579_v40 = vand.u32 2147483647, %v3372_v51 }
 0x5d8   : > { %v5203_v41 = vpop.eup %5202  ;;  %v3559_v59 = vadd.f32 %v5201_v16, %v3558_v8  ;;  %v4843_v19 = vmul.f32 -1.442695, %v3310_v22  ;;  %vm3580_vm1 = vcmp.eq.f32.partialorder %v3579_v40, 8.507059e+37 }
 0x5d9   : > { %v5205_v6 = vpop.eup %5204  ;;  %v3373_v14 = vadd.f32 1.0, %v5203_v41 }
 0x5da   : > { %v3563_v3 = vsel %vm3562_vm12, %v5201_v16, %v3559_v59  ;;  %v3571_v29 = vmul.f32 %v5205_v6, %v3372_v51  ;;  %5206 = vpow2.f32 %v4843_v19  ;;  %vm3576_vm14 = vweird.f32 %v5205_v6 }
 0x5db   : > { %v3568_v43 = vsel %vm3565_vm13, %v3567_v38, %v3563_v3  ;;  %5208 = vrcp.f32 %v3373_v14  ;;  %vm3577_vm0 = vmor %vm3575_vm15, %vm3576_vm14  ;;  %v3596_v39 = vand.u32 2147483648, %v3373_v14  ;;  %v3594_v46 = vand.u32 2147483647, %v3373_v14 }
 0x5dc   : > { %3627 = vst [vmem:[%s7593_s24 + $0x60] sm:$0xff] %v3568_v43  ;;  %v3572_v18 = vsub.f32 1.0, %v3571_v29  ;;  %vm3590_vm3 = vweird.f32 %v3373_v14 }
 0x5dd   : > { %v3597_v55 = vor.u32 1.1754944e-38, %v3596_v39  ;;  %vm3595_vm6 = vcmp.eq.f32.partialorder %v3594_v46, 8.507059e+37 }
 0x5de   : > { %v3573_v28 = vmul.f32 %v5205_v6, %v3572_v18 }
 0x5e0   : > { %v5207_v52 = vpop.eup %5206  ;;  %v3574_v36 = vadd.f32 %v5205_v6, %v3573_v28 }
 0x5e1   : > { %v5209_v12 = vpop.eup %5208  ;;  %v3374_v54 = vadd.f32 1.0, %v5207_v52 }
 0x5e2   : > { %v3578_v24 = vsel %vm3577_vm0, %v5205_v6, %v3574_v36  ;;  %v3586_v0 = vmul.f32 %v5209_v12, %v3373_v14  ;;  %vm3591_vm2 = vweird.f32 %v5209_v12 }
 0x5e3   : > { %v3583_v34 = vsel %vm3580_vm1, %v3582_v61, %v3578_v24  ;;  %5210 = vrcp.f32 %v3374_v54  ;;  %vm3592_vm5 = vmor %vm3590_vm3, %vm3591_vm2  ;;  %v3611_v10 = vand.u32 2147483648, %v3374_v54  ;;  %v3609_v31 = vand.u32 2147483647, %v3374_v54 }
 0x5e4   : > { %3628 = vst [vmem:[%s7593_s24 + $0x68] sm:$0xff] %v3583_v34  ;;  %v3587_v56 = vsub.f32 1.0, %v3586_v0  ;;  %vm3605_vm8 = vweird.f32 %v3374_v54 }
 0x5e5   : > { %v3612_v13 = vor.u32 1.1754944e-38, %v3611_v10  ;;  %vm3610_vm4 = vcmp.eq.f32.partialorder %v3609_v31, 8.507059e+37 }
 0x5e6   : > { %v3588_v53 = vmul.f32 %v5209_v12, %v3587_v56 }
 0x5e8   : > { %v3589_v57 = vadd.f32 %v5209_v12, %v3588_v53 }
 0x5e9   : > { %v5211_v7 = vpop.eup %5210 }
 0x5ea   : > { %v3593_v48 = vsel %vm3592_vm5, %v5209_v12, %v3589_v57  ;;  %v3601_v49 = vmul.f32 %v5211_v7, %v3374_v54  ;;  %vm3606_vm7 = vweird.f32 %v5211_v7 }
 0x5eb   : > { %v3598_v21 = vsel %vm3595_vm6, %v3597_v55, %v3593_v48  ;;  %vm3607_vm9 = vmor %vm3605_vm8, %vm3606_vm7 }
 0x5ec   : > { %3629 = vst [vmem:[%s7593_s24 + $0x70] sm:$0xff] %v3598_v21  ;;  %v3602_v5 = vsub.f32 1.0, %v3601_v49 }
 0x5ee   : > { %v3603_v50 = vmul.f32 %v5211_v7, %v3602_v5 }
 0x5f0   : > { %v3604_v33 = vadd.f32 %v5211_v7, %v3603_v50 }
 0x5f2   : > { %v3608_v42 = vsel %vm3607_vm9, %v5211_v7, %v3604_v33 }
 0x5f3   : > { %v3613_v17 = vsel %vm3610_vm4, %v3612_v13, %v3608_v42 }
 0x5f4   : > { %3630 = vst [vmem:[%s7593_s24 + $0x78] sm:$0xff] %v3613_v17 }
 0x5f5 PF: > { %s18_s26 = sadd.s32 1, %s5218_s26  }
 0x5f6   : > { %p15_p4 = scmp.ge.s32.totalorder %s18_s26, 5  }
 0x5f8   :  { %17 = sbr.rel (!%p15_p4) target bundleno = 2 (0x2), region = 85 }

</bundles_post_ra>
